<compile_context>
chip_gen: v7x
topology: tpu7x:2x2x1
jax: 0.10.0
libtpu: 0.0.40
codegen_flags: <defaults>
</compile_context>

<pallas_src>
import functools
import math

import jax
import jax.numpy as jnp
from jax import lax
from jax.experimental import pallas as pl
from jax.experimental.pallas import tpu as pltpu


def _rup(x, m):
    return ((x + m - 1) // m) * m


def _silu(x):
    return x * (1.0 / (1.0 + jnp.exp(-x)))


def _softplus(x):
    # matches F.softplus (threshold 20)
    return jnp.where(x > 20.0, x, jnp.log1p(jnp.exp(x)))


def _padded_vmem_bytes(shape, dtype):
    """Rough VMEM footprint after (sublane, lane) tile padding."""
    itemsize = jnp.dtype(dtype).itemsize
    sub = 8 * (4 // itemsize)
    if len(shape) == 0:
        return 4
    if len(shape) == 1:
        return _rup(shape[0], 128) * itemsize
    lead = 1
    for s in shape[:-2]:
        lead *= s
    return lead * _rup(shape[-2], sub) * _rup(shape[-1], 128) * itemsize


def _mamba_stack_kernel(
    # inputs
    x_hbm,        # (L_pad, B, d_model) f32 in HBM (pl.ANY), read once at layer 0
    w_in_ref,     # (1, d_model, 2*dpad)      bf16  columns [x-branch | z-gate], lane-padded groups
    w_conv_ref,   # (1, d_conv, d_inner)      f32
    b_conv_ref,   # (1, 1, d_inner)           f32
    w_x_ref,      # (1, d_inner, 2*spad)      bf16  columns [B | C], lane-padded groups
    w_xdt_ref,    # (1, d_inner, dt_rank)     f32   dt_low projection (f32 dt path)
    w_dt_ref,     # (1, dt_rank, d_inner)     f32
    b_dt_ref,     # (1, 1, d_inner)           f32
    A_ref,        # (1, d_state, d_inner)     f32   = -exp(A_log), transposed
    D_ref,        # (1, 1, d_inner)           f32
    w_out_ref,    # (1, d_inner, d_model)     bf16
    # output: constant block index -> stays resident in VMEM across the whole
    # grid and doubles as the carried activation between layers.
    out_ref,      # (L_pad, B, d_model)       f32
    # scratch (persist across grid iterations)
    dA_scr,       # (Tc, B, d_state, d_inner) bf16
    dBu_scr,      # (Tc, B, d_state, d_inner) bf16
    c_scr,        # (Tc, B, d_state, 1)       f32
    y_scr,        # (Tc, B, d_inner)          f32
    h_scr,        # (B, d_state, d_inner)     f32   scan state carried across chunks
    tail_scr,     # (d_conv-1, B, d_inner)    f32   conv tail carried across chunks
    dma_sem,      # DMA semaphore
    *, Tc, Bsz, d_model, d_inner, d_state, d_conv, dt_rank, dpad, spad, G,
):
    f32 = jnp.float32
    bf16 = jnp.bfloat16
    layer = pl.program_id(0)
    chunk = pl.program_id(1)
    c0 = pl.multiple_of(chunk * Tc, Tc)
    rows = Tc * Bsz

    # ---- (layer 0, chunk 0): DMA kernel input into the resident output block --
    @pl.when(jnp.logical_and(layer == 0, chunk == 0))
    def _():
        cp = pltpu.make_async_copy(x_hbm, out_ref, dma_sem)
        cp.start()
        cp.wait()

    # ---- start of each layer: reset scan state and conv tail ------------------
    @pl.when(chunk == 0)
    def _():
        h_scr[...] = jnp.zeros_like(h_scr)
        tail_scr[...] = jnp.zeros_like(tail_scr)

    # ---- this chunk's activation ----------------------------------------------
    xs = out_ref[pl.ds(c0, Tc)]                          # (Tc, B, d_model) f32
    x2 = xs.reshape(rows, d_model)

    # ---- fused in_proj [x | z] (bf16 MXU, f32 acc); lane-aligned groups --------
    xz = jnp.dot(x2.astype(bf16), w_in_ref[0], preferred_element_type=f32)
    xp = xz[:, 0:d_inner]                                # group starts at lane 0
    z = xz[:, dpad:dpad + d_inner]                       # group starts at 128-lane boundary

    # ---- causal depthwise conv1d via shifted views (VPU) -----------------------
    xp3 = xp.reshape(Tc, Bsz, d_inner)
    convin = jnp.concatenate([tail_scr[...], xp3], axis=0)   # (Tc+d_conv-1, B, d_inner)
    tail_scr[...] = convin[Tc:]                          # carry last d_conv-1 rows
    w_conv = w_conv_ref[0]                               # (d_conv, d_inner)
    acc = jnp.broadcast_to(b_conv_ref[0][None], (Tc, Bsz, d_inner))
    for k in range(d_conv):                              # tiny static unroll
        acc = acc + convin[k:k + Tc] * w_conv[k]
    xc3 = _silu(acc)                                     # (Tc, B, d_inner)
    xc2 = xc3.reshape(rows, d_inner)

    # ---- x_proj: fused bf16 [B | C] + f32 dt path (precision-sensitive) --------
    xbc = jnp.dot(xc2.astype(bf16), w_x_ref[0], preferred_element_type=f32)
    Bm = xbc[:, 0:d_state]                               # (rows, d_state)
    Cm = xbc[:, spad:spad + d_state]                     # (rows, d_state)
    dt_low = jnp.dot(xc2, w_xdt_ref[0], preferred_element_type=f32)
    dt = _softplus(jnp.dot(dt_low, w_dt_ref[0], preferred_element_type=f32)
                   + b_dt_ref[0])                        # (rows, d_inner) f32

    # ---- hoisted scan setup (exp / outer products once per chunk) --------------
    A_T = A_ref[0]                                       # (d_state, d_inner)
    dt3 = dt.reshape(Tc, Bsz, d_inner)
    u3 = (dt * xc2).reshape(Tc, Bsz, d_inner)            # delta * conv_out
    dA_scr[...] = jnp.exp(dt3[:, :, None, :] * A_T[None, None, :, :]).astype(bf16)
    dBu_scr[...] = (Bm.reshape(Tc, Bsz, d_state)[:, :, :, None]
                    * u3[:, :, None, :]).astype(bf16)
    c_scr[...] = Cm.reshape(Tc, Bsz, d_state)[:, :, :, None]

    # ---- selective scan: serial over time, grouped (slab) y stores -------------
    def group_body(g, h):
        t0 = pl.multiple_of(g * G, G)
        ys = []
        for k in range(G):                               # static unroll inside group
            t = t0 + k
            h = dA_scr[t].astype(f32) * h + dBu_scr[t].astype(f32)
            ys.append(jnp.sum(c_scr[t] * h, axis=1))     # (B, d_inner), lane broadcast of C
        y_scr[pl.ds(t0, G)] = jnp.stack(ys, axis=0)      # one dense store per group
        return h

    h_fin = lax.fori_loop(0, Tc // G, group_body, h_scr[...])
    h_scr[...] = h_fin

    # ---- D skip, silu(z) gate, out_proj; write chunk back into resident block --
    y2 = y_scr[...].reshape(rows, d_inner)
    y2 = (y2 + D_ref[0] * xc2) * _silu(z)
    out2 = jnp.dot(y2.astype(bf16), w_out_ref[0], preferred_element_type=f32)
    out_ref[pl.ds(c0, Tc)] = out2.reshape(Tc, Bsz, d_model)


def _choose_chunk(L, Bsz, d_inner, d_state, budget_bytes=20 << 20):
    """Largest chunk (multiple of 8) whose scan scratches + temporaries fit the budget."""
    per_t = (2 * Bsz * _padded_vmem_bytes((d_state, d_inner), jnp.bfloat16)   # dA + dBu
             + Bsz * _padded_vmem_bytes((d_state, 1), jnp.float32)            # C
             + _padded_vmem_bytes((Bsz, d_inner), jnp.float32)                # y
             + 2 * Bsz * _padded_vmem_bytes((d_state, d_inner), jnp.float32))  # f32 temporaries
    cap = max(8, (budget_bytes // per_t) // 8 * 8)
    cap = min(cap, 512)                                  # matmul M is plenty by then
    return int(min(_rup(L, 8), cap))


def mamba_stack(x_lb, params, *, d_state, d_conv):
    """Apply the full fused Mamba stack to x_lb of shape (L, B, d_model)."""
    L, Bsz, d_model = x_lb.shape
    num_layers, dt_rank, d_inner = params["w_dt"].shape
    dpad = params["w_in"].shape[2] // 2
    spad = params["w_x"].shape[2] // 2

    Tc = _choose_chunk(L, Bsz, d_inner, d_state)
    G = 8
    assert Tc % G == 0
    L_pad = _rup(L, Tc)
    num_chunks = L_pad // Tc
    if L_pad != L:
        # padded (trailing) timesteps are causal-safe: they never influence real rows
        x_lb = jnp.pad(x_lb, ((0, L_pad - L), (0, 0), (0, 0)))

    kernel = functools.partial(
        _mamba_stack_kernel, Tc=Tc, Bsz=Bsz, d_model=d_model, d_inner=d_inner,
        d_state=d_state, d_conv=d_conv, dt_rank=dt_rank, dpad=dpad, spad=spad, G=G)

    names = ["w_in", "w_conv", "b_conv", "w_x", "w_xdt", "w_dt", "b_dt",
             "A_T", "D", "w_out"]
    weights = [params[n] for n in names]

    def _w_spec(w):
        return pl.BlockSpec((1,) + w.shape[1:],
                            lambda l, c, _n=w.ndim - 1: (l,) + (0,) * _n)

    in_specs = [pl.BlockSpec(memory_space=pl.ANY)]       # x stays in HBM
    in_specs += [_w_spec(w) for w in weights]

    scratch_specs = [
        ((Tc, Bsz, d_state, d_inner), jnp.bfloat16),     # dA
        ((Tc, Bsz, d_state, d_inner), jnp.bfloat16),     # dB*u
        ((Tc, Bsz, d_state, 1), jnp.float32),            # C
        ((Tc, Bsz, d_inner), jnp.float32),               # y
        ((Bsz, d_state, d_inner), jnp.float32),          # h carry
        ((d_conv - 1, Bsz, d_inner), jnp.float32),       # conv tail carry
    ]
    scratch_shapes = [pltpu.VMEM(s, d) for s, d in scratch_specs]
    scratch_shapes.append(pltpu.SemaphoreType.DMA(()))

    # explicit VMEM budget: scratches + double-buffered weights + resident out block
    est = sum(_padded_vmem_bytes(s, d) for s, d in scratch_specs)
    est += sum(2 * _padded_vmem_bytes(w.shape[1:], w.dtype) for w in weights)
    est += _padded_vmem_bytes((L_pad, Bsz, d_model), jnp.float32)
    vmem_limit = int(min(max(est + (16 << 20), 32 << 20), 96 << 20))

    out = pl.pallas_call(
        kernel,
        out_shape=jax.ShapeDtypeStruct((L_pad, Bsz, d_model), jnp.float32),
        grid_spec=pltpu.PrefetchScalarGridSpec(
            num_scalar_prefetch=0,
            grid=(num_layers, num_chunks),               # chunk varies fastest
            in_specs=in_specs,
            out_specs=pl.BlockSpec((L_pad, Bsz, d_model), lambda l, c: (0, 0, 0)),
            scratch_shapes=scratch_shapes,
        ),
        # layer and chunk axes are sequential dependence chains.
        compiler_params=pltpu.CompilerParams(
            dimension_semantics=("arbitrary", "arbitrary"),
            vmem_limit_bytes=vmem_limit,
        ),
    )(x_lb, *weights)
    return out[:L]


def init_mamba_params(key, *, d_model, d_state, d_conv, expand, num_layers):
    """Deterministic synthetic parameters, stacked over layers, in kernel layout."""
    d_inner = expand * d_model
    dt_rank = math.ceil(d_model / 16)
    dpad = _rup(d_inner, 128)
    spad = _rup(d_state, 128)

    def unif(k, shape, scale):
        return jax.random.uniform(k, shape, jnp.float32, -scale, scale)

    def pad_cols(w, width):
        return jnp.pad(w, ((0, 0), (0, width - w.shape[1])))

    layers = []
    for l in range(num_layers):
        kl = jax.random.fold_in(key, l)
        ks = jax.random.split(kl, 7)
        # in_proj (bias=False): columns [x-branch | z-gate], each group lane-padded
        w_in_raw = unif(ks[0], (d_model, 2 * d_inner), 1.0 / math.sqrt(d_model))
        w_in = jnp.concatenate([pad_cols(w_in_raw[:, :d_inner], dpad),
                                pad_cols(w_in_raw[:, d_inner:], dpad)], axis=1)
        w_conv = unif(ks[1], (d_conv, d_inner), 1.0 / math.sqrt(d_conv))
        b_conv = unif(ks[2], (1, d_inner), 1.0 / math.sqrt(d_conv))
        # x_proj (bias=False); reference column order is [dt | B | C] —
        # NOTE: preserve this split/reorder if real checkpoints are loaded.
        w_x_raw = unif(ks[3], (d_inner, dt_rank + 2 * d_state), 1.0 / math.sqrt(d_inner))
        w_xdt = w_x_raw[:, :dt_rank]                                    # f32 dt path
        w_x = jnp.concatenate(
            [pad_cols(w_x_raw[:, dt_rank:dt_rank + d_state], spad),     # B
             pad_cols(w_x_raw[:, dt_rank + d_state:], spad)], axis=1)   # C
        w_dt = unif(ks[4], (dt_rank, d_inner), dt_rank ** -0.5)
        # dt bias: inverse softplus of dt sampled log-uniform in [1e-3, 1e-1]
        dt_min, dt_max = 1e-3, 1e-1
        uu = jax.random.uniform(ks[5], (1, d_inner), jnp.float32)
        dt_val = jnp.exp(uu * (math.log(dt_max) - math.log(dt_min)) + math.log(dt_min))
        dt_val = jnp.maximum(dt_val, 1e-4)
        b_dt = dt_val + jnp.log(-jnp.expm1(-dt_val))
        # A_log[c, s] = log(s+1); pass A = -exp(A_log), transposed to (d_state, d_inner)
        A_T = -jnp.broadcast_to(
            jnp.arange(1, d_state + 1, dtype=jnp.float32)[:, None], (d_state, d_inner))
        D = jnp.ones((1, d_inner), jnp.float32)
        w_out = unif(ks[6], (d_inner, d_model), 1.0 / math.sqrt(d_inner))
        layers.append(dict(w_in=w_in, w_conv=w_conv, b_conv=b_conv, w_x=w_x,
                           w_xdt=w_xdt, w_dt=w_dt, b_dt=b_dt, A_T=A_T, D=D,
                           w_out=w_out))

    stacked = {k: jnp.stack([lyr[k] for lyr in layers]) for k in layers[0]}
    # bf16 only on the big MXU operands; the dt path (w_xdt, w_dt) and all scan /
    # elementwise parameters stay f32 (dt feeds exp(dt*A) and is precision sensitive).
    for name in ("w_in", "w_x", "w_out"):
        stacked[name] = stacked[name].astype(jnp.bfloat16)
    return stacked


def mamba_model_forward(params, pe, condition, *, d_state, d_conv):
    """MambaModel.forward: Sequential(Mamba...) applied to pe.repeat(B,1,1) + condition."""
    assert condition.ndim == 3
    x = pe[None, :, :] + condition                       # (B, L, d_model)
    x_lb = jnp.transpose(x, (1, 0, 2))                   # (L, B, d_model) kernel layout
    out_lb = mamba_stack(x_lb, params, d_state=d_state, d_conv=d_conv)
    return jnp.transpose(out_lb, (1, 0, 2))              # (B, L, d_model)


if __name__ == "__main__":
    config = dict(d_model=32, d_state=16, d_conv=4, expand=2, num_layers=2)
    B, L = 2, 8

    key = jax.random.PRNGKey(0)
    k_pe, k_cond, k_params = jax.random.split(key, 3)
    positional_embedding = 0.02 * jax.random.normal(k_pe, (L, config["d_model"]), jnp.float32)
    condition = jax.random.normal(k_cond, (B, L, config["d_model"]), jnp.float32)
    params = init_mamba_params(k_params, **config)

    out = mamba_model_forward(params, positional_embedding, condition,
                              d_state=config["d_state"], d_conv=config["d_conv"])
    out = jax.block_until_ready(out)

    assert out.shape == (B, L, config["d_model"])
    assert bool(jnp.all(jnp.isfinite(out)))
    print("KERNEL_OK")
</pallas_src>

<mosaic_0001>
module attributes {stable_mosaic.version = 11 : i64} {
  func.func @_mamba_stack_kernel(%arg0: i32, %arg1: i32, %arg2: memref<8x2x32xf32, #tpu.memory_space<any>>, %arg3: memref<1x32x256xbf16, #tpu.memory_space<vmem>>, %arg4: memref<1x4x64xf32, #tpu.memory_space<vmem>>, %arg5: memref<1x1x64xf32, #tpu.memory_space<vmem>>, %arg6: memref<1x64x256xbf16, #tpu.memory_space<vmem>>, %arg7: memref<1x64x2xf32, #tpu.memory_space<vmem>>, %arg8: memref<1x2x64xf32, #tpu.memory_space<vmem>>, %arg9: memref<1x1x64xf32, #tpu.memory_space<vmem>>, %arg10: memref<1x16x64xf32, #tpu.memory_space<vmem>>, %arg11: memref<1x1x64xf32, #tpu.memory_space<vmem>>, %arg12: memref<1x64x32xbf16, #tpu.memory_space<vmem>>, %arg13: memref<8x2x32xf32, #tpu.memory_space<vmem>>, %arg14: memref<8x2x16x64xbf16, #tpu.memory_space<vmem>>, %arg15: memref<8x2x16x64xbf16, #tpu.memory_space<vmem>>, %arg16: memref<8x2x16x1xf32, #tpu.memory_space<vmem>>, %arg17: memref<8x2x64xf32, #tpu.memory_space<vmem>>, %arg18: memref<2x16x64xf32, #tpu.memory_space<vmem>>, %arg19: memref<3x2x64xf32, #tpu.memory_space<vmem>>, %arg20: memref<!tpu.dma_semaphore, #tpu.memory_space<semaphore_mem>>) attributes {dimension_semantics = [#tpu.dimension_semantics<arbitrary>, #tpu.dimension_semantics<arbitrary>], iteration_bounds = array<i64: 2, 1>, scalar_prefetch = 0 : i64, scratch_operands = 7 : i64, tpu.core_type = #tpu.core_type<tc>, window_params = [{}, {transform_indices = @transform_1, window_bounds = array<i64: 1, 32, 256>}, {transform_indices = @transform_2, window_bounds = array<i64: 1, 4, 64>}, {transform_indices = @transform_3, window_bounds = array<i64: 1, 1, 64>}, {transform_indices = @transform_4, window_bounds = array<i64: 1, 64, 256>}, {transform_indices = @transform_5, window_bounds = array<i64: 1, 64, 2>}, {transform_indices = @transform_6, window_bounds = array<i64: 1, 2, 64>}, {transform_indices = @transform_7, window_bounds = array<i64: 1, 1, 64>}, {transform_indices = @transform_8, window_bounds = array<i64: 1, 16, 64>}, {transform_indices = @transform_9, window_bounds = array<i64: 1, 1, 64>}, {transform_indices = @transform_10, window_bounds = array<i64: 1, 64, 32>}, {pipeline_mode = #tpu.pipeline_mode<synchronous>, transform_indices = @transform_11, window_bounds = array<i64: 8, 2, 32>}]} {
    %c8_i32 = arith.constant 8 : i32
    %0 = arith.muli %arg1, %c8_i32 : i32
    %1 = tpu.assume_multiple %0, 8 : i32
    %c0_i32 = arith.constant 0 : i32
    %2 = arith.cmpi eq, %arg0, %c0_i32 : i32
    %c0_i32_0 = arith.constant 0 : i32
    %3 = arith.cmpi eq, %arg1, %c0_i32_0 : i32
    %4 = arith.andi %2, %3 : i1
    %5 = arith.extui %4 : i1 to i32
    %c0_i32_1 = arith.constant 0 : i32
    %6 = arith.cmpi ne, %5, %c0_i32_1 : i32
    scf.if %6 {
      tpu.enqueue_dma source(%arg2 : memref<8x2x32xf32, #tpu.memory_space<any>>) target(%arg13 : memref<8x2x32xf32, #tpu.memory_space<vmem>>) target_semaphore(%arg20 : memref<!tpu.dma_semaphore, #tpu.memory_space<semaphore_mem>>)
      tpu.wait_dma2 semaphore(%arg20 : memref<!tpu.dma_semaphore, #tpu.memory_space<semaphore_mem>>) src(%arg2 : memref<8x2x32xf32, #tpu.memory_space<any>>) dst(%arg13 : memref<8x2x32xf32, #tpu.memory_space<vmem>>)
    } else {
    }
    %c0_i32_2 = arith.constant 0 : i32
    %7 = arith.cmpi eq, %arg1, %c0_i32_2 : i32
    %8 = arith.extui %7 : i1 to i32
    %c0_i32_3 = arith.constant 0 : i32
    %9 = arith.cmpi ne, %8, %c0_i32_3 : i32
    scf.if %9 {
      %cst_161 = arith.constant 0.000000e+00 : f32
      %287 = vector.broadcast %cst_161 : f32 to vector<2x16x64xf32>
      %c0_162 = arith.constant 0 : index
      %c0_163 = arith.constant 0 : index
      %c0_164 = arith.constant 0 : index
      %288 = vector.load %arg18[%c0_162, %c0_163, %c0_164] : memref<2x16x64xf32, #tpu.memory_space<vmem>>, vector<2x16x64xf32>
      tpu.vector_store %arg18[%c0_162, %c0_163, %c0_164], %287 {strides = array<i32>} : memref<2x16x64xf32, #tpu.memory_space<vmem>>, vector<2x16x64xf32>,
      %cst_165 = arith.constant 0.000000e+00 : f32
      %289 = vector.broadcast %cst_165 : f32 to vector<3x2x64xf32>
      %c0_166 = arith.constant 0 : index
      %c0_167 = arith.constant 0 : index
      %c0_168 = arith.constant 0 : index
      %290 = vector.load %arg19[%c0_166, %c0_167, %c0_168] : memref<3x2x64xf32, #tpu.memory_space<vmem>>, vector<3x2x64xf32>
      tpu.vector_store %arg19[%c0_166, %c0_167, %c0_168], %289 {strides = array<i32>} : memref<3x2x64xf32, #tpu.memory_space<vmem>>, vector<3x2x64xf32>,
    } else {
    }
    %10 = arith.index_cast %1 : i32 to index
    %c0 = arith.constant 0 : index
    %c0_4 = arith.constant 0 : index
    %11 = vector.load %arg13[%10, %c0, %c0_4] : memref<8x2x32xf32, #tpu.memory_space<vmem>>, vector<8x2x32xf32>
    %12 = vector.shape_cast %11 : vector<8x2x32xf32> to vector<16x32xf32>
    %13 = arith.truncf %12 : vector<16x32xf32> to vector<16x32xbf16>
    %c0_5 = arith.constant 0 : index
    %c0_6 = arith.constant 0 : index
    %c0_7 = arith.constant 0 : index
    %14 = vector.load %arg3[%c0_5, %c0_6, %c0_7] : memref<1x32x256xbf16, #tpu.memory_space<vmem>>, vector<1x32x256xbf16>
    %15 = vector.shape_cast %14 : vector<1x32x256xbf16> to vector<32x256xbf16>
    %cst = arith.constant dense<0.000000e+00> : vector<16x256xf32>
    %16 = tpu.matmul %13, %15, %cst {dimension_numbers = #tpu.dot_dimension_numbers<[1], [0], [0], [1], [0, 0, 1, 1], [], []>} : vector<16x32xbf16>, vector<32x256xbf16>, vector<16x256xf32> -> vector<16x256xf32>
    %17 = vector.extract_strided_slice %16 {offsets = [0, 0], sizes = [16, 64], strides = [1, 1]} : vector<16x256xf32> to vector<16x64xf32>
    %18 = vector.extract_strided_slice %16 {offsets = [0, 128], sizes = [16, 64], strides = [1, 1]} : vector<16x256xf32> to vector<16x64xf32>
    %19 = vector.shape_cast %17 : vector<16x64xf32> to vector<8x2x64xf32>
    %c0_8 = arith.constant 0 : index
    %c0_9 = arith.constant 0 : index
    %c0_10 = arith.constant 0 : index
    %20 = vector.load %arg19[%c0_8, %c0_9, %c0_10] : memref<3x2x64xf32, #tpu.memory_space<vmem>>, vector<3x2x64xf32>
    %21 = tpu.concatenate %20, %19 in 0 : vector<3x2x64xf32>, vector<8x2x64xf32> -> vector<11x2x64xf32>
    %22 = vector.extract_strided_slice %21 {offsets = [8, 0, 0], sizes = [3, 2, 64], strides = [1, 1, 1]} : vector<11x2x64xf32> to vector<3x2x64xf32>
    %c0_11 = arith.constant 0 : index
    %c0_12 = arith.constant 0 : index
    %c0_13 = arith.constant 0 : index
    %23 = vector.load %arg19[%c0_11, %c0_12, %c0_13] : memref<3x2x64xf32, #tpu.memory_space<vmem>>, vector<3x2x64xf32>
    tpu.vector_store %arg19[%c0_11, %c0_12, %c0_13], %22 {strides = array<i32>} : memref<3x2x64xf32, #tpu.memory_space<vmem>>, vector<3x2x64xf32>,
    %c0_14 = arith.constant 0 : index
    %c0_15 = arith.constant 0 : index
    %c0_16 = arith.constant 0 : index
    %24 = vector.load %arg4[%c0_14, %c0_15, %c0_16] : memref<1x4x64xf32, #tpu.memory_space<vmem>>, vector<1x4x64xf32>
    %25 = vector.shape_cast %24 : vector<1x4x64xf32> to vector<4x64xf32>
    %c0_17 = arith.constant 0 : index
    %c0_18 = arith.constant 0 : index
    %c0_19 = arith.constant 0 : index
    %26 = vector.load %arg5[%c0_17, %c0_18, %c0_19] : memref<1x1x64xf32, #tpu.memory_space<vmem>>, vector<1x1x64xf32>
    %27 = vector.shape_cast %26 : vector<1x1x64xf32> to vector<1x64xf32>
    %28 = vector.shape_cast %27 : vector<1x64xf32> to vector<1x1x64xf32>
    %29 = vector.shape_cast %28 : vector<1x1x64xf32> to vector<1x1x64xf32>
    %30 = vector.broadcast %29 : vector<1x1x64xf32> to vector<8x2x64xf32>
    %31 = vector.extract_strided_slice %21 {offsets = [0, 0, 0], sizes = [8, 2, 64], strides = [1, 1, 1]} : vector<11x2x64xf32> to vector<8x2x64xf32>
    %32 = vector.extract_strided_slice %25 {offsets = [0, 0], sizes = [1, 64], strides = [1, 1]} : vector<4x64xf32> to vector<1x64xf32>
    %33 = vector.shape_cast %32 : vector<1x64xf32> to vector<64xf32>
    %34 = vector.shape_cast %33 : vector<64xf32> to vector<1x1x64xf32>
    %35 = vector.broadcast %34 : vector<1x1x64xf32> to vector<8x2x64xf32>
    %36 = arith.mulf %31, %35 : vector<8x2x64xf32>
    %37 = arith.addf %30, %36 : vector<8x2x64xf32>
    %38 = vector.extract_strided_slice %21 {offsets = [1, 0, 0], sizes = [8, 2, 64], strides = [1, 1, 1]} : vector<11x2x64xf32> to vector<8x2x64xf32>
    %39 = vector.extract_strided_slice %25 {offsets = [1, 0], sizes = [1, 64], strides = [1, 1]} : vector<4x64xf32> to vector<1x64xf32>
    %40 = vector.shape_cast %39 : vector<1x64xf32> to vector<64xf32>
    %41 = vector.shape_cast %40 : vector<64xf32> to vector<1x1x64xf32>
    %42 = vector.broadcast %41 : vector<1x1x64xf32> to vector<8x2x64xf32>
    %43 = arith.mulf %38, %42 : vector<8x2x64xf32>
    %44 = arith.addf %37, %43 : vector<8x2x64xf32>
    %45 = vector.extract_strided_slice %21 {offsets = [2, 0, 0], sizes = [8, 2, 64], strides = [1, 1, 1]} : vector<11x2x64xf32> to vector<8x2x64xf32>
    %46 = vector.extract_strided_slice %25 {offsets = [2, 0], sizes = [1, 64], strides = [1, 1]} : vector<4x64xf32> to vector<1x64xf32>
    %47 = vector.shape_cast %46 : vector<1x64xf32> to vector<64xf32>
    %48 = vector.shape_cast %47 : vector<64xf32> to vector<1x1x64xf32>
    %49 = vector.broadcast %48 : vector<1x1x64xf32> to vector<8x2x64xf32>
    %50 = arith.mulf %45, %49 : vector<8x2x64xf32>
    %51 = arith.addf %44, %50 : vector<8x2x64xf32>
    %52 = vector.extract_strided_slice %21 {offsets = [3, 0, 0], sizes = [8, 2, 64], strides = [1, 1, 1]} : vector<11x2x64xf32> to vector<8x2x64xf32>
    %53 = vector.extract_strided_slice %25 {offsets = [3, 0], sizes = [1, 64], strides = [1, 1]} : vector<4x64xf32> to vector<1x64xf32>
    %54 = vector.shape_cast %53 : vector<1x64xf32> to vector<64xf32>
    %55 = vector.shape_cast %54 : vector<64xf32> to vector<1x1x64xf32>
    %56 = vector.broadcast %55 : vector<1x1x64xf32> to vector<8x2x64xf32>
    %57 = arith.mulf %52, %56 : vector<8x2x64xf32>
    %58 = arith.addf %51, %57 : vector<8x2x64xf32>
    %cst_20 = arith.constant 0.000000e+00 : f32
    %59 = vector.broadcast %cst_20 : f32 to vector<8x2x64xf32>
    %60 = arith.subf %59, %58 : vector<8x2x64xf32>
    %61 = math.exp %60 : vector<8x2x64xf32>
    %cst_21 = arith.constant 1.000000e+00 : f32
    %62 = vector.broadcast %cst_21 : f32 to vector<8x2x64xf32>
    %63 = arith.addf %62, %61 : vector<8x2x64xf32>
    %cst_22 = arith.constant 1.000000e+00 : f32
    %64 = vector.broadcast %cst_22 : f32 to vector<8x2x64xf32>
    %65 = arith.divf %64, %63 : vector<8x2x64xf32>
    %66 = arith.mulf %58, %65 : vector<8x2x64xf32>
    %67 = vector.shape_cast %66 : vector<8x2x64xf32> to vector<16x64xf32>
    %68 = arith.truncf %67 : vector<16x64xf32> to vector<16x64xbf16>
    %c0_23 = arith.constant 0 : index
    %c0_24 = arith.constant 0 : index
    %c0_25 = arith.constant 0 : index
    %69 = vector.load %arg6[%c0_23, %c0_24, %c0_25] : memref<1x64x256xbf16, #tpu.memory_space<vmem>>, vector<1x64x256xbf16>
    %70 = vector.shape_cast %69 : vector<1x64x256xbf16> to vector<64x256xbf16>
    %cst_26 = arith.constant dense<0.000000e+00> : vector<16x256xf32>
    %71 = tpu.matmul %68, %70, %cst_26 {dimension_numbers = #tpu.dot_dimension_numbers<[1], [0], [0], [1], [0, 0, 1, 1], [], []>} : vector<16x64xbf16>, vector<64x256xbf16>, vector<16x256xf32> -> vector<16x256xf32>
    %72 = vector.extract_strided_slice %71 {offsets = [0, 0], sizes = [16, 16], strides = [1, 1]} : vector<16x256xf32> to vector<16x16xf32>
    %73 = vector.extract_strided_slice %71 {offsets = [0, 128], sizes = [16, 16], strides = [1, 1]} : vector<16x256xf32> to vector<16x16xf32>
    %c0_27 = arith.constant 0 : index
    %c0_28 = arith.constant 0 : index
    %c0_29 = arith.constant 0 : index
    %74 = vector.load %arg7[%c0_27, %c0_28, %c0_29] : memref<1x64x2xf32, #tpu.memory_space<vmem>>, vector<1x64x2xf32>
    %75 = vector.shape_cast %74 : vector<1x64x2xf32> to vector<64x2xf32>
    %cst_30 = arith.constant dense<0.000000e+00> : vector<16x2xf32>
    %76 = tpu.matmul %67, %75, %cst_30 {dimension_numbers = #tpu.dot_dimension_numbers<[1], [0], [0], [1], [0, 0, 1, 1], [], []>} : vector<16x64xf32>, vector<64x2xf32>, vector<16x2xf32> -> vector<16x2xf32>
    %c0_31 = arith.constant 0 : index
    %c0_32 = arith.constant 0 : index
    %c0_33 = arith.constant 0 : index
    %77 = vector.load %arg8[%c0_31, %c0_32, %c0_33] : memref<1x2x64xf32, #tpu.memory_space<vmem>>, vector<1x2x64xf32>
    %78 = vector.shape_cast %77 : vector<1x2x64xf32> to vector<2x64xf32>
    %cst_34 = arith.constant dense<0.000000e+00> : vector<16x64xf32>
    %79 = tpu.matmul %76, %78, %cst_34 {dimension_numbers = #tpu.dot_dimension_numbers<[1], [0], [0], [1], [0, 0, 1, 1], [], []>} : vector<16x2xf32>, vector<2x64xf32>, vector<16x64xf32> -> vector<16x64xf32>
    %c0_35 = arith.constant 0 : index
    %c0_36 = arith.constant 0 : index
    %c0_37 = arith.constant 0 : index
    %80 = vector.load %arg9[%c0_35, %c0_36, %c0_37] : memref<1x1x64xf32, #tpu.memory_space<vmem>>, vector<1x1x64xf32>
    %81 = vector.shape_cast %80 : vector<1x1x64xf32> to vector<1x64xf32>
    %82 = vector.broadcast %81 : vector<1x64xf32> to vector<16x64xf32>
    %83 = arith.addf %79, %82 : vector<16x64xf32>
    %cst_38 = arith.constant 2.000000e+01 : f32
    %84 = vector.broadcast %cst_38 : f32 to vector<16x64xf32>
    %85 = arith.cmpf ogt, %83, %84 : vector<16x64xf32>
    %86 = math.exp %83 : vector<16x64xf32>
    %87 = math.log1p %86 : vector<16x64xf32>
    %88 = arith.select %85, %83, %87 : vector<16x64xi1>, vector<16x64xf32>
    %c0_39 = arith.constant 0 : index
    %c0_40 = arith.constant 0 : index
    %c0_41 = arith.constant 0 : index
    %89 = vector.load %arg10[%c0_39, %c0_40, %c0_41] : memref<1x16x64xf32, #tpu.memory_space<vmem>>, vector<1x16x64xf32>
    %90 = vector.shape_cast %89 : vector<1x16x64xf32> to vector<16x64xf32>
    %91 = vector.shape_cast %88 : vector<16x64xf32> to vector<8x2x64xf32>
    %92 = arith.mulf %88, %67 : vector<16x64xf32>
    %93 = vector.shape_cast %92 : vector<16x64xf32> to vector<8x2x64xf32>
    %94 = vector.shape_cast %91 : vector<8x2x64xf32> to vector<8x2x1x64xf32>
    %95 = vector.shape_cast %90 : vector<16x64xf32> to vector<1x1x16x64xf32>
    %96 = vector.broadcast %94 : vector<8x2x1x64xf32> to vector<8x2x16x64xf32>
    %97 = vector.broadcast %95 : vector<1x1x16x64xf32> to vector<8x2x16x64xf32>
    %98 = arith.mulf %96, %97 : vector<8x2x16x64xf32>
    %99 = math.exp %98 : vector<8x2x16x64xf32>
    %100 = arith.truncf %99 : vector<8x2x16x64xf32> to vector<8x2x16x64xbf16>
    %c0_42 = arith.constant 0 : index
    %c0_43 = arith.constant 0 : index
    %c0_44 = arith.constant 0 : index
    %c0_45 = arith.constant 0 : index
    %101 = vector.load %arg14[%c0_42, %c0_43, %c0_44, %c0_45] : memref<8x2x16x64xbf16, #tpu.memory_space<vmem>>, vector<8x2x16x64xbf16>
    tpu.vector_store %arg14[%c0_42, %c0_43, %c0_44, %c0_45], %100 {strides = array<i32>} : memref<8x2x16x64xbf16, #tpu.memory_space<vmem>>, vector<8x2x16x64xbf16>,
    %102 = vector.shape_cast %72 : vector<16x16xf32> to vector<8x2x16xf32>
    %103 = vector.shape_cast %102 : vector<8x2x16xf32> to vector<8x2x16x1xf32>
    %104 = vector.shape_cast %93 : vector<8x2x64xf32> to vector<8x2x1x64xf32>
    %105 = vector.broadcast %103 : vector<8x2x16x1xf32> to vector<8x2x16x64xf32>
    %106 = vector.broadcast %104 : vector<8x2x1x64xf32> to vector<8x2x16x64xf32>
    %107 = arith.mulf %105, %106 : vector<8x2x16x64xf32>
    %108 = arith.truncf %107 : vector<8x2x16x64xf32> to vector<8x2x16x64xbf16>
    %c0_46 = arith.constant 0 : index
    %c0_47 = arith.constant 0 : index
    %c0_48 = arith.constant 0 : index
    %c0_49 = arith.constant 0 : index
    %109 = vector.load %arg15[%c0_46, %c0_47, %c0_48, %c0_49] : memref<8x2x16x64xbf16, #tpu.memory_space<vmem>>, vector<8x2x16x64xbf16>
    tpu.vector_store %arg15[%c0_46, %c0_47, %c0_48, %c0_49], %108 {strides = array<i32>} : memref<8x2x16x64xbf16, #tpu.memory_space<vmem>>, vector<8x2x16x64xbf16>,
    %110 = vector.shape_cast %73 : vector<16x16xf32> to vector<8x2x16xf32>
    %111 = vector.shape_cast %110 : vector<8x2x16xf32> to vector<8x2x16x1xf32>
    %c0_50 = arith.constant 0 : index
    %c0_51 = arith.constant 0 : index
    %c0_52 = arith.constant 0 : index
    %c0_53 = arith.constant 0 : index
    %112 = vector.load %arg16[%c0_50, %c0_51, %c0_52, %c0_53] : memref<8x2x16x1xf32, #tpu.memory_space<vmem>>, vector<8x2x16x1xf32>
    tpu.vector_store %arg16[%c0_50, %c0_51, %c0_52, %c0_53], %111 {strides = array<i32>} : memref<8x2x16x1xf32, #tpu.memory_space<vmem>>, vector<8x2x16x1xf32>,
    %c0_54 = arith.constant 0 : index
    %c0_55 = arith.constant 0 : index
    %c0_56 = arith.constant 0 : index
    %113 = vector.load %arg18[%c0_54, %c0_55, %c0_56] : memref<2x16x64xf32, #tpu.memory_space<vmem>>, vector<2x16x64xf32>
    %c0_i32_57 = arith.constant 0 : i32
    %c8_i32_58 = arith.constant 8 : i32
    %114 = arith.muli %c0_i32_57, %c8_i32_58 : i32
    %115 = tpu.assume_multiple %114, 8 : i32
    %c0_i32_59 = arith.constant 0 : i32
    %116 = arith.addi %115, %c0_i32_59 : i32
    %117 = arith.index_cast %116 : i32 to index
    %c0_60 = arith.constant 0 : index
    %c0_61 = arith.constant 0 : index
    %c0_62 = arith.constant 0 : index
    %118 = vector.load %arg14[%117, %c0_60, %c0_61, %c0_62] : memref<8x2x16x64xbf16, #tpu.memory_space<vmem>>, vector<1x2x16x64xbf16>
    %119 = vector.shape_cast %118 : vector<1x2x16x64xbf16> to vector<2x16x64xbf16>
    %120 = arith.extf %119 : vector<2x16x64xbf16> to vector<2x16x64xf32>
    %121 = arith.mulf %120, %113 : vector<2x16x64xf32>
    %122 = arith.index_cast %116 : i32 to index
    %c0_63 = arith.constant 0 : index
    %c0_64 = arith.constant 0 : index
    %c0_65 = arith.constant 0 : index
    %123 = vector.load %arg15[%122, %c0_63, %c0_64, %c0_65] : memref<8x2x16x64xbf16, #tpu.memory_space<vmem>>, vector<1x2x16x64xbf16>
    %124 = vector.shape_cast %123 : vector<1x2x16x64xbf16> to vector<2x16x64xbf16>
    %125 = arith.extf %124 : vector<2x16x64xbf16> to vector<2x16x64xf32>
    %126 = arith.addf %121, %125 : vector<2x16x64xf32>
    %127 = arith.index_cast %116 : i32 to index
    %c0_66 = arith.constant 0 : index
    %c0_67 = arith.constant 0 : index
    %c0_68 = arith.constant 0 : index
    %128 = vector.load %arg16[%127, %c0_66, %c0_67, %c0_68] : memref<8x2x16x1xf32, #tpu.memory_space<vmem>>, vector<1x2x16x1xf32>
    %129 = vector.shape_cast %128 : vector<1x2x16x1xf32> to vector<2x16x1xf32>
    %130 = vector.broadcast %129 : vector<2x16x1xf32> to vector<2x16x64xf32>
    %131 = arith.mulf %130, %126 : vector<2x16x64xf32>
    %cst_69 = arith.constant dense<0.000000e+00> : vector<2x64xf32>
    %132 = vector.multi_reduction <add>, %131, %cst_69 [1] : vector<2x16x64xf32> to vector<2x64xf32>
    %c1_i32 = arith.constant 1 : i32
    %133 = arith.addi %115, %c1_i32 : i32
    %134 = arith.index_cast %133 : i32 to index
    %c0_70 = arith.constant 0 : index
    %c0_71 = arith.constant 0 : index
    %c0_72 = arith.constant 0 : index
    %135 = vector.load %arg14[%134, %c0_70, %c0_71, %c0_72] : memref<8x2x16x64xbf16, #tpu.memory_space<vmem>>, vector<1x2x16x64xbf16>
    %136 = vector.shape_cast %135 : vector<1x2x16x64xbf16> to vector<2x16x64xbf16>
    %137 = arith.extf %136 : vector<2x16x64xbf16> to vector<2x16x64xf32>
    %138 = arith.mulf %137, %126 : vector<2x16x64xf32>
    %139 = arith.index_cast %133 : i32 to index
    %c0_73 = arith.constant 0 : index
    %c0_74 = arith.constant 0 : index
    %c0_75 = arith.constant 0 : index
    %140 = vector.load %arg15[%139, %c0_73, %c0_74, %c0_75] : memref<8x2x16x64xbf16, #tpu.memory_space<vmem>>, vector<1x2x16x64xbf16>
    %141 = vector.shape_cast %140 : vector<1x2x16x64xbf16> to vector<2x16x64xbf16>
    %142 = arith.extf %141 : vector<2x16x64xbf16> to vector<2x16x64xf32>
    %143 = arith.addf %138, %142 : vector<2x16x64xf32>
    %144 = arith.index_cast %133 : i32 to index
    %c0_76 = arith.constant 0 : index
    %c0_77 = arith.constant 0 : index
    %c0_78 = arith.constant 0 : index
    %145 = vector.load %arg16[%144, %c0_76, %c0_77, %c0_78] : memref<8x2x16x1xf32, #tpu.memory_space<vmem>>, vector<1x2x16x1xf32>
    %146 = vector.shape_cast %145 : vector<1x2x16x1xf32> to vector<2x16x1xf32>
    %147 = vector.broadcast %146 : vector<2x16x1xf32> to vector<2x16x64xf32>
    %148 = arith.mulf %147, %143 : vector<2x16x64xf32>
    %cst_79 = arith.constant dense<0.000000e+00> : vector<2x64xf32>
    %149 = vector.multi_reduction <add>, %148, %cst_79 [1] : vector<2x16x64xf32> to vector<2x64xf32>
    %c2_i32 = arith.constant 2 : i32
    %150 = arith.addi %115, %c2_i32 : i32
    %151 = arith.index_cast %150 : i32 to index
    %c0_80 = arith.constant 0 : index
    %c0_81 = arith.constant 0 : index
    %c0_82 = arith.constant 0 : index
    %152 = vector.load %arg14[%151, %c0_80, %c0_81, %c0_82] : memref<8x2x16x64xbf16, #tpu.memory_space<vmem>>, vector<1x2x16x64xbf16>
    %153 = vector.shape_cast %152 : vector<1x2x16x64xbf16> to vector<2x16x64xbf16>
    %154 = arith.extf %153 : vector<2x16x64xbf16> to vector<2x16x64xf32>
    %155 = arith.mulf %154, %143 : vector<2x16x64xf32>
    %156 = arith.index_cast %150 : i32 to index
    %c0_83 = arith.constant 0 : index
    %c0_84 = arith.constant 0 : index
    %c0_85 = arith.constant 0 : index
    %157 = vector.load %arg15[%156, %c0_83, %c0_84, %c0_85] : memref<8x2x16x64xbf16, #tpu.memory_space<vmem>>, vector<1x2x16x64xbf16>
    %158 = vector.shape_cast %157 : vector<1x2x16x64xbf16> to vector<2x16x64xbf16>
    %159 = arith.extf %158 : vector<2x16x64xbf16> to vector<2x16x64xf32>
    %160 = arith.addf %155, %159 : vector<2x16x64xf32>
    %161 = arith.index_cast %150 : i32 to index
    %c0_86 = arith.constant 0 : index
    %c0_87 = arith.constant 0 : index
    %c0_88 = arith.constant 0 : index
    %162 = vector.load %arg16[%161, %c0_86, %c0_87, %c0_88] : memref<8x2x16x1xf32, #tpu.memory_space<vmem>>, vector<1x2x16x1xf32>
    %163 = vector.shape_cast %162 : vector<1x2x16x1xf32> to vector<2x16x1xf32>
    %164 = vector.broadcast %163 : vector<2x16x1xf32> to vector<2x16x64xf32>
    %165 = arith.mulf %164, %160 : vector<2x16x64xf32>
    %cst_89 = arith.constant dense<0.000000e+00> : vector<2x64xf32>
    %166 = vector.multi_reduction <add>, %165, %cst_89 [1] : vector<2x16x64xf32> to vector<2x64xf32>
    %c3_i32 = arith.constant 3 : i32
    %167 = arith.addi %115, %c3_i32 : i32
    %168 = arith.index_cast %167 : i32 to index
    %c0_90 = arith.constant 0 : index
    %c0_91 = arith.constant 0 : index
    %c0_92 = arith.constant 0 : index
    %169 = vector.load %arg14[%168, %c0_90, %c0_91, %c0_92] : memref<8x2x16x64xbf16, #tpu.memory_space<vmem>>, vector<1x2x16x64xbf16>
    %170 = vector.shape_cast %169 : vector<1x2x16x64xbf16> to vector<2x16x64xbf16>
    %171 = arith.extf %170 : vector<2x16x64xbf16> to vector<2x16x64xf32>
    %172 = arith.mulf %171, %160 : vector<2x16x64xf32>
    %173 = arith.index_cast %167 : i32 to index
    %c0_93 = arith.constant 0 : index
    %c0_94 = arith.constant 0 : index
    %c0_95 = arith.constant 0 : index
    %174 = vector.load %arg15[%173, %c0_93, %c0_94, %c0_95] : memref<8x2x16x64xbf16, #tpu.memory_space<vmem>>, vector<1x2x16x64xbf16>
    %175 = vector.shape_cast %174 : vector<1x2x16x64xbf16> to vector<2x16x64xbf16>
    %176 = arith.extf %175 : vector<2x16x64xbf16> to vector<2x16x64xf32>
    %177 = arith.addf %172, %176 : vector<2x16x64xf32>
    %178 = arith.index_cast %167 : i32 to index
    %c0_96 = arith.constant 0 : index
    %c0_97 = arith.constant 0 : index
    %c0_98 = arith.constant 0 : index
    %179 = vector.load %arg16[%178, %c0_96, %c0_97, %c0_98] : memref<8x2x16x1xf32, #tpu.memory_space<vmem>>, vector<1x2x16x1xf32>
    %180 = vector.shape_cast %179 : vector<1x2x16x1xf32> to vector<2x16x1xf32>
    %181 = vector.broadcast %180 : vector<2x16x1xf32> to vector<2x16x64xf32>
    %182 = arith.mulf %181, %177 : vector<2x16x64xf32>
    %cst_99 = arith.constant dense<0.000000e+00> : vector<2x64xf32>
    %183 = vector.multi_reduction <add>, %182, %cst_99 [1] : vector<2x16x64xf32> to vector<2x64xf32>
    %c4_i32 = arith.constant 4 : i32
    %184 = arith.addi %115, %c4_i32 : i32
    %185 = arith.index_cast %184 : i32 to index
    %c0_100 = arith.constant 0 : index
    %c0_101 = arith.constant 0 : index
    %c0_102 = arith.constant 0 : index
    %186 = vector.load %arg14[%185, %c0_100, %c0_101, %c0_102] : memref<8x2x16x64xbf16, #tpu.memory_space<vmem>>, vector<1x2x16x64xbf16>
    %187 = vector.shape_cast %186 : vector<1x2x16x64xbf16> to vector<2x16x64xbf16>
    %188 = arith.extf %187 : vector<2x16x64xbf16> to vector<2x16x64xf32>
    %189 = arith.mulf %188, %177 : vector<2x16x64xf32>
    %190 = arith.index_cast %184 : i32 to index
    %c0_103 = arith.constant 0 : index
    %c0_104 = arith.constant 0 : index
    %c0_105 = arith.constant 0 : index
    %191 = vector.load %arg15[%190, %c0_103, %c0_104, %c0_105] : memref<8x2x16x64xbf16, #tpu.memory_space<vmem>>, vector<1x2x16x64xbf16>
    %192 = vector.shape_cast %191 : vector<1x2x16x64xbf16> to vector<2x16x64xbf16>
    %193 = arith.extf %192 : vector<2x16x64xbf16> to vector<2x16x64xf32>
    %194 = arith.addf %189, %193 : vector<2x16x64xf32>
    %195 = arith.index_cast %184 : i32 to index
    %c0_106 = arith.constant 0 : index
    %c0_107 = arith.constant 0 : index
    %c0_108 = arith.constant 0 : index
    %196 = vector.load %arg16[%195, %c0_106, %c0_107, %c0_108] : memref<8x2x16x1xf32, #tpu.memory_space<vmem>>, vector<1x2x16x1xf32>
    %197 = vector.shape_cast %196 : vector<1x2x16x1xf32> to vector<2x16x1xf32>
    %198 = vector.broadcast %197 : vector<2x16x1xf32> to vector<2x16x64xf32>
    %199 = arith.mulf %198, %194 : vector<2x16x64xf32>
    %cst_109 = arith.constant dense<0.000000e+00> : vector<2x64xf32>
    %200 = vector.multi_reduction <add>, %199, %cst_109 [1] : vector<2x16x64xf32> to vector<2x64xf32>
    %c5_i32 = arith.constant 5 : i32
    %201 = arith.addi %115, %c5_i32 : i32
    %202 = arith.index_cast %201 : i32 to index
    %c0_110 = arith.constant 0 : index
    %c0_111 = arith.constant 0 : index
    %c0_112 = arith.constant 0 : index
    %203 = vector.load %arg14[%202, %c0_110, %c0_111, %c0_112] : memref<8x2x16x64xbf16, #tpu.memory_space<vmem>>, vector<1x2x16x64xbf16>
    %204 = vector.shape_cast %203 : vector<1x2x16x64xbf16> to vector<2x16x64xbf16>
    %205 = arith.extf %204 : vector<2x16x64xbf16> to vector<2x16x64xf32>
    %206 = arith.mulf %205, %194 : vector<2x16x64xf32>
    %207 = arith.index_cast %201 : i32 to index
    %c0_113 = arith.constant 0 : index
    %c0_114 = arith.constant 0 : index
    %c0_115 = arith.constant 0 : index
    %208 = vector.load %arg15[%207, %c0_113, %c0_114, %c0_115] : memref<8x2x16x64xbf16, #tpu.memory_space<vmem>>, vector<1x2x16x64xbf16>
    %209 = vector.shape_cast %208 : vector<1x2x16x64xbf16> to vector<2x16x64xbf16>
    %210 = arith.extf %209 : vector<2x16x64xbf16> to vector<2x16x64xf32>
    %211 = arith.addf %206, %210 : vector<2x16x64xf32>
    %212 = arith.index_cast %201 : i32 to index
    %c0_116 = arith.constant 0 : index
    %c0_117 = arith.constant 0 : index
    %c0_118 = arith.constant 0 : index
    %213 = vector.load %arg16[%212, %c0_116, %c0_117, %c0_118] : memref<8x2x16x1xf32, #tpu.memory_space<vmem>>, vector<1x2x16x1xf32>
    %214 = vector.shape_cast %213 : vector<1x2x16x1xf32> to vector<2x16x1xf32>
    %215 = vector.broadcast %214 : vector<2x16x1xf32> to vector<2x16x64xf32>
    %216 = arith.mulf %215, %211 : vector<2x16x64xf32>
    %cst_119 = arith.constant dense<0.000000e+00> : vector<2x64xf32>
    %217 = vector.multi_reduction <add>, %216, %cst_119 [1] : vector<2x16x64xf32> to vector<2x64xf32>
    %c6_i32 = arith.constant 6 : i32
    %218 = arith.addi %115, %c6_i32 : i32
    %219 = arith.index_cast %218 : i32 to index
    %c0_120 = arith.constant 0 : index
    %c0_121 = arith.constant 0 : index
    %c0_122 = arith.constant 0 : index
    %220 = vector.load %arg14[%219, %c0_120, %c0_121, %c0_122] : memref<8x2x16x64xbf16, #tpu.memory_space<vmem>>, vector<1x2x16x64xbf16>
    %221 = vector.shape_cast %220 : vector<1x2x16x64xbf16> to vector<2x16x64xbf16>
    %222 = arith.extf %221 : vector<2x16x64xbf16> to vector<2x16x64xf32>
    %223 = arith.mulf %222, %211 : vector<2x16x64xf32>
    %224 = arith.index_cast %218 : i32 to index
    %c0_123 = arith.constant 0 : index
    %c0_124 = arith.constant 0 : index
    %c0_125 = arith.constant 0 : index
    %225 = vector.load %arg15[%224, %c0_123, %c0_124, %c0_125] : memref<8x2x16x64xbf16, #tpu.memory_space<vmem>>, vector<1x2x16x64xbf16>
    %226 = vector.shape_cast %225 : vector<1x2x16x64xbf16> to vector<2x16x64xbf16>
    %227 = arith.extf %226 : vector<2x16x64xbf16> to vector<2x16x64xf32>
    %228 = arith.addf %223, %227 : vector<2x16x64xf32>
    %229 = arith.index_cast %218 : i32 to index
    %c0_126 = arith.constant 0 : index
    %c0_127 = arith.constant 0 : index
    %c0_128 = arith.constant 0 : index
    %230 = vector.load %arg16[%229, %c0_126, %c0_127, %c0_128] : memref<8x2x16x1xf32, #tpu.memory_space<vmem>>, vector<1x2x16x1xf32>
    %231 = vector.shape_cast %230 : vector<1x2x16x1xf32> to vector<2x16x1xf32>
    %232 = vector.broadcast %231 : vector<2x16x1xf32> to vector<2x16x64xf32>
    %233 = arith.mulf %232, %228 : vector<2x16x64xf32>
    %cst_129 = arith.constant dense<0.000000e+00> : vector<2x64xf32>
    %234 = vector.multi_reduction <add>, %233, %cst_129 [1] : vector<2x16x64xf32> to vector<2x64xf32>
    %c7_i32 = arith.constant 7 : i32
    %235 = arith.addi %115, %c7_i32 : i32
    %236 = arith.index_cast %235 : i32 to index
    %c0_130 = arith.constant 0 : index
    %c0_131 = arith.constant 0 : index
    %c0_132 = arith.constant 0 : index
    %237 = vector.load %arg14[%236, %c0_130, %c0_131, %c0_132] : memref<8x2x16x64xbf16, #tpu.memory_space<vmem>>, vector<1x2x16x64xbf16>
    %238 = vector.shape_cast %237 : vector<1x2x16x64xbf16> to vector<2x16x64xbf16>
    %239 = arith.extf %238 : vector<2x16x64xbf16> to vector<2x16x64xf32>
    %240 = arith.mulf %239, %228 : vector<2x16x64xf32>
    %241 = arith.index_cast %235 : i32 to index
    %c0_133 = arith.constant 0 : index
    %c0_134 = arith.constant 0 : index
    %c0_135 = arith.constant 0 : index
    %242 = vector.load %arg15[%241, %c0_133, %c0_134, %c0_135] : memref<8x2x16x64xbf16, #tpu.memory_space<vmem>>, vector<1x2x16x64xbf16>
    %243 = vector.shape_cast %242 : vector<1x2x16x64xbf16> to vector<2x16x64xbf16>
    %244 = arith.extf %243 : vector<2x16x64xbf16> to vector<2x16x64xf32>
    %245 = arith.addf %240, %244 : vector<2x16x64xf32>
    %246 = arith.index_cast %235 : i32 to index
    %c0_136 = arith.constant 0 : index
    %c0_137 = arith.constant 0 : index
    %c0_138 = arith.constant 0 : index
    %247 = vector.load %arg16[%246, %c0_136, %c0_137, %c0_138] : memref<8x2x16x1xf32, #tpu.memory_space<vmem>>, vector<1x2x16x1xf32>
    %248 = vector.shape_cast %247 : vector<1x2x16x1xf32> to vector<2x16x1xf32>
    %249 = vector.broadcast %248 : vector<2x16x1xf32> to vector<2x16x64xf32>
    %250 = arith.mulf %249, %245 : vector<2x16x64xf32>
    %cst_139 = arith.constant dense<0.000000e+00> : vector<2x64xf32>
    %251 = vector.multi_reduction <add>, %250, %cst_139 [1] : vector<2x16x64xf32> to vector<2x64xf32>
    %252 = vector.shape_cast %132 : vector<2x64xf32> to vector<1x2x64xf32>
    %253 = vector.shape_cast %149 : vector<2x64xf32> to vector<1x2x64xf32>
    %254 = vector.shape_cast %166 : vector<2x64xf32> to vector<1x2x64xf32>
    %255 = vector.shape_cast %183 : vector<2x64xf32> to vector<1x2x64xf32>
    %256 = vector.shape_cast %200 : vector<2x64xf32> to vector<1x2x64xf32>
    %257 = vector.shape_cast %217 : vector<2x64xf32> to vector<1x2x64xf32>
    %258 = vector.shape_cast %234 : vector<2x64xf32> to vector<1x2x64xf32>
    %259 = vector.shape_cast %251 : vector<2x64xf32> to vector<1x2x64xf32>
    %260 = tpu.concatenate %252, %253, %254, %255, %256, %257, %258, %259 in 0 : vector<1x2x64xf32>, vector<1x2x64xf32>, vector<1x2x64xf32>, vector<1x2x64xf32>, vector<1x2x64xf32>, vector<1x2x64xf32>, vector<1x2x64xf32>, vector<1x2x64xf32> -> vector<8x2x64xf32>
    %261 = arith.index_cast %115 : i32 to index
    %c0_140 = arith.constant 0 : index
    %c0_141 = arith.constant 0 : index
    %262 = vector.load %arg17[%261, %c0_140, %c0_141] : memref<8x2x64xf32, #tpu.memory_space<vmem>>, vector<8x2x64xf32>
    tpu.vector_store %arg17[%261, %c0_140, %c0_141], %260 {strides = array<i32>} : memref<8x2x64xf32, #tpu.memory_space<vmem>>, vector<8x2x64xf32>,
    %c1_i32_142 = arith.constant 1 : i32
    %c0_143 = arith.constant 0 : index
    %c0_144 = arith.constant 0 : index
    %c0_145 = arith.constant 0 : index
    %263 = vector.load %arg18[%c0_143, %c0_144, %c0_145] : memref<2x16x64xf32, #tpu.memory_space<vmem>>, vector<2x16x64xf32>
    tpu.vector_store %arg18[%c0_143, %c0_144, %c0_145], %245 {strides = array<i32>} : memref<2x16x64xf32, #tpu.memory_space<vmem>>, vector<2x16x64xf32>,
    %c0_146 = arith.constant 0 : index
    %c0_147 = arith.constant 0 : index
    %c0_148 = arith.constant 0 : index
    %264 = vector.load %arg17[%c0_146, %c0_147, %c0_148] : memref<8x2x64xf32, #tpu.memory_space<vmem>>, vector<8x2x64xf32>
    %265 = vector.shape_cast %264 : vector<8x2x64xf32> to vector<16x64xf32>
    %c0_149 = arith.constant 0 : index
    %c0_150 = arith.constant 0 : index
    %c0_151 = arith.constant 0 : index
    %266 = vector.load %arg11[%c0_149, %c0_150, %c0_151] : memref<1x1x64xf32, #tpu.memory_space<vmem>>, vector<1x1x64xf32>
    %267 = vector.shape_cast %266 : vector<1x1x64xf32> to vector<1x64xf32>
    %268 = vector.broadcast %267 : vector<1x64xf32> to vector<16x64xf32>
    %269 = arith.mulf %268, %67 : vector<16x64xf32>
    %270 = arith.addf %265, %269 : vector<16x64xf32>
    %cst_152 = arith.constant 0.000000e+00 : f32
    %271 = vector.broadcast %cst_152 : f32 to vector<16x64xf32>
    %272 = arith.subf %271, %18 : vector<16x64xf32>
    %273 = math.exp %272 : vector<16x64xf32>
    %cst_153 = arith.constant 1.000000e+00 : f32
    %274 = vector.broadcast %cst_153 : f32 to vector<16x64xf32>
    %275 = arith.addf %274, %273 : vector<16x64xf32>
    %cst_154 = arith.constant 1.000000e+00 : f32
    %276 = vector.broadcast %cst_154 : f32 to vector<16x64xf32>
    %277 = arith.divf %276, %275 : vector<16x64xf32>
    %278 = arith.mulf %18, %277 : vector<16x64xf32>
    %279 = arith.mulf %270, %278 : vector<16x64xf32>
    %280 = arith.truncf %279 : vector<16x64xf32> to vector<16x64xbf16>
    %c0_155 = arith.constant 0 : index
    %c0_156 = arith.constant 0 : index
    %c0_157 = arith.constant 0 : index
    %281 = vector.load %arg12[%c0_155, %c0_156, %c0_157] : memref<1x64x32xbf16, #tpu.memory_space<vmem>>, vector<1x64x32xbf16>
    %282 = vector.shape_cast %281 : vector<1x64x32xbf16> to vector<64x32xbf16>
    %cst_158 = arith.constant dense<0.000000e+00> : vector<16x32xf32>
    %283 = tpu.matmul %280, %282, %cst_158 {dimension_numbers = #tpu.dot_dimension_numbers<[1], [0], [0], [1], [0, 0, 1, 1], [], []>} : vector<16x64xbf16>, vector<64x32xbf16>, vector<16x32xf32> -> vector<16x32xf32>
    %284 = vector.shape_cast %283 : vector<16x32xf32> to vector<8x2x32xf32>
    %285 = arith.index_cast %1 : i32 to index
    %c0_159 = arith.constant 0 : index
    %c0_160 = arith.constant 0 : index
    %286 = vector.load %arg13[%285, %c0_159, %c0_160] : memref<8x2x32xf32, #tpu.memory_space<vmem>>, vector<8x2x32xf32>
    tpu.vector_store %arg13[%285, %c0_159, %c0_160], %284 {strides = array<i32>} : memref<8x2x32xf32, #tpu.memory_space<vmem>>, vector<8x2x32xf32>,
    return
  }
  func.func @transform_1(%arg0: i32, %arg1: i32) -> (i32, i32, i32) {
    %c0_i32 = arith.constant 0 : i32
    %c0_i32_0 = arith.constant 0 : i32
    %c0_i32_1 = arith.constant 0 : i32
    return %arg0, %c0_i32, %c0_i32_0 : i32, i32, i32
  }
  func.func @transform_2(%arg0: i32, %arg1: i32) -> (i32, i32, i32) {
    %c0_i32 = arith.constant 0 : i32
    %c0_i32_0 = arith.constant 0 : i32
    %c0_i32_1 = arith.constant 0 : i32
    return %arg0, %c0_i32, %c0_i32_0 : i32, i32, i32
  }
  func.func @transform_3(%arg0: i32, %arg1: i32) -> (i32, i32, i32) {
    %c0_i32 = arith.constant 0 : i32
    %c0_i32_0 = arith.constant 0 : i32
    %c0_i32_1 = arith.constant 0 : i32
    return %arg0, %c0_i32, %c0_i32_0 : i32, i32, i32
  }
  func.func @transform_4(%arg0: i32, %arg1: i32) -> (i32, i32, i32) {
    %c0_i32 = arith.constant 0 : i32
    %c0_i32_0 = arith.constant 0 : i32
    %c0_i32_1 = arith.constant 0 : i32
    return %arg0, %c0_i32, %c0_i32_0 : i32, i32, i32
  }
  func.func @transform_5(%arg0: i32, %arg1: i32) -> (i32, i32, i32) {
    %c0_i32 = arith.constant 0 : i32
    %c0_i32_0 = arith.constant 0 : i32
    %c0_i32_1 = arith.constant 0 : i32
    return %arg0, %c0_i32, %c0_i32_0 : i32, i32, i32
  }
  func.func @transform_6(%arg0: i32, %arg1: i32) -> (i32, i32, i32) {
    %c0_i32 = arith.constant 0 : i32
    %c0_i32_0 = arith.constant 0 : i32
    %c0_i32_1 = arith.constant 0 : i32
    return %arg0, %c0_i32, %c0_i32_0 : i32, i32, i32
  }
  func.func @transform_7(%arg0: i32, %arg1: i32) -> (i32, i32, i32) {
    %c0_i32 = arith.constant 0 : i32
    %c0_i32_0 = arith.constant 0 : i32
    %c0_i32_1 = arith.constant 0 : i32
    return %arg0, %c0_i32, %c0_i32_0 : i32, i32, i32
  }
  func.func @transform_8(%arg0: i32, %arg1: i32) -> (i32, i32, i32) {
    %c0_i32 = arith.constant 0 : i32
    %c0_i32_0 = arith.constant 0 : i32
    %c0_i32_1 = arith.constant 0 : i32
    return %arg0, %c0_i32, %c0_i32_0 : i32, i32, i32
  }
  func.func @transform_9(%arg0: i32, %arg1: i32) -> (i32, i32, i32) {
    %c0_i32 = arith.constant 0 : i32
    %c0_i32_0 = arith.constant 0 : i32
    %c0_i32_1 = arith.constant 0 : i32
    return %arg0, %c0_i32, %c0_i32_0 : i32, i32, i32
  }
  func.func @transform_10(%arg0: i32, %arg1: i32) -> (i32, i32, i32) {
    %c0_i32 = arith.constant 0 : i32
    %c0_i32_0 = arith.constant 0 : i32
    %c0_i32_1 = arith.constant 0 : i32
    return %arg0, %c0_i32, %c0_i32_0 : i32, i32, i32
  }
  func.func @transform_11(%arg0: i32, %arg1: i32) -> (i32, i32, i32) {
    %c0_i32 = arith.constant 0 : i32
    %c0_i32_0 = arith.constant 0 : i32
    %c0_i32_1 = arith.constant 0 : i32
    %c0_i32_2 = arith.constant 0 : i32
    return %c0_i32, %c0_i32_0, %c0_i32_1 : i32, i32, i32
  }
}

</mosaic_0001>

<bundles_post_ra>
// kernel: tpu_custom_call.1
= control target key start
LH: loop header
LB: loop body
LE: loop exit
PB: predicated region body
PF: predicated region fallthrough
CT: control target
= control target key end

     0   :  { %s5100_s0 = inlined_call_operand.hbm [shape: f32[8,2,32], index: 0, kind: input, shape index: {}]   ;;  %s5101_s1 = inlined_call_operand.vmem [shape: bf16[2,32,256], index: 1, kind: input, shape index: {}]   ;;  %s5102_s2 = inlined_call_operand.vmem [shape: f32[2,4,64], index: 2, kind: input, shape index: {}]   ;;  %s5103_s3 = inlined_call_operand.hbm [shape: f32[2,1,64], index: 3, kind: input, shape index: {}]   ;;  %s5104_s4 = inlined_call_operand.vmem [shape: bf16[2,64,256], index: 4, kind: input, shape index: {}]   ;;  %s5105_s5 = inlined_call_operand.vmem [shape: f32[2,64,2], index: 5, kind: input, shape index: {}]   ;;  %s5106_s6 = inlined_call_operand.hbm [shape: f32[2,2,64], index: 6, kind: input, shape index: {}]   ;;  %s5107_s7 = inlined_call_operand.hbm [shape: f32[2,1,64], index: 7, kind: input, shape index: {}]   ;;  %s5108_s8 = inlined_call_operand.vmem [shape: f32[2,16,64], index: 8, kind: input, shape index: {}]   ;;  %s5109_s9 = inlined_call_operand.hbm [shape: f32[2,1,64], index: 9, kind: input, shape index: {}]   ;;  %s5110_s10 = inlined_call_operand.vmem [shape: bf16[2,64,32], index: 10, kind: input, shape index: {}]   ;;  %s5111_s11 = inlined_call_operand.hbm [shape: f32[8,2,32], index: 11, kind: output, shape index: {}]  }
   0x1   :  { %5127 = sst [smem:[#allocation45_spill]] %s5100_s0 }
   0x2   :  { %5128 = sst [smem:[#allocation46_spill]] %s5101_s1 }
   0x3   :  { %5129 = sst [smem:[#allocation47_spill]] %s5102_s2 }
   0x4   :  { %5130 = sst [smem:[#allocation48_spill]] %s5103_s3 }
   0x5   :  { %5131 = sst [smem:[#allocation49_spill]] %s5104_s4 }
   0x6   :  { %5132 = sst [smem:[#allocation50_spill]] %s5106_s6 }
   0x7   :  { %5133 = sst [smem:[#allocation51_spill]] %s5111_s11 }
   0x8   :  { %16 = vsyncpa [#allocation10], 0 }
   0x9   :  { %18 = vsyncpa [#allocation10 + $0x1], 0 }
   0xa   :  { %19 = vsyncpa [#allocation13], 0 }
   0xb   :  { %21 = vsyncpa [#allocation13 + $0x1], 0 }
   0xc   :  { %22 = vsyncpa [#allocation16], 0 }
   0xd   :  { %24 = vsyncpa [#allocation16 + $0x1], 0 }
   0xe   :  { %25 = vsyncpa [#allocation11], 0  ;;  %s4084_s17 = smov 0   ;;  %s4086_s18 = smov 0  }
   0xf   :  { %s4088_s19 = smov 0   ;;  %s4090_s20 = smov 0  }
  0x10   :  { %s4092_s21 = smov 0   ;;  %s4094_s22 = smov 0  }
  0x11 LB: > { %5134 = sst [smem:[#allocation27_spill]] %s3998_s19  ;;  %s4113_s23 = sadd.s32 4294967295, %s4010_s22   ;;  %s4010_s22 = sphi %s4094_s22, %s31_s22   ;;  %s4006_s21 = sphi %s4092_s21, %s5193_s21   ;;  %s4002_s20 = sphi %s4090_s20, %s5192_s20   ;;  %s3998_s19 = sphi %s4088_s19, %s5191_s19   ;;  %s3994_s18 = sphi %s4086_s18, %s5195_s18   ;;  %s3990_s17 = sphi %s4084_s17, %s5194_s17  }
  0x12   : > { %5135 = sst [smem:[#allocation28_spill]] %s4006_s21  ;;  %s43_s24 = sadd.s32 1, %s4006_s21 }
  0x13   : > { %5136 = sst [smem:[#allocation29_spill]] %s4010_s22  ;;  %p45_p0 = scmp.ge.s32.totalorder %s43_s24, 2 }
  0x14   : > { %s102_s25 = sadd.s32 1, %s3998_s19  ;;  %p109_p1 = scmp.ne.s32.totalorder %s3998_s19, %s3994_s18 }
  0x15   : > { %p110_p2 = scmp.eq.s32.totalorder %s4010_s22, 0  ;;  %s5197_s24 = smov (%p45_p0, %s43_s24), 0 }
  0x16   : > { %5137 = sst [smem:[#allocation30_spill]] %s5197_s24  ;;  %p115_p4 = scmp.ne.s32.totalorder %s3994_s18, %s3990_s17 }
  0x17   : > { %p111_p3 = por %p110_p2, %p109_p1  ;;  %s99_s26 = ssub.s32 %s4006_s21, %s5197_s24 }
  0x18   : > { %p116_p5 = scmp.eq.s32.totalorder %s4113_s23, 0  ;;  %p100_p6 = scmp.eq.s32.totalorder %s99_s26, 0 }
  0x19   : > { %p3577_p8 = scmp.lt.s32.totalorder %s4010_s22, 2  ;;  %s4135_s29 = sand.u32 1, %s3998_s19  }
  0x1a   : > { %p4126_p7 = por %p116_p5, %p115_p4  ;;  %s390_s12 = sand.u32 1, %s4010_s22  }
  0x1b   : > { %s4132_s28 = scalar_select %p100_p6, %s3998_s19, %s102_s25  }
  0x1c   : > { %s5138_s27 = scalar_select %p4126_p7, 1, 0 }
  0x1d   : > { %5139 = sst [smem:[#allocation31_spill]] %s4132_s28  ;;  %p4137_p9 = pnand %p3577_p8, %p111_p3 }
  0x1e   : > { %s3424_s13 = sshll.u32 %s4135_s29, 1  ;;  %s3425_s14 = sshll.u32 %s4006_s21, 5 }
  0x1f   : > { %s5140_s30 = scalar_select %p4137_p9, 1, 0 }
  0x20   : > { %s5141_s6 = sld [smem:[#allocation50_spill]]  ;;  %s394_s25 = scalar_lea.vmem [#allocation12], %s3424_s13 }
  0x21   : > { %s401_s26 = sshll.u32 %s394_s25, 4  ;;  %s4152_s24 = scalar_lea.sflag [#allocation13], %s390_s12  ;;  %s4149_s26 = int_to_ptr.vmem [resolvable:$true] %s401_s26 }
  0x22   : > { %p4158_p12 = pneg %p4137_p9 }
  0x26   : > { %s4147_s17 = scalar_lea.hbm %s5141_s6, %s3425_s14  ;;  %s3777_s13 = scalar_lea.hbm %s5141_s6, 64 }
  0x27   : > { %s3772_s28 = scalar_lea.hbm %s4147_s17, 32  ;;  %p3778_p1 = scmp.lt.u32.totalorder %s4147_s17, %s5141_s6 }
  0x28   : > { %p3773_p11 = scmp.ne.s32.totalorder %s4147_s17, %s3772_s28  ;;  %p3779_p2 = scmp.lt.u32.totalorder %s3777_s13, %s3772_s28 }
  0x29   : > { %p3781_p4 = scmp.lt.u32.totalorder %s3772_s28, %s4147_s17 }
  0x2a   : > { %p3775_p13 = pnand %p4158_p12, %p3773_p11  ;;  %p3780_p3 = por %p3779_p2, %p3778_p1 }
  0x2c   : > { %p3776_p0 = pneg %p3775_p13  ;;  %p3782_p5 = por %p3781_p4, %p3780_p3 }
  0x2e   : > { %p3783_p6 = pnand %p3782_p5, %p3776_p0 }
  0x30   : > { %3786 = shalt.err (!%p3783_p6)
}
  0x31   : > { %s3787_s12 = scalar_lea.vmem %s4149_s26, 32  ;;  %s4012_s14 = smov [#allocation12]  }
  0x32   : > { %p3788_p8 = scmp.ne.s32.totalorder %s4149_s26, %s3787_s12  ;;  %s3792_s15 = sshll.u32 %s4012_s14, 4  ;;  %s3793_s15 = int_to_ptr.vmem [resolvable:$false] %s3792_s15 }
  0x33   : > { %s3794_s16 = scalar_lea.vmem %s3793_s15, 64  ;;  %p3795_p10 = scmp.lt.s32.totalorder %s4149_s26, %s3793_s15 }
  0x34   : > { %p3790_p11 = pnand %p3788_p8, %p4158_p12  ;;  %p3796_p7 = scmp.lt.s32.totalorder %s3794_s16, %s3787_s12 }
  0x36   : > { %p3791_p13 = pneg %p3790_p11  ;;  %p3797_p1 = por %p3796_p7, %p3795_p10 }
  0x38   : > { %p3798_p2 = pnand %p3797_p1, %p3791_p13 }
  0x3a   : > { %3801 = shalt.err (!%p3798_p2)
}
  0x3b   : > { %3570 = dma.hbm_to_vmem [thread:$0]  (!%p4137_p9), %s4147_s17, 32, %s4149_s26, %s4152_s24  }
  0x3c   : > { %p456_p0 = scmp.lt.s32.totalorder %s4010_s22, 3  ;;  %p5143_p3 = scmp.ge.s32.totalorder %s4010_s22, 1 }
  0x3d   : > { %s4190_s13 = sshll.u32 %s4006_s21, 4  ;;  %s360_s25 = scalar_lea.vmem [#allocation9], %s4135_s29 }
  0x3e   : > { %p4185_p4 = pnand %p5143_p3, %p456_p0  ;;  %s367_s12 = sshll.u32 %s360_s25, 4  ;;  %s368_s12 = int_to_ptr.vmem [resolvable:$true] %s367_s12 }
  0x3f   : > { %s5145_s3 = sld [smem:[#allocation48_spill]]  ;;  %s358_s17 = scalar_lea.sflag [#allocation10], %s4135_s29 }
  0x40   : > { %s5144_s28 = scalar_select %p4185_p4, 1, 0 }
  0x45   : > { %s4197_s16 = scalar_lea.hbm %s5145_s3, %s4190_s13  ;;  %s3807_s25 = scalar_lea.hbm %s5145_s3, 32 }
  0x46   : > { %s3802_s26 = scalar_lea.hbm %s4197_s16, 16  ;;  %p3808_p6 = scmp.lt.u32.totalorder %s4197_s16, %s5145_s3 }
  0x47   : > { %p3803_p7 = scmp.ne.s32.totalorder %s4197_s16, %s3802_s26  ;;  %p3809_p8 = scmp.lt.u32.totalorder %s3807_s25, %s3802_s26 }
  0x48   : > { %p3811_p13 = scmp.lt.u32.totalorder %s3802_s26, %s4197_s16 }
  0x49   : > { %p3805_p10 = pnand %p3803_p7, %p4158_p12  ;;  %p3810_p11 = por %p3809_p8, %p3808_p6 }
  0x4b   : > { %p3806_p5 = pneg %p3805_p10  ;;  %p3812_p1 = por %p3811_p13, %p3810_p11 }
  0x4d   : > { %p3813_p2 = pnand %p3812_p1, %p3806_p5 }
  0x4f   : > { %3816 = shalt.err (!%p3813_p2)
}
  0x50   : > { %s3817_s14 = scalar_lea.vmem %s368_s12, 16  ;;  %s4013_s15 = smov [#allocation9]  }
  0x51   : > { %p3818_p0 = scmp.ne.s32.totalorder %s368_s12, %s3817_s14  ;;  %s3822_s0 = sshll.u32 %s4013_s15, 4  ;;  %s3823_s0 = int_to_ptr.vmem [resolvable:$false] %s3822_s0 }
  0x52   : > { %s3824_s6 = scalar_lea.vmem %s3823_s0, 32  ;;  %p3825_p10 = scmp.lt.s32.totalorder %s368_s12, %s3823_s0 }
  0x53   : > { %p3820_p3 = pnand %p3818_p0, %p4158_p12  ;;  %p3826_p4 = scmp.lt.s32.totalorder %s3824_s6, %s3817_s14 }
  0x55   : > { %p3821_p7 = pneg %p3820_p3  ;;  %p3827_p9 = por %p3826_p4, %p3825_p10 }
  0x57   : > { %p3828_p6 = pnand %p3827_p9, %p3821_p7 }
  0x59   : > { %3831 = shalt.err (!%p3828_p6)
}
  0x5a   : > { %p5146_p8 = scmp.ne.s32.totalorder %s5140_s30, 0  ;;  %s4221_s22 = scalar_lea.hbm %s5107_s7, %s4190_s13 }
  0x5b   : > { %s411_s0 = scalar_lea.vmem [#allocation14], %s4135_s29  ;;  %s3832_s25 = scalar_lea.hbm %s4221_s22, 16 }
  0x5c   : > { %3567 = dma.hbm_to_vmem [thread:$0]  (!%p5146_p8), %s4197_s16, 16, %s368_s12, %s358_s17  }
  0x5d   : > { %s418_s26 = sshll.u32 %s411_s0, 4  ;;  %p3833_p9 = scmp.ne.s32.totalorder %s4221_s22, %s3832_s25  ;;  %s419_s26 = int_to_ptr.vmem [resolvable:$true] %s418_s26 }
  0x5e   : > { %s3837_s12 = scalar_lea.hbm %s5107_s7, 32  ;;  %p3838_p11 = scmp.lt.u32.totalorder %s4221_s22, %s5107_s7 }
  0x5f   : > { %p3835_p4 = pnand %p3833_p9, %p4158_p12  ;;  %p3839_p13 = scmp.lt.u32.totalorder %s3837_s12, %s3832_s25 }
  0x60   : > { %p3841_p2 = scmp.lt.u32.totalorder %s3832_s25, %s4221_s22 }
  0x61   : > { %p3836_p5 = pneg %p3835_p4  ;;  %p3840_p1 = por %p3839_p13, %p3838_p11 }
  0x63   : > { %p3842_p0 = por %p3841_p2, %p3840_p1 }
  0x65   : > { %p3843_p3 = pnand %p3842_p0, %p3836_p5 }
  0x67   : > { %3846 = shalt.err (!%p3843_p3)
}
  0x68   : > { %s3847_s6 = scalar_lea.vmem %s419_s26, 16  ;;  %s4014_s11 = smov [#allocation14]  }
  0x69   : > { %p3848_p7 = scmp.ne.s32.totalorder %s419_s26, %s3847_s6  ;;  %s3852_s21 = sshll.u32 %s4014_s11, 4  ;;  %s3853_s21 = int_to_ptr.vmem [resolvable:$false] %s3852_s21 }
  0x6a   : > { %s3854_s0 = scalar_lea.vmem %s3853_s21, 32  ;;  %p3855_p9 = scmp.lt.s32.totalorder %s419_s26, %s3853_s21 }
  0x6b   : > { %p3850_p10 = pnand %p3848_p7, %p4158_p12  ;;  %p3856_p4 = scmp.lt.s32.totalorder %s3854_s0, %s3847_s6 }
  0x6d   : > { %p3851_p6 = pneg %p3850_p10  ;;  %p3857_p8 = por %p3856_p4, %p3855_p9 }
  0x6f   : > { %p3858_p11 = pnand %p3857_p8, %p3851_p6 }
  0x71   : > { %3861 = shalt.err (!%p3858_p11)
}
  0x72   : > { %p5147_p13 = scmp.ne.s32.totalorder %s5140_s30, 0  ;;  %s4246_s15 = scalar_lea.hbm %s5109_s9, %s4190_s13 }
  0x73   : > { %s436_s12 = scalar_lea.vmem [#allocation15], %s4135_s29  ;;  %s434_s17 = scalar_lea.sflag [#allocation16], %s4135_s29 }
  0x74   : > { %3573 = dma.hbm_to_vmem [thread:$0]  (!%p5147_p13), %s4221_s22, 16, %s419_s26, %s4152_s24  }
  0x75   : > { %s443_s16 = sshll.u32 %s436_s12, 4  ;;  %s3862_s6 = scalar_lea.hbm %s4246_s15, 16  ;;  %s444_s16 = int_to_ptr.vmem [resolvable:$true] %s443_s16 }
  0x76   : > { %p3863_p8 = scmp.ne.s32.totalorder %s4246_s15, %s3862_s6  ;;  %s3867_s22 = scalar_lea.hbm %s5109_s9, 32 }
  0x77   : > { %p3868_p2 = scmp.lt.u32.totalorder %s4246_s15, %s5109_s9  ;;  %p3869_p0 = scmp.lt.u32.totalorder %s3867_s22, %s3862_s6 }
  0x78   : > { %p3865_p5 = pnand %p3863_p8, %p4158_p12  ;;  %p3871_p7 = scmp.lt.u32.totalorder %s3862_s6, %s4246_s15 }
  0x79   : > { %p3870_p3 = por %p3869_p0, %p3868_p2 }
  0x7a   : > { %p3866_p1 = pneg %p3865_p5 }
  0x7b   : > { %p3872_p10 = por %p3871_p7, %p3870_p3 }
  0x7d   : > { %p3873_p6 = pnand %p3872_p10, %p3866_p1 }
  0x7f   : > { %3876 = shalt.err (!%p3873_p6)
}
  0x80   : > { %s3877_s29 = scalar_lea.vmem %s444_s16, 16  ;;  %s4015_s21 = smov [#allocation15]  }
  0x81   : > { %p3878_p9 = scmp.ne.s32.totalorder %s444_s16, %s3877_s29  ;;  %s3882_s0 = sshll.u32 %s4015_s21, 4  ;;  %s3883_s0 = int_to_ptr.vmem [resolvable:$false] %s3882_s0 }
  0x82   : > { %s3884_s25 = scalar_lea.vmem %s3883_s0, 32  ;;  %p3885_p8 = scmp.lt.s32.totalorder %s444_s16, %s3883_s0 }
  0x83   : > { %p3880_p4 = pnand %p3878_p9, %p4158_p12  ;;  %p3886_p5 = scmp.lt.s32.totalorder %s3884_s25, %s3877_s29 }
  0x85   : > { %p3881_p11 = pneg %p3880_p4  ;;  %p3887_p13 = por %p3886_p5, %p3885_p8 }
  0x87   : > { %p3888_p0 = pnand %p3887_p13, %p3881_p11 }
  0x89   : > { %3891 = shalt.err (!%p3888_p0)
}
  0x8a   : > { %p5148_p2 = scmp.ne.s32.totalorder %s5140_s30, 0  ;;  %p5149_p1 = scmp.ne.s32.totalorder %s5144_s28, 0 }
  0x8c   : > { %3576 = dma.hbm_to_vmem [thread:$0]  (!%p5148_p2), %s4246_s15, 16, %s444_s16, %s434_s17  }
  0x8d   : > { %460 = sbr.rel (%p5149_p1) target bundleno = 1354 (0x54a), region = 60 }
  0x94   : > { %s4270_s19 = sand.u32 1, %s3994_s18   ;;  %p5150_p12 = scmp.ne.s32.totalorder %s5138_s27, 0 }
  0x95   : > { %s463_s14 = scalar_lea.sflag [#allocation10], %s4270_s19 }
  0x96   : > { %3969 = dma.done.wait (%p5150_p12), %s463_s14, 16  }
  0x97   : > { %3971 = vsyncadd (%p5150_p12), %s463_s14, 4294967280  ;;  %s470_s30 = sand.u32 1, %s4113_s23   ;;  %s3429_s15 = sshll.u32 %s4270_s19, 1 }
  0x98   : > { %s471_s28 = scalar_lea.sflag [#allocation13], %s470_s30  ;;  %s4280_s16 = scalar_lea.vmem [#allocation12], %s3429_s15 }
  0x99   : > { %3973 = dma.done.wait (%p5150_p12), %s471_s28, 48  }
  0x9a   : > { %3975 = vsyncadd (%p5150_p12), %s471_s28, 4294967248  ;;  %s488_s6 = scalar_lea.sflag [#allocation16], %s4270_s19 }
  0x9b   : > { %3977 = dma.done.wait (%p5150_p12), %s488_s6, 16  }
  0x9c   : > { %3979 = vsyncadd (%p5150_p12), %s488_s6, 4294967280  ;;  %p563_p13 = scmp.lt.s32.totalorder %s4002_s20, 1  ;;  %p594_p3 = scmp.eq.s32.totalorder %s4002_s20, 0 }
  0x9d   : > { %s4016_s22 = smov [#allocation17]   ;;  %s5151_s1 = sld [smem:[#allocation46_spill]] }
  0x9e   : > { %s564_s24 = scalar_select %p563_p13, %s4002_s20, 1 }
  0x9f   : > { %s607_s26 = sshll.u32 %s4016_s22, 4  ;;  %s5152_s2 = sld [smem:[#allocation47_spill]]  ;;  %s4326_s26 = int_to_ptr.vmem [resolvable:$true] %s607_s26 }
  0xa0   : > { %s3474_s13 = sshll.u32 %s564_s24, 5  ;;  %s3432_s29 = sshll.u32 %s564_s24, 2 }
  0xa1   : > { %s3475_s15 = sshll.u32 %s564_s24, 6  ;;  %s3477_s28 = sshll.u32 %s564_s24, 4 }
  0xa2   : > { %s5153_s4 = sld [smem:[#allocation49_spill]]  ;;  %s4314_s3 = scalar_lea.vmem %s5105_s5, %s3475_s15 }
  0xa3   : > { %s4299_s25 = scalar_lea.vmem %s5151_s1, %s3474_s13  ;;  %s4319_s1 = scalar_lea.vmem %s5108_s8, %s3477_s28 }
  0xa4   : > { %s4324_s30 = scalar_lea.vmem %s5110_s10, %s3474_s13  ;;  %s5154_s6 = sld [smem:[#allocation45_spill]] }
  0xa5   : > { %s4304_s27 = scalar_lea.vmem %s5152_s2, %s3432_s29 }
  0xa8   : > { %s4309_s17 = scalar_lea.vmem %s5153_s4, %s3475_s15 }
  0xaa   : > { %s3892_s2 = scalar_lea.hbm %s5154_s6, 256 }
  0xab   : > { %p3893_p7 = scmp.ne.s32.totalorder %s5154_s6, %s3892_s2  ;;  %p3898_p9 = scmp.lt.u32.totalorder %s3892_s2, %s5154_s6 }
  0xad   : > { %p3894_p10 = pnand %p3893_p7, %p594_p3 }
  0xaf   : > { %p3895_p6 = pneg %p3894_p10 }
  0xb1   : > { %p3900_p4 = pnand %p3898_p9, %p3895_p6 }
  0xb3   : > { %3903 = shalt.err (!%p3900_p4)  }
  0xb4   : > { %s4340_s13 = scalar_lea.vmem %s4326_s26, 256  ;;  %p3911_p0 = scmp.lt.s32.totalorder %s4326_s26, %s4326_s26 }
  0xb5   : > { %p3905_p11 = scmp.ne.s32.totalorder %s4326_s26, %s4340_s13  ;;  %p3912_p2 = scmp.lt.s32.totalorder %s4340_s13, %s4340_s13 }
  0xb7   : > { %p3906_p8 = pnand %p3905_p11, %p594_p3  ;;  %p4353_p1 = por %p3912_p2, %p3911_p0 }
  0xb9   : > { %p3907_p5 = pneg %p3906_p8 }
  0xbb   : > { %p3914_p12 = pnand %p4353_p1, %p3907_p5 }
  0xbd   : > { %3917 = shalt.err (!%p3914_p12)  }
  0xbe   : > { %3558 = dma.hbm_to_vmem [thread:$0]  (%p594_p3), %s5154_s6, 256, %s4326_s26, [#allocation8] }
  0xbf   : > { %3981 = dma.done.wait (%p594_p3), [#allocation8], 256 }
  0xc0   : > { %3983 = vsyncadd (%p594_p3), [#allocation8], 4294967040  ;;  %v4017_v0 = vmov 0   ;;  %v4018_v1 = vmov 1983009808   ;;  %v650_v3 = vlaneseq  ;;  %vm623_vm0 = vcmask 517120  }
  0xc1   : > { %742 = vmatprep.mubr.bf16.mxu1 %v4017_v0  ;;  %v648_v2 = vunpack.c.l.s4 %v4018_v1  ;;  %3636 = vset.pattern.permute.xlu0 %v4017_v0  ;;  %v5121_v4 = vmov 0.0   ;;  %v3638_v7 = vld [vmem:[%s4299_s25 + $0x4] ss:$8 sps:$4 sm:$0xff]   ;;  %v3640_v8 = vld [vmem:[%s4299_s25] ss:$8 sps:$4 sm:$0xff]   ;;  %vm706_vm1 = vcmask 261120  }
  0xc2   : > { %625 = vst.msk [vmem:[#allocation7 + $0x2] sm:$0x3] %vm623_vm0, %v5121_v4  ;;  %626 = vst.msk [vmem:[#allocation7 + $0x4] sm:$0x3] %vm623_vm0, %v5121_v4  ;;  %3637 = vset.pattern.permute.xlu1 %v4017_v0  ;;  %v4375_v6 = vshrl.u32 %v650_v3, 7  ;;  %710 = vmatprep.subr.bf16.mxu1 %v3638_v7  ;;  %v1088_v31 = vld [vmem:[%s4314_s3] sm:$0xff] }
  0xc3   : > { %624 = vst.msk [vmem:[#allocation7] sm:$0x3] %vm623_vm0, %v5121_v4  ;;  %v649_v5 = vunpack.c.0.s8 %v648_v2  ;;  %v3641_v9 = vld [vmem:[%s4299_s25 + $0x14] ss:$8 sps:$4 sm:$0xff]   ;;  %v3643_v10 = vld [vmem:[%s4299_s25 + $0x10] ss:$8 sps:$4 sm:$0xff]   ;;  %711 = vmatpush1.bf16.msra.mxu1 %v3640_v8 }
  0xc4   : > { %v629_v11 = vld [vmem:[#allocation17] sm:$0x3]  ;;  %v630_v13 = vld [vmem:[#allocation17 + $0x2] sm:$0x3]  ;;  %v631_v14 = vld [vmem:[#allocation17 + $0x4] sm:$0x3]  ;;  %712 = vmatprep.subr.bf16.mxu1 %v3641_v9 }
  0xc5   : > { %v4382_v12 = vsub.s32 %v649_v5, %v4375_v6  ;;  %v632_v15 = vld [vmem:[#allocation17 + $0x6] sm:$0x3]  ;;  %v633_v16 = vld [vmem:[#allocation17 + $0x8] sm:$0x3]  ;;  %v634_v17 = vld [vmem:[#allocation17 + $0xa] sm:$0x3]  ;;  %v645_v19 = vcombine.low %v629_v11, %v630_v13 }
  0xc6   : > { %v635_v18 = vld [vmem:[#allocation17 + $0xc] sm:$0x3]  ;;  %v646_v20 = vcombine.low %v631_v14, %v632_v15  ;;  %v636_v21 = vld [vmem:[#allocation17 + $0xe] sm:$0x3]  ;;  %v662_v22 = vcombine.low %v633_v16, %v634_v17  ;;  %v3644_v35 = vld [vmem:[%s4309_s17] ss:$8 sps:$4 sm:$0xff]  }
  0xc7   : > { %5156 = vst [vmem:[#allocation32_spill] sm:$0xff] %v4382_v12  ;;  %v653_v23 = vrot.slane %v645_v19, %v4382_v12  ;;  %v663_v25 = vcombine.low %v635_v18, %v636_v21  ;;  %713 = vmatpush1.bf16.msra.mxu1 %v3643_v10  ;;  %v1089_v32 = vld [vmem:[%s4314_s3 + $0x8] sm:$0xff]  ;;  %v1090_v36 = vld [vmem:[%s4314_s3 + $0x10] sm:$0xff]  ;;  %v1091_v37 = vld [vmem:[%s4314_s3 + $0x18] sm:$0xff]  ;;  %vm618_vm2 = vcmask 523264   ;;  %v4414_v51 = vsub.s32 0, %v4375_v6 }
  0xc8   : > { %v660_v24 = vrot.slane %v646_v20, %v4382_v12  ;;  %v670_v26 = vrot.slane %v662_v22, %v4382_v12  ;;  %v3534_v33 = vpack.c.bf16 %v1089_v32, %v1088_v31  ;;  %v3646_v34 = vld [vmem:[%s4309_s17 + $0x4] ss:$8 sps:$4 sm:$0xff]   ;;  %v3538_v38 = vpack.c.bf16 %v1091_v37, %v1090_v36  ;;  %v3649_v39 = vld [vmem:[%s4309_s17 + $0x14] ss:$8 sps:$4 sm:$0xff]   ;;  %619 = vst.msk [vmem:[#allocation6] sm:$0xff] %vm618_vm2, %v5121_v4  ;;  %s5169_s20 = scalar_lea.vmem [#allocation14], %s4270_s19 }
  0xc9   : > { %v677_v28 = vrot.slane %v663_v25, %v4382_v12  ;;  %1045 = vmatprep.subr.bf16.mxu1 %v3646_v34  ;;  %v1092_v40 = vld [vmem:[%s4314_s3 + $0x20] sm:$0xff]  ;;  %620 = vst.msk [vmem:[#allocation6 + $0x8] sm:$0xff] %vm618_vm2, %v5121_v4  ;;  %621 = vst.msk [vmem:[#allocation6 + $0x10] sm:$0xff] %vm618_vm2, %v5121_v4  ;;  %v3647_v41 = vld [vmem:[%s4309_s17 + $0x10] ss:$8 sps:$4 sm:$0xff]   ;;  %v4419_v54 = vsub.s32 1, %v4375_v6 }
  0xca   : > { %v661_v27 = vcombine.low %v653_v23, %v660_v24  ;;  %3535 = vmatprep.subr.bf16.mxu0 %v3534_v33  ;;  %622 = vst.msk [vmem:[#allocation6 + $0x18] sm:$0xff] %vm618_vm2, %v5121_v4  ;;  %v1093_v42 = vld [vmem:[%s4314_s3 + $0x28] sm:$0xff]  ;;  %v1094_v45 = vld [vmem:[%s4314_s3 + $0x30] sm:$0xff]  ;;  %v1095_v46 = vld [vmem:[%s4314_s3 + $0x38] sm:$0xff]  ;;  %s5157_s3 = scalar_lea.vmem [#allocation9], %s4270_s19  ;;  %v4425_v60 = vsub.s32 2, %v4375_v6 }
  0xcb   : > { %v678_v29 = vcombine.low %v670_v26, %v677_v28  ;;  %3537 = vmatpush3.bf16.msra.mxu0 %v3534_v33  ;;  %v3542_v43 = vpack.c.bf16 %v1093_v42, %v1092_v40  ;;  %v3652_v44 = vld [vmem:[%s4309_s17 + $0x24] ss:$8 sps:$4 sm:$0xff]   ;;  %v3546_v47 = vpack.c.bf16 %v1095_v46, %v1094_v45  ;;  %v3650_v48 = vld [vmem:[%s4309_s17 + $0x20] ss:$8 sps:$4 sm:$0xff]   ;;  %v3655_v49 = vld [vmem:[%s4309_s17 + $0x34] ss:$8 sps:$4 sm:$0xff]  }
  0xcc   : > { %3539 = vmatprep.subr.bf16.mxu0 %v3538_v38  ;;  %v3653_v50 = vld [vmem:[%s4309_s17 + $0x30] ss:$8 sps:$4 sm:$0xff]   ;;  %v804_v52 = vld [vmem:[%s4304_s27] sm:$0xf]  ;;  %v799_v62 = vld [vmem:[#allocation7 + $0x4] sm:$0x3] }
  0xcd   : > { %v681_v30 = vpack.c.bf16 %v678_v29, %v661_v27  ;;  %v815_v53 = vrot.slane %v804_v52, %v4414_v51  ;;  %v797_v55 = vld [vmem:[#allocation7] sm:$0x3]  ;;  %v798_v56 = vld [vmem:[#allocation7 + $0x2] sm:$0x3]  ;;  %v835_v57 = vrot.slane %v804_v52, %v4419_v54  ;;  %v3447_v59 = vld [vmem:[%s5157_s3] ss:$0 sm:$0xff]  ;;  %v4431_v2 = vrot.slane %v804_v52, %v4425_v60 }
  0xce   : > { %v4428_v63 = vsub.s32 3, %v4375_v6  ;;  %vm1190_vm3 = vcmask 1041408   ;;  %vm1183_vm4 = vcmask 15360   ;;  %vm2203_vm5 = vcmask 7168   ;;  %p3578_p13 = scmp.eq.s32.totalorder %s4113_s23, 1 }
  0xcf   : > { %3446 = vmatmul.mubr.msk.bf16.vlgmr.msra.gmra.mrb[0].mxu1 %vm706_vm1, %v681_v30  ;;  %3541 = vmatpush3.bf16.msra.mxu0 %v3538_v38  ;;  %v816_v58 = vmul.f32 %v815_v53, %v797_v55  ;;  %v817_v61 = vmul.f32 %v815_v53, %v798_v56  ;;  %v836_v1 = vmul.f32 %v835_v57, %v798_v56  ;;  %vm2848_vm10 = vcmask 1041409  }
  0xd0   : > { %1077 = vmatprep.mubr.bf16.mxu1 %v4017_v0  ;;  %1046 = vmatpush1.bf16.msra.mxu1 %v3644_v35  ;;  %v818_v5 = vmul.f32 %v815_v53, %v799_v62  ;;  %v837_v8 = vmul.f32 %v835_v57, %v799_v62  ;;  %v4437_v13 = vrot.slane %v804_v52, %v4428_v63  ;;  %vm4021_vm11 = vmmov 0   ;;  %p3920_p3 = pnand %p3905_p11, %p3578_p13 }
  0xd1   : > { %1047 = vmatprep.subr.bf16.mxu1 %v3649_v39  ;;  %3543 = vmatprep.subr.bf16.mxu0 %v3542_v43  ;;  %v824_v0 = vadd.f32 %v3447_v59, %v816_v58  ;;  %v825_v7 = vadd.f32 %v3447_v59, %v817_v61  ;;  %v856_v20 = vmul.f32 %v4431_v2, %v799_v62  ;;  %vm3185_vm12 = vcmask 254976  }
  0xd2   : > { %v826_v21 = vadd.f32 %v3447_v59, %v818_v5  ;;  %p3921_p7 = pneg %p3920_p3 }
  0xd3   : > { %3545 = vmatpush3.bf16.msra.mxu0 %v3542_v43  ;;  %v844_v15 = vadd.f32 %v836_v1, %v824_v0  ;;  %v845_v23 = vadd.f32 %v837_v8, %v825_v7 }
  0xd4   : > { %1048 = vmatpush1.bf16.msra.mxu1 %v3647_v41  ;;  %3547 = vmatprep.subr.bf16.mxu0 %v3546_v47  ;;  %p3928_p10 = pnand %p3921_p7, %p4353_p1 }
  0xd5   : > { %1049 = vmatprep.subr.bf16.mxu1 %v3652_v44  ;;  %v864_v34 = vadd.f32 %v856_v20, %v844_v15 }
  0xd7   : > { %3549 = vmatpush3.bf16.msra.mxu0 %v3546_v47 }
  0xd8   : > { %1050 = vmatpush1.bf16.msra.mxu1 %v3650_v48  ;;  %3522 = vmatprep.subr.bf16.mxu0 %v5121_v4 }
  0xd9   : > { %1051 = vmatprep.subr.bf16.mxu1 %v3655_v49 }
  0xdc   : > { %1052 = vmatpush1.bf16.msra.mxu1 %v3653_v50 }
 0x1a2   : > { %v744_v3 = vpop.f32.mrb[0].mxu1 }
 0x1a3   : > { %v755_v9 = vcombine.high %v744_v3, %v744_v3  ;;  %v762_v10 = vrot.slane %v744_v3, %v4382_v12  ;;  %v4434_v11 = vpop.f32.mrb[1].mxu1 }
 0x1a4   : > { %5158 = vst [vmem:[#allocation33_spill] sm:$0xff] %v4434_v11  ;;  %v748_v14 = vpop.f32.mrb[2].mxu1 }
 0x1a5   : > { %v769_v16 = vrot.slane %v755_v9, %v4382_v12  ;;  %v770_v17 = vcombine.high %v762_v10, %v762_v10  ;;  %v819_v18 = vmul.f32 %v815_v53, %v762_v10  ;;  %v4440_v19 = vpop.f32.mrb[3].mxu1  ;;  %v838_v22 = vmul.f32 %v835_v57, %v762_v10 }
 0x1a6   : > { %v772_v24 = vcombine.high %v748_v14, %v748_v14  ;;  %v857_v28 = vmul.f32 %v4431_v2, %v762_v10  ;;  %v876_v33 = vmul.f32 %v4437_v13, %v762_v10  ;;  %v779_v37 = vrot.slane %v748_v14, %v4382_v12 }
 0x1a7   : > { %v771_v25 = vcombine.high %v769_v16, %v769_v16  ;;  %v820_v26 = vmul.f32 %v815_v53, %v770_v17  ;;  %v821_v27 = vmul.f32 %v815_v53, %v769_v16  ;;  %v827_v29 = vadd.f32 %v3447_v59, %v819_v18 }
 0x1a8   : > { %v839_v30 = vmul.f32 %v835_v57, %v770_v17  ;;  %v840_v32 = vmul.f32 %v835_v57, %v769_v16  ;;  %v846_v36 = vadd.f32 %v838_v22, %v826_v21  ;;  %v786_v38 = vrot.slane %v772_v24, %v4382_v12 }
 0x1a9   : > { %v829_v31 = vadd.f32 %v3447_v59, %v821_v27  ;;  %v828_v35 = vadd.f32 %v3447_v59, %v820_v26  ;;  %v859_v39 = vmul.f32 %v4431_v2, %v769_v16  ;;  %v865_v40 = vadd.f32 %v857_v28, %v845_v23 }
 0x1aa   : > { %v822_v41 = vmul.f32 %v815_v53, %v771_v25  ;;  %v841_v42 = vmul.f32 %v835_v57, %v771_v25  ;;  %v847_v43 = vadd.f32 %v839_v30, %v827_v29  ;;  %v787_v44 = vcombine.high %v779_v37, %v779_v37  ;;  %802 = vst.msk [vmem:[#allocation7 + $0x2] sm:$0x3] %vm623_vm0, %v786_v38 }
 0x1ab   : > { %v788_v45 = vcombine.high %v786_v38, %v786_v38  ;;  %v823_v46 = vmul.f32 %v815_v53, %v779_v37  ;;  %v842_v48 = vmul.f32 %v835_v57, %v779_v37  ;;  %v861_v50 = vmul.f32 %v4431_v2, %v779_v37 }
 0x1ac   : > { %v830_v47 = vadd.f32 %v3447_v59, %v822_v41  ;;  %v849_v49 = vadd.f32 %v841_v42, %v829_v31  ;;  %v848_v52 = vadd.f32 %v840_v32, %v828_v35  ;;  %v878_v55 = vmul.f32 %v4437_v13, %v769_v16  ;;  %801 = vst.msk [vmem:[#allocation7] sm:$0x3] %vm623_vm0, %v787_v44 }
 0x1ad   : > { %803 = vst.msk [vmem:[#allocation7 + $0x4] sm:$0x3] %vm623_vm0, %v788_v45  ;;  %v831_v56 = vadd.f32 %v3447_v59, %v823_v46  ;;  %v843_v58 = vmul.f32 %v835_v57, %v787_v44  ;;  %v862_v62 = vmul.f32 %v4431_v2, %v787_v44  ;;  %v863_v0 = vmul.f32 %v4431_v2, %v786_v38 }
 0x1ae   : > { %v850_v61 = vadd.f32 %v842_v48, %v830_v47  ;;  %v869_v53 = vadd.f32 %v861_v50, %v849_v49  ;;  %v882_v3 = vmul.f32 %v4437_v13, %v786_v38  ;;  %v858_v5 = vmul.f32 %v4431_v2, %v770_v17 }
 0x1af   : > { %v851_v1 = vadd.f32 %v843_v58, %v831_v56  ;;  %v867_v7 = vadd.f32 %v859_v39, %v847_v43  ;;  %v877_v9 = vmul.f32 %v4437_v13, %v770_v17  ;;  %v879_v59 = vmul.f32 %v4437_v13, %v771_v25 }
 0x1b0   : > { %v870_v8 = vadd.f32 %v862_v62, %v850_v61  ;;  %v4459_v57 = vadd.f32 %v876_v33, %v864_v34  ;;  %v883_v14 = vmul.f32 %v4437_v13, %v788_v45  ;;  %v866_v15 = vadd.f32 %v858_v5, %v846_v36 }
 0x1b1   : > { %v871_v10 = vadd.f32 %v863_v0, %v851_v1  ;;  %v860_v16 = vmul.f32 %v4431_v2, %v771_v25  ;;  %v885_v20 = vadd.f32 %v877_v9, %v865_v40  ;;  %v4465_v21 = vadd.f32 %v879_v59, %v867_v7 }
 0x1b2   : > { %v4463_v18 = vadd.f32 %v882_v3, %v870_v8  ;;  %v892_v22 = vsub.f32 0.0, %v4459_v57  ;;  %v880_v23 = vmul.f32 %v4437_v13, %v779_v37  ;;  %v886_v17 = vadd.f32 %v878_v55, %v866_v15 }
 0x1b3   : > { %v868_v24 = vadd.f32 %v860_v16, %v848_v52  ;;  %v881_v26 = vmul.f32 %v4437_v13, %v787_v44  ;;  %v893_v28 = vsub.f32 0.0, %v885_v20  ;;  %v895_v29 = vsub.f32 0.0, %v4465_v21 }
 0x1b4   : > { %v898_v27 = vsub.f32 0.0, %v4463_v18  ;;  %v4472_v30 = vadd.f32 %v883_v14, %v871_v10  ;;  %v894_v2 = vsub.f32 0.0, %v886_v17  ;;  %v900_v25 = vmul.f32 1.442695, %v892_v22 }
 0x1b5   : > { %v888_v31 = vadd.f32 %v880_v23, %v868_v24  ;;  %v889_v32 = vadd.f32 %v881_v26, %v869_v53  ;;  %v902_v34 = vmul.f32 1.442695, %v893_v28  ;;  %v906_v35 = vmul.f32 1.442695, %v895_v29 }
 0x1b6   : > { %v912_v33 = vmul.f32 1.442695, %v898_v27  ;;  %3660 = vpow2.f32 %v900_v25  ;;  %v904_v36 = vmul.f32 1.442695, %v894_v2  ;;  %v899_v13 = vsub.f32 0.0, %v4472_v30 }
 0x1b7   : > { %v896_v37 = vsub.f32 0.0, %v888_v31  ;;  %v897_v38 = vsub.f32 0.0, %v889_v32 }
 0x1b8   : > { %3662 = vpow2.f32 %v912_v33  ;;  %v914_v41 = vmul.f32 1.442695, %v899_v13  ;;  %v1664_v13 = vsub.s32 5, %v4375_v6 }
 0x1b9   : > { %3664 = vpow2.f32 %v902_v34  ;;  %v908_v39 = vmul.f32 1.442695, %v896_v37  ;;  %v910_v40 = vmul.f32 1.442695, %v897_v38 }
 0x1ba   : > { %3666 = vpow2.f32 %v904_v36 }
 0x1bb   : > { %3668 = vpow2.f32 %v906_v35 }
 0x1bc   : > { %3670 = vpow2.f32 %v908_v39  ;;  %v1653_v39 = vsub.s32 4, %v4375_v6 }
 0x1bd   : > { %3672 = vpow2.f32 %v910_v40  ;;  %v1686_v40 = vsub.s32 7, %v4375_v6 }
 0x1be   : > { %3674 = vpow2.f32 %v914_v41 }
 0x1c0   : > { %v3661_v42 = vpop.eup %3660 }
 0x1c1   : > { %v916_v44 = vadd.f32 1.0, %v3661_v42 }
 0x1c2   : > { %v3663_v43 = vpop.eup %3662 }
 0x1c3   : > { %v3665_v45 = vpop.eup %3664  ;;  %v922_v46 = vadd.f32 1.0, %v3663_v43  ;;  %3676 = vrcp.f32 %v916_v44 }
 0x1c4   : > { %v3667_v47 = vpop.eup %3666  ;;  %v917_v48 = vadd.f32 1.0, %v3665_v45  ;;  %v1675_v45 = vsub.s32 6, %v4375_v6 }
 0x1c5   : > { %v3669_v49 = vpop.eup %3668  ;;  %3678 = vrcp.f32 %v922_v46  ;;  %v918_v50 = vadd.f32 1.0, %v3667_v47 }
 0x1c6   : > { %v3671_v52 = vpop.eup %3670  ;;  %v919_v55 = vadd.f32 1.0, %v3669_v49  ;;  %3680 = vrcp.f32 %v917_v48 }
 0x1c7   : > { %v3673_v56 = vpop.eup %3672  ;;  %3682 = vrcp.f32 %v918_v50  ;;  %v920_v58 = vadd.f32 1.0, %v3671_v52 }
 0x1c8   : > { %3684 = vrcp.f32 %v919_v55  ;;  %v921_v61 = vadd.f32 1.0, %v3673_v56  ;;  %v3675_v62 = vpop.eup %3674 }
 0x1c9   : > { %3686 = vrcp.f32 %v920_v58  ;;  %v923_v0 = vadd.f32 1.0, %v3675_v62 }
 0x1ca   : > { %3688 = vrcp.f32 %v921_v61 }
 0x1cb   : > { %3690 = vrcp.f32 %v923_v0 }
 0x1cd   : > { %v3677_v53 = vpop.eup %3676 }
 0x1ce   : > { %v940_v7 = vmul.f32 %v3677_v53, %v4459_v57 }
 0x1cf   : > { %v3679_v1 = vpop.eup %3678 }
 0x1d0   : > { %v3681_v3 = vpop.eup %3680  ;;  %v946_v26 = vmul.f32 %v3679_v1, %v4463_v18 }
 0x1d1   : > { %v3683_v5 = vpop.eup %3682  ;;  %v941_v8 = vmul.f32 %v3681_v3, %v885_v20 }
 0x1d2   : > { %v3685_v9 = vpop.eup %3684  ;;  %v942_v10 = vmul.f32 %v3683_v5, %v886_v17 }
 0x1d3   : > { %v3687_v59 = vpop.eup %3686  ;;  %v943_v14 = vmul.f32 %v3685_v9, %v4465_v21  ;;  %v956_v15 = vcombine.low %v940_v7, %v941_v8 }
 0x1d4   : > { %v3689_v16 = vpop.eup %3688  ;;  %v944_v22 = vmul.f32 %v3687_v59, %v888_v31 }
 0x1d5   : > { %v957_v23 = vcombine.low %v942_v10, %v943_v14  ;;  %v945_v24 = vmul.f32 %v3689_v16, %v889_v32  ;;  %v3691_v27 = vpop.eup %3690  ;;  %v964_v28 = vrot.slane %v956_v15, %v4382_v12 }
 0x1d6   : > { %v947_v57 = vmul.f32 %v3691_v27, %v4472_v30  ;;  %v1175_v30 = vld [vmem:[%s4280_s16] sm:$0x3] }
 0x1d7   : > { %v971_v29 = vrot.slane %v957_v23, %v4382_v12  ;;  %v973_v20 = vcombine.low %v944_v22, %v945_v24  ;;  %3517 = vmatprep.subr.msk.mxu1 %vm1190_vm3, %v1175_v30 }
 0x1d8   : > { %v974_v17 = vcombine.low %v946_v26, %v947_v57 }
 0x1d9   : > { %v4481_v2 = vcombine.low %v964_v28, %v971_v29  ;;  %v981_v21 = vrot.slane %v973_v20, %v4382_v12 }
 0x1da   : > { %v988_v25 = vrot.slane %v974_v17, %v4382_v12 }
 0x1db   : > { %3514 = vmatprep.mubr.msk.f32.mxu0 %vm618_vm2, %v4481_v2 }
 0x1dc   : > { %v4487_v31 = vcombine.low %v981_v21, %v988_v25 }
 0x1de   : > { %5159 = vst [vmem:[#allocation34_spill] sm:$0xff] %v4487_v31  ;;  %3515 = vmatmul.mubr.msk.f32.vlgmr.msra.gmra.mrb[0].mxu0 %vm618_vm2, %v4487_v31  ;;  %v992_v18 = vpack.c.bf16 %v4487_v31, %v4481_v2 }
 0x1e0   : > { %3456 = vmatmul.mubr.msk.bf16.vlgmr.msra.gmra.mrb[4].mxu1 %vm618_vm2, %v992_v18 }
 0x1e1   : > { %3518 = vmatpush3.msk.msra.mxu1 %vm1190_vm3, %v1175_v30 }
 0x2b1   : > { %v3516_v32 = vpop.f32.mrb[0].mxu0 }
 0x2b2   : > { %v1166_v33 = vpop.f32.mrb[1].mxu0 }
 0x2b3   : > { %v1079_v34 = vpop.f32.mrb[4].mxu1  ;;  %3519 = vmatprep.mubr.msk.f32.mxu1 %vm1183_vm4, %v1166_v33 }
 0x2b4   : > { %v1081_v35 = vpop.f32.mrb[5].mxu1  ;;  %3520 = vmatmul.mubr.msk.f32.vlgmr.msra.gmra.mrb[8].mxu1 %vm1183_vm4, %v3516_v32  ;;  %v1621_v36 = vrot.slane %v1079_v34, %v4419_v54  ;;  %v1610_v41 = vrot.slane %v1079_v34, %v4414_v51  ;;  %v1643_v49 = vrot.slane %v1079_v34, %v4428_v63  ;;  %v1632_v55 = vrot.slane %v1079_v34, %v4425_v60 }
 0x2b5   : > { %v4496_v37 = vpop.f32.mrb[6].mxu1  ;;  %v1665_v56 = vrot.slane %v1079_v34, %v1664_v13  ;;  %v1654_v58 = vrot.slane %v1079_v34, %v1653_v39  ;;  %v1687_v61 = vrot.slane %v1079_v34, %v1686_v40  ;;  %v1676_v62 = vrot.slane %v1079_v34, %v1675_v45 }
 0x2b6   : > { %1627 = vbcast.lane.b32.xlu1 %v1621_v36, 264  ;;  %1623 = vbcast.lane.b32.xlu0 %v1621_v36, 256  ;;  %v4498_v38 = vpop.f32.mrb[7].mxu1  ;;  %v4505_v42 = vrot.slane %v4496_v37, %v1664_v13  ;;  %v4508_v43 = vrot.slane %v4496_v37, %v1653_v39  ;;  %v4511_v44 = vrot.slane %v4496_v37, %v1686_v40 }
 0x2b7   : > { %v4515_v46 = vrot.slane %v4498_v38, %v1664_v13  ;;  %v4518_v47 = vrot.slane %v4498_v38, %v1686_v40  ;;  %v4521_v48 = vrot.slane %v4498_v38, %v1653_v39  ;;  %v4525_v50 = vrot.slane %v4498_v38, %v1675_v45 }
 0x2b8   : > { %v4528_v52 = vrot.slane %v4496_v37, %v1675_v45  ;;  %v2063_v0 = vrot.slane %v1081_v35, %v4428_v63  ;;  %v2041_v53 = vrot.slane %v1081_v35, %v4419_v54  ;;  %v2085_v1 = vrot.slane %v1081_v35, %v1664_v13 }
 0x2b9   : > { %v2107_v3 = vrot.slane %v1081_v35, %v1686_v40  ;;  %v2030_v5 = vrot.slane %v1081_v35, %v4414_v51  ;;  %v2052_v7 = vrot.slane %v1081_v35, %v4425_v60  ;;  %v2074_v8 = vrot.slane %v1081_v35, %v1653_v39 }
 0x2ba   : > { %1616 = vbcast.lane.b32.xlu1 %v1610_v41, 264  ;;  %1612 = vbcast.lane.b32.xlu0 %v1610_v41, 256  ;;  %v2096_v9 = vrot.slane %v1081_v35, %v1675_v45  ;;  %v1709_v59 = vrot.slane %v4496_v37, %v4419_v54  ;;  %v1698_v10 = vrot.slane %v4496_v37, %v4414_v51 }
 0x2bb   : > { %v1731_v14 = vrot.slane %v4496_v37, %v4428_v63  ;;  %v1720_v15 = vrot.slane %v4496_v37, %v4425_v60  ;;  %v2129_v16 = vrot.slane %v4498_v38, %v4419_v54  ;;  %v2151_v22 = vrot.slane %v4498_v38, %v4428_v63 }
 0x2bc   : > { %v2118_v23 = vrot.slane %v4498_v38, %v4414_v51  ;;  %v2140_v54 = vrot.slane %v4498_v38, %v4425_v60 }
 0x2be   : > { %1649 = vbcast.lane.b32.xlu1 %v1643_v49, 264  ;;  %1645 = vbcast.lane.b32.xlu0 %v1643_v49, 256 }
 0x2c2   : > { %1638 = vbcast.lane.b32.xlu1 %v1632_v55, 264  ;;  %1634 = vbcast.lane.b32.xlu0 %v1632_v55, 256 }
 0x2c6   : > { %1671 = vbcast.lane.b32.xlu1 %v1665_v56, 264  ;;  %1667 = vbcast.lane.b32.xlu0 %v1665_v56, 256 }
 0x2ca   : > { %1660 = vbcast.lane.b32.xlu1 %v1654_v58, 264  ;;  %1656 = vbcast.lane.b32.xlu0 %v1654_v58, 256 }
 0x2ce   : > { %1693 = vbcast.lane.b32.xlu1 %v1687_v61, 264  ;;  %1689 = vbcast.lane.b32.xlu0 %v1687_v61, 256 }
 0x2d2   : > { %1682 = vbcast.lane.b32.xlu1 %v1676_v62, 264  ;;  %1678 = vbcast.lane.b32.xlu0 %v1676_v62, 256 }
 0x2d6   : > { %2065 = vbcast.lane.b32.xlu1 %v2063_v0, 256  ;;  %2043 = vbcast.lane.b32.xlu0 %v2041_v53, 256 }
 0x2da   : > { %2069 = vbcast.lane.b32.xlu1 %v2063_v0, 264  ;;  %2047 = vbcast.lane.b32.xlu0 %v2041_v53, 264 }
 0x2de   : > { %2091 = vbcast.lane.b32.xlu1 %v2085_v1, 264  ;;  %2087 = vbcast.lane.b32.xlu0 %v2085_v1, 256 }
 0x2e2   : > { %2113 = vbcast.lane.b32.xlu1 %v2107_v3, 264  ;;  %2109 = vbcast.lane.b32.xlu0 %v2107_v3, 256 }
 0x2e6   : > { %2036 = vbcast.lane.b32.xlu1 %v2030_v5, 264  ;;  %2032 = vbcast.lane.b32.xlu0 %v2030_v5, 256 }
 0x2ea   : > { %2058 = vbcast.lane.b32.xlu1 %v2052_v7, 264  ;;  %2054 = vbcast.lane.b32.xlu0 %v2052_v7, 256 }
 0x2ee   : > { %2080 = vbcast.lane.b32.xlu1 %v2074_v8, 264  ;;  %2076 = vbcast.lane.b32.xlu0 %v2074_v8, 256 }
 0x2f2   : > { %2102 = vbcast.lane.b32.xlu1 %v2096_v9, 264  ;;  %2098 = vbcast.lane.b32.xlu0 %v2096_v9, 256 }
 0x2f6   : > { %1715 = vbcast.lane.b32.xlu1 %v1709_v59, 264  ;;  %1711 = vbcast.lane.b32.xlu0 %v1709_v59, 256 }
 0x2fa   : > { %1704 = vbcast.lane.b32.xlu1 %v1698_v10, 264  ;;  %1700 = vbcast.lane.b32.xlu0 %v1698_v10, 256 }
 0x2fe   : > { %1737 = vbcast.lane.b32.xlu1 %v1731_v14, 264  ;;  %1733 = vbcast.lane.b32.xlu0 %v1731_v14, 256 }
 0x302   : > { %1726 = vbcast.lane.b32.xlu1 %v1720_v15, 264  ;;  %1722 = vbcast.lane.b32.xlu0 %v1720_v15, 256 }
 0x306   : > { %1759 = vbcast.lane.b32.xlu1 %v4505_v42, 264  ;;  %1755 = vbcast.lane.b32.xlu0 %v4505_v42, 256 }
 0x30a   : > { %1748 = vbcast.lane.b32.xlu1 %v4508_v43, 264  ;;  %1744 = vbcast.lane.b32.xlu0 %v4508_v43, 256 }
 0x30e   : > { %1781 = vbcast.lane.b32.xlu1 %v4511_v44, 264  ;;  %1777 = vbcast.lane.b32.xlu0 %v4511_v44, 256 }
 0x312   : > { %2135 = vbcast.lane.b32.xlu1 %v2129_v16, 264  ;;  %2131 = vbcast.lane.b32.xlu0 %v2129_v16, 256 }
 0x316   : > { %2157 = vbcast.lane.b32.xlu1 %v2151_v22, 264  ;;  %2153 = vbcast.lane.b32.xlu0 %v2151_v22, 256 }
 0x31a   : > { %2179 = vbcast.lane.b32.xlu1 %v4515_v46, 264  ;;  %2175 = vbcast.lane.b32.xlu0 %v4515_v46, 256 }
 0x31e   : > { %2201 = vbcast.lane.b32.xlu1 %v4518_v47, 264  ;;  %2197 = vbcast.lane.b32.xlu0 %v4518_v47, 256 }
 0x322   : > { %2124 = vbcast.lane.b32.xlu1 %v2118_v23, 264  ;;  %2120 = vbcast.lane.b32.xlu0 %v2118_v23, 256 }
 0x326   : > { %2146 = vbcast.lane.b32.xlu1 %v2140_v54, 264  ;;  %2142 = vbcast.lane.b32.xlu0 %v2140_v54, 256 }
 0x328   : > { %v4561_v63 = vpop.permute.xlu1 %1627  ;;  %v4563_v24 = vpop.permute.xlu0 %1623 }
 0x32a   : > { %2168 = vbcast.lane.b32.xlu1 %v4521_v48, 264  ;;  %2164 = vbcast.lane.b32.xlu0 %v4521_v48, 256 }
 0x32c   : > { %v4567_v26 = vpop.permute.xlu1 %1616  ;;  %v4569_v27 = vpop.permute.xlu0 %1612 }
 0x32e   : > { %2190 = vbcast.lane.b32.xlu1 %v4525_v50, 264  ;;  %2186 = vbcast.lane.b32.xlu0 %v4525_v50, 256 }
 0x330   : > { %v4573_v28 = vpop.permute.xlu1 %1649  ;;  %v4575_v60 = vpop.permute.xlu0 %1645 }
 0x332   : > { %1770 = vbcast.lane.b32.xlu1 %v4528_v52, 264  ;;  %1766 = vbcast.lane.b32.xlu0 %v4528_v52, 256 }
 0x334   : > { %v4579_v29 = vpop.permute.xlu1 %1638  ;;  %v4581_v57 = vpop.permute.xlu0 %1634 }
 0x338   : > { %v4583_v20 = vpop.permute.xlu1 %1671  ;;  %v4585_v17 = vpop.permute.xlu0 %1667 }
 0x33c   : > { %v4587_v21 = vpop.permute.xlu1 %1660  ;;  %v4589_v25 = vpop.permute.xlu0 %1656 }
 0x340   : > { %v4591_v18 = vpop.permute.xlu1 %1693  ;;  %v4593_v30 = vpop.permute.xlu0 %1689 }
 0x341   : > { %5160 = vst [vmem:[#allocation35_spill] sm:$0xff] %v4591_v18  ;;  %5161 = vst [vmem:[#allocation36_spill] sm:$0xff] %v4593_v30 }
 0x344   : > { %v4595_v32 = vpop.permute.xlu1 %1682  ;;  %v4597_v33 = vpop.permute.xlu0 %1678 }
 0x345   : > { %5162 = vst [vmem:[#allocation37_spill] sm:$0xff] %v4595_v32 }
 0x348   : > { %v2066_v34 = vpop.permute.xlu1 %2065  ;;  %v2044_v35 = vpop.permute.xlu0 %2043 }
 0x349   : > { %2210 = vst.msk [vmem:[#allocation4 + $0x30] sm:$0xff] %vm2203_vm5, %v2066_v34  ;;  %2206 = vst.msk [vmem:[#allocation4 + $0x10] sm:$0xff] %vm2203_vm5, %v2044_v35 }
 0x34c   : > { %v2070_v36 = vpop.permute.xlu1 %2069  ;;  %v2048_v37 = vpop.permute.xlu0 %2047 }
 0x34d   : > { %2211 = vst.msk [vmem:[#allocation4 + $0x38] sm:$0xff] %vm2203_vm5, %v2070_v36  ;;  %2207 = vst.msk [vmem:[#allocation4 + $0x18] sm:$0xff] %vm2203_vm5, %v2048_v37 }
 0x350   : > { %v2092_v38 = vpop.permute.xlu1 %2091  ;;  %v2088_v13 = vpop.permute.xlu0 %2087  ;;  %v2269_v39 = vld [vmem:[#allocation4 + $0x10] sm:$0xff] }
 0x351   : > { %2215 = vst.msk [vmem:[#allocation4 + $0x58] sm:$0xff] %vm2203_vm5, %v2092_v38  ;;  %2214 = vst.msk [vmem:[#allocation4 + $0x50] sm:$0xff] %vm2203_vm5, %v2088_v13  ;;  %2283 = vperm.xlu0 %3636, %v2269_v39   ;;  %v2343_v46 = vld [vmem:[#allocation4 + $0x30] sm:$0xff] }
 0x354   : > { %v2114_v40 = vpop.permute.xlu1 %2113  ;;  %v2110_v41 = vpop.permute.xlu0 %2109  ;;  %v2270_v42 = vld [vmem:[#allocation4 + $0x18] sm:$0xff] }
 0x355   : > { %v2344_v43 = vld [vmem:[#allocation4 + $0x38] sm:$0xff]  ;;  %2219 = vst.msk [vmem:[#allocation4 + $0x78] sm:$0xff] %vm2203_vm5, %v2114_v40  ;;  %2218 = vst.msk [vmem:[#allocation4 + $0x70] sm:$0xff] %vm2203_vm5, %v2110_v41  ;;  %2288 = vperm.xlu1 %3637, %v2270_v42   ;;  %v3459_v41 = vld [vmem:[%s5169_s20] ss:$0 sm:$0xff] }
 0x356   : > { %2362 = vperm.xlu0 %3636, %v2344_v43  }
 0x358   : > { %v2037_v44 = vpop.permute.xlu1 %2036  ;;  %v2033_v45 = vpop.permute.xlu0 %2032  ;;  %v2418_v47 = vld [vmem:[#allocation4 + $0x58] sm:$0xff]  ;;  %v2417_v50 = vld [vmem:[#allocation4 + $0x50] sm:$0xff] }
 0x359   : > { %2205 = vst.msk [vmem:[#allocation4 + $0x8] sm:$0xff] %vm2203_vm5, %v2037_v44  ;;  %2204 = vst.msk [vmem:[#allocation4] sm:$0xff] %vm2203_vm5, %v2033_v45  ;;  %2357 = vperm.xlu1 %3637, %v2343_v46  }
 0x35a   : > { %2436 = vperm.xlu0 %3636, %v2418_v47  }
 0x35c   : > { %v2059_v48 = vpop.permute.xlu1 %2058  ;;  %v2055_v49 = vpop.permute.xlu0 %2054  ;;  %v2492_v52 = vld [vmem:[#allocation4 + $0x78] sm:$0xff]  ;;  %v2491_v58 = vld [vmem:[#allocation4 + $0x70] sm:$0xff] }
 0x35d   : > { %2209 = vst.msk [vmem:[#allocation4 + $0x28] sm:$0xff] %vm2203_vm5, %v2059_v48  ;;  %2208 = vst.msk [vmem:[#allocation4 + $0x20] sm:$0xff] %vm2203_vm5, %v2055_v49  ;;  %2431 = vperm.xlu1 %3637, %v2417_v50  }
 0x35e   : > { %2510 = vperm.xlu0 %3636, %v2492_v52  }
 0x360   : > { %v2081_v55 = vpop.permute.xlu1 %2080  ;;  %v2077_v56 = vpop.permute.xlu0 %2076  ;;  %v2268_v61 = vld [vmem:[#allocation4 + $0x8] sm:$0xff]  ;;  %v2267_v53 = vld [vmem:[#allocation4] sm:$0xff] }
 0x361   : > { %2213 = vst.msk [vmem:[#allocation4 + $0x48] sm:$0xff] %vm2203_vm5, %v2081_v55  ;;  %2212 = vst.msk [vmem:[#allocation4 + $0x40] sm:$0xff] %vm2203_vm5, %v2077_v56  ;;  %2505 = vperm.xlu1 %3637, %v2491_v58  }
 0x362   : > { %2278 = vperm.xlu0 %3636, %v2268_v61  }
 0x364   : > { %v2103_v62 = vpop.permute.xlu1 %2102  ;;  %v2099_v0 = vpop.permute.xlu0 %2098  ;;  %v2342_v1 = vld [vmem:[#allocation4 + $0x28] sm:$0xff]  ;;  %v2341_v7 = vld [vmem:[#allocation4 + $0x20] sm:$0xff] }
 0x365   : > { %2217 = vst.msk [vmem:[#allocation4 + $0x68] sm:$0xff] %vm2203_vm5, %v2103_v62  ;;  %2216 = vst.msk [vmem:[#allocation4 + $0x60] sm:$0xff] %vm2203_vm5, %v2099_v0  ;;  %2273 = vperm.xlu1 %3637, %v2267_v53  }
 0x366   : > { %2352 = vperm.xlu0 %3636, %v2342_v1  }
 0x368   : > { %v4615_v3 = vpop.permute.xlu1 %1715  ;;  %v4617_v5 = vpop.permute.xlu0 %1711  ;;  %v2416_v8 = vld [vmem:[#allocation4 + $0x48] sm:$0xff]  ;;  %v2415_v10 = vld [vmem:[#allocation4 + $0x40] sm:$0xff] }
 0x369   : > { %2347 = vperm.xlu1 %3637, %v2341_v7  }
 0x36a   : > { %2426 = vperm.xlu0 %3636, %v2416_v8  }
 0x36c   : > { %v4619_v9 = vpop.permute.xlu1 %1704  ;;  %v4621_v59 = vpop.permute.xlu0 %1700  ;;  %v2490_v14 = vld [vmem:[#allocation4 + $0x68] sm:$0xff]  ;;  %v2489_v22 = vld [vmem:[#allocation4 + $0x60] sm:$0xff] }
 0x36d   : > { %2421 = vperm.xlu1 %3637, %v2415_v10  }
 0x36e   : > { %2500 = vperm.xlu0 %3636, %v2490_v14  }
 0x370   : > { %v4623_v15 = vpop.permute.xlu1 %1737  ;;  %v4625_v16 = vpop.permute.xlu0 %1733 }
 0x371   : > { %2495 = vperm.xlu1 %3637, %v2489_v22  }
 0x374   : > { %v4627_v23 = vpop.permute.xlu1 %1726  ;;  %v4629_v54 = vpop.permute.xlu0 %1722 }
 0x378   : > { %v4631_v34 = vpop.permute.xlu1 %1759  ;;  %v4633_v35 = vpop.permute.xlu0 %1755 }
 0x379   : > { %5163 = vst [vmem:[#allocation38_spill] sm:$0xff] %v4631_v34  ;;  %5164 = vst [vmem:[#allocation39_spill] sm:$0xff] %v4633_v35 }
 0x37c   : > { %v4635_v36 = vpop.permute.xlu1 %1748  ;;  %v4637_v37 = vpop.permute.xlu0 %1744 }
 0x37d   : > { %5165 = vst [vmem:[#allocation40_spill] sm:$0xff] %v4635_v36  ;;  %5166 = vst [vmem:[#allocation41_spill] sm:$0xff] %v4637_v37 }
 0x380   : > { %v4639_v38 = vpop.permute.xlu1 %1781  ;;  %v4641_v13 = vpop.permute.xlu0 %1777 }
 0x381   : > { %5167 = vst [vmem:[#allocation42_spill] sm:$0xff] %v4639_v38  ;;  %5168 = vst [vmem:[#allocation43_spill] sm:$0xff] %v4641_v13 }
 0x384   : > { %v2136_v39 = vpop.permute.xlu1 %2135  ;;  %v2132_v40 = vpop.permute.xlu0 %2131 }
 0x385   : > { %2223 = vst.msk [vmem:[#allocation4 + $0x98] sm:$0xff] %vm2203_vm5, %v2136_v39  ;;  %2222 = vst.msk [vmem:[#allocation4 + $0x90] sm:$0xff] %vm2203_vm5, %v2132_v40 }
 0x387   : > { %v3521_v42 = vpop.f32.mrb[8].mxu1 }
 0x388   : > { %v4647_v43 = vadd.f32 %v3521_v42, %v3459_v41  ;;  %v2158_v44 = vpop.permute.xlu1 %2157  ;;  %v2154_v45 = vpop.permute.xlu0 %2153 }
 0x389   : > { %2227 = vst.msk [vmem:[#allocation4 + $0xb8] sm:$0xff] %vm2203_vm5, %v2158_v44  ;;  %2226 = vst.msk [vmem:[#allocation4 + $0xb0] sm:$0xff] %vm2203_vm5, %v2154_v45  ;;  %v1260_v46 = vpop.f32.mrb[9].mxu1 }
 0x38a   : > { %v1273_v47 = vmul.f32 1.442695, %v4647_v43  ;;  %v4652_v48 = vadd.f32 %v3459_v41, %v1260_v46  ;;  %v4020_v46 = vmov 1966171168   ;;  %vm1270_vm7 = vcmp.gt.f32.partialorder %v4647_v43, 20.0 }
 0x38c   : > { %3692 = vpow2.f32 %v1273_v47  ;;  %v1271_v49 = vmul.f32 1.442695, %v4652_v48  ;;  %v2180_v50 = vpop.permute.xlu1 %2179  ;;  %v2176_v52 = vpop.permute.xlu0 %2175  ;;  %v2565_v55 = vld [vmem:[#allocation4 + $0x90] sm:$0xff]  ;;  %v2566_v56 = vld [vmem:[#allocation4 + $0x98] sm:$0xff]  ;;  %v1303_v47 = vunpack.c.l.s4 %v4020_v46  ;;  %vm1269_vm8 = vcmp.gt.f32.partialorder %v4652_v48, 20.0 }
 0x38d   : > { %2231 = vst.msk [vmem:[#allocation4 + $0xd8] sm:$0xff] %vm2203_vm5, %v2180_v50  ;;  %2230 = vst.msk [vmem:[#allocation4 + $0xd0] sm:$0xff] %vm2203_vm5, %v2176_v52  ;;  %2579 = vperm.xlu1 %3637, %v2565_v55   ;;  %2584 = vperm.xlu0 %3636, %v2566_v56  }
 0x38e   : > { %3694 = vpow2.f32 %v1271_v49 }
 0x390   : > { %v2202_v58 = vpop.permute.xlu1 %2201  ;;  %v2198_v61 = vpop.permute.xlu0 %2197  ;;  %v2639_v62 = vld [vmem:[#allocation4 + $0xb0] sm:$0xff]  ;;  %v2640_v0 = vld [vmem:[#allocation4 + $0xb8] sm:$0xff] }
 0x391   : > { %2235 = vst.msk [vmem:[#allocation4 + $0xf8] sm:$0xff] %vm2203_vm5, %v2202_v58  ;;  %2234 = vst.msk [vmem:[#allocation4 + $0xf0] sm:$0xff] %vm2203_vm5, %v2198_v61  ;;  %2653 = vperm.xlu1 %3637, %v2639_v62   ;;  %2658 = vperm.xlu0 %3636, %v2640_v0   ;;  %v1304_v61 = vunpack.c.0.s8 %v1303_v47 }
 0x394   : > { %v2125_v53 = vpop.permute.xlu1 %2124  ;;  %v2121_v1 = vpop.permute.xlu0 %2120  ;;  %v2713_v7 = vld [vmem:[#allocation4 + $0xd0] sm:$0xff]  ;;  %v2714_v8 = vld [vmem:[#allocation4 + $0xd8] sm:$0xff] }
 0x395   : > { %2221 = vst.msk [vmem:[#allocation4 + $0x88] sm:$0xff] %vm2203_vm5, %v2125_v53  ;;  %2220 = vst.msk [vmem:[#allocation4 + $0x80] sm:$0xff] %vm2203_vm5, %v2121_v1  ;;  %2727 = vperm.xlu1 %3637, %v2713_v7   ;;  %2732 = vperm.xlu0 %3636, %v2714_v8   ;;  %v2954_v7 = vsub.f32 0.0, %v4434_v11 }
 0x396   : > { %v3693_v10 = vpop.eup %3692 }
 0x397   : > { %v1284_v14 = vadd.f32 1.0, %v3693_v10  ;;  %v1287_v45 = vmul.f32 -0.5, %v3693_v10  ;;  %v1290_v8 = vand.u32 2147483647, %v3693_v10 }
 0x398   : > { %v3695_v22 = vpop.eup %3694  ;;  %v2147_v39 = vpop.permute.xlu1 %2146  ;;  %v2787_v41 = vld [vmem:[#allocation4 + $0xf0] sm:$0xff]  ;;  %v2788_v42 = vld [vmem:[#allocation4 + $0xf8] sm:$0xff] }
 0x399   : > { %v2143_v40 = vpop.permute.xlu0 %2142  ;;  %3696 = vlog2.f32 %v1284_v14  ;;  %v1275_v44 = vadd.f32 1.0, %v3695_v22  ;;  %2225 = vst.msk [vmem:[#allocation4 + $0xa8] sm:$0xff] %vm2203_vm5, %v2147_v39  ;;  %2801 = vperm.xlu1 %3637, %v2787_v41   ;;  %2806 = vperm.xlu0 %3636, %v2788_v42   ;;  %v1278_v56 = vmul.f32 -0.5, %v3695_v22  ;;  %v1288_v58 = vadd.f32 1.0, %v1287_v45 }
 0x39a   : > { %2224 = vst.msk [vmem:[#allocation4 + $0xa0] sm:$0xff] %vm2203_vm5, %v2143_v40  ;;  %v1281_v40 = vand.u32 2147483647, %v3695_v22  ;;  %vm1291_vm6 = vcmp.lt.f32.partialorder %v1290_v8, 0.0004427343 }
 0x39b   : > { %3698 = vlog2.f32 %v1275_v44  ;;  %v1279_v14 = vadd.f32 1.0, %v1278_v56  ;;  %v1289_v42 = vmul.f32 %v3693_v10, %v1288_v58  ;;  %v4669_v44 = vsub.s32 %v1304_v61, %v4375_v6 }
 0x39c   : > { %v2169_v49 = vpop.permute.xlu1 %2168  ;;  %v2564_v52 = vld [vmem:[#allocation4 + $0x88] sm:$0xff]  ;;  %v2563_v55 = vld [vmem:[#allocation4 + $0x80] sm:$0xff]  ;;  %vm1282_vm9 = vcmp.lt.f32.partialorder %v1281_v40, 0.0004427343 }
 0x39d   : > { %v2165_v50 = vpop.permute.xlu0 %2164  ;;  %2229 = vst.msk [vmem:[#allocation4 + $0xc8] sm:$0xff] %vm2203_vm5, %v2169_v49  ;;  %2574 = vperm.xlu0 %3636, %v2564_v52   ;;  %2569 = vperm.xlu1 %3637, %v2563_v55   ;;  %v2956_v49 = vmul.f32 1.442695, %v2954_v7  ;;  %v1280_v55 = vmul.f32 %v3695_v22, %v1279_v14  ;;  %v4696_v40 = vld [vmem:[%s4319_s1 + $0x8] sm:$0xff] }
 0x39e   : > { %2228 = vst.msk [vmem:[#allocation4 + $0xc0] sm:$0xff] %vm2203_vm5, %v2165_v50 }
 0x39f   : > { %3700 = vpow2.f32 %v2956_v49 }
 0x3a0   : > { %v2191_v62 = vpop.permute.xlu1 %2190  ;;  %v2638_v53 = vld [vmem:[#allocation4 + $0xa8] sm:$0xff] }
 0x3a1   : > { %v2187_v0 = vpop.permute.xlu0 %2186  ;;  %v2637_v1 = vld [vmem:[#allocation4 + $0xa0] sm:$0xff]  ;;  %2233 = vst.msk [vmem:[#allocation4 + $0xe8] sm:$0xff] %vm2203_vm5, %v2191_v62  ;;  %2648 = vperm.xlu0 %3636, %v2638_v53  }
 0x3a2   : > { %2232 = vst.msk [vmem:[#allocation4 + $0xe0] sm:$0xff] %vm2203_vm5, %v2187_v0  ;;  %2643 = vperm.xlu1 %3637, %v2637_v1  }
 0x3a3   : > { %v3697_v39 = vpop.eup %3696 }
 0x3a4   : > { %v1286_v41 = vmul.f32 0.6931472, %v3697_v39  ;;  %v2712_v45 = vld [vmem:[#allocation4 + $0xc8] sm:$0xff]  ;;  %v4693_v39 = vld [vmem:[%s4319_s1] sm:$0xff]  ;;  %s5183_s1 = scalar_lea.vmem [#allocation15], %s4270_s19 }
 0x3a5   : > { %v2711_v46 = vld [vmem:[#allocation4 + $0xc0] sm:$0xff]  ;;  %v3699_v47 = vpop.eup %3698  ;;  %2722 = vperm.xlu0 %3636, %v2712_v45  }
 0x3a6   : > { %2717 = vperm.xlu1 %3637, %v2711_v46   ;;  %v1292_v50 = vsel %vm1291_vm6, %v1289_v42, %v1286_v41  ;;  %v1277_v52 = vmul.f32 0.6931472, %v3699_v47 }
 0x3a7   : > { %v1294_v56 = vsel %vm1270_vm7, %v4647_v43, %v1292_v50 }
 0x3a8   : > { %v4675_v6 = vmul.f32 %v1294_v56, %v4487_v31  ;;  %v1350_v10 = vcombine.high %v1294_v56, %v1294_v56  ;;  %v1357_v58 = vrot.slane %v1294_v56, %v4669_v44  ;;  %v1283_v61 = vsel %vm1282_vm9, %v1280_v55, %v1277_v52  ;;  %v2786_v62 = vld [vmem:[#allocation4 + $0xe8] sm:$0xff] }
 0x3a9   : > { %v2785_v0 = vld [vmem:[#allocation4 + $0xe0] sm:$0xff]  ;;  %v4679_v53 = vsel %vm1269_vm8, %v4652_v48, %v1283_v61  ;;  %2796 = vperm.xlu0 %3636, %v2786_v62   ;;  %v4726_v31 = vpop.eup %3700 }
 0x3aa   : > { %2791 = vperm.xlu1 %3637, %v2785_v0   ;;  %v1364_v43 = vrot.slane %v1350_v10, %v4669_v44  ;;  %v1365_v22 = vcombine.high %v1357_v58, %v1357_v58  ;;  %v1373_v1 = vrot.slane %v1357_v58, %v4669_v44  ;;  %v1841_v8 = vrot.slane %v4675_v6, %v4669_v44 }
 0x3ab   : > { %v1301_v14 = vcombine.high %v4679_v53, %v4679_v53  ;;  %v4690_v48 = vrot.slane %v4679_v53, %v4669_v44  ;;  %5170 = vst [vmem:[#allocation44_spill] sm:$0xff] %v4726_v31 }
 0x3ac   : > { %v1366_v41 = vcombine.high %v1364_v43, %v1364_v43  ;;  %v1380_v42 = vrot.slane %v1364_v43, %v4669_v44  ;;  %v1387_v45 = vrot.slane %v1365_v22, %v4669_v44  ;;  %v1395_v46 = vcombine.high %v1373_v1, %v1373_v1 }
 0x3ad   : > { %v1434_v47 = vrot.slane %v1373_v1, %v4414_v51  ;;  %v1849_v49 = vcombine.high %v1841_v8, %v1841_v8  ;;  %v1857_v50 = vrot.slane %v1841_v8, %v4669_v44  ;;  %v4703_v52 = vrot.slane %v1301_v14, %v4669_v44 }
 0x3ae   : > { %v1394_v55 = vrot.slane %v1366_v41, %v4669_v44  ;;  %v1396_v56 = vcombine.high %v1380_v42, %v1380_v42  ;;  %v1397_v10 = vcombine.high %v1387_v45, %v1387_v45  ;;  %v1438_v58 = vrot.slane %v1387_v45, %v4414_v51 }
 0x3af   : > { %v1442_v61 = vrot.slane %v1395_v46, %v4414_v51  ;;  %v1450_v62 = vrot.slane %v1380_v42, %v4414_v51  ;;  %v1495_v0 = vmul.f32 %v1434_v47, %v4693_v39  ;;  %v1496_v43 = vmul.f32 %v1434_v47, %v4696_v40 }
 0x3b0   : > { %v1398_v22 = vcombine.high %v1394_v55, %v1394_v55  ;;  %v1446_v1 = vrot.slane %v1397_v10, %v4414_v51  ;;  %v1454_v8 = vrot.slane %v1394_v55, %v4414_v51  ;;  %v1458_v14 = vrot.slane %v1396_v56, %v4414_v51 }
 0x3b1   : > { %v1497_v41 = vmul.f32 %v1438_v58, %v4693_v39  ;;  %v1498_v4 = vmul.f32 %v1438_v58, %v4696_v40  ;;  %v1499_v45 = vmul.f32 %v1442_v61, %v4693_v39  ;;  %v1500_v46 = vmul.f32 %v1442_v61, %v4696_v40 }
 0x3b2   : > { %v1462_v42 = vrot.slane %v1398_v22, %v4414_v51  ;;  %v1501_v7 = vmul.f32 %v1446_v1, %v4693_v39  ;;  %v1502_v47 = vmul.f32 %v1446_v1, %v4696_v40  ;;  %v1503_v10 = vmul.f32 %v1450_v62, %v4693_v39 }
 0x3b3   : > { %v1504_v55 = vmul.f32 %v1450_v62, %v4696_v40  ;;  %v1505_v56 = vmul.f32 %v1454_v8, %v4693_v39  ;;  %v1506_v12 = vmul.f32 %v1454_v8, %v4696_v40  ;;  %v1507_v58 = vmul.f32 %v1458_v14, %v4693_v39 }
 0x3b4   : > { %v1508_v61 = vmul.f32 %v1458_v14, %v4696_v40  ;;  %v1509_v22 = vmul.f32 %v1462_v42, %v4693_v39  ;;  %v1510_v11 = vmul.f32 %v1462_v42, %v4696_v40  ;;  %v1543_v38 = vmul.f32 1.442695, %v1495_v0 }
 0x3b5   : > { %v1545_v1 = vmul.f32 1.442695, %v1496_v43  ;;  %v1547_v13 = vmul.f32 1.442695, %v1497_v41  ;;  %v1549_v34 = vmul.f32 1.442695, %v1498_v4  ;;  %v1871_v62 = vrot.slane %v1849_v49, %v4669_v44 }
 0x3b6   : > { %3702 = vpow2.f32 %v1543_v38  ;;  %v1551_v35 = vmul.f32 1.442695, %v1499_v45  ;;  %v1553_v36 = vmul.f32 1.442695, %v1500_v46  ;;  %v1555_v8 = vmul.f32 1.442695, %v1501_v7 }
 0x3b7   : > { %3704 = vpow2.f32 %v1545_v1  ;;  %v1557_v37 = vmul.f32 1.442695, %v1502_v47  ;;  %v1559_v18 = vmul.f32 1.442695, %v1503_v10  ;;  %v1561_v31 = vmul.f32 1.442695, %v1504_v55 }
 0x3b8   : > { %3706 = vpow2.f32 %v1547_v13  ;;  %v1563_v14 = vmul.f32 1.442695, %v1505_v56  ;;  %v1565_v30 = vmul.f32 1.442695, %v1506_v12  ;;  %v1567_v32 = vmul.f32 1.442695, %v1507_v58 }
 0x3b9   : > { %3708 = vpow2.f32 %v1549_v34  ;;  %v1569_v42 = vmul.f32 1.442695, %v1508_v61  ;;  %v1571_v0 = vmul.f32 1.442695, %v1509_v22  ;;  %v1573_v43 = vmul.f32 1.442695, %v1510_v11 }
 0x3ba   : > { %3710 = vpow2.f32 %v1551_v35  ;;  %v1879_v4 = vcombine.high %v1857_v50, %v1857_v50  ;;  %v1881_v41 = vcombine.high %v1871_v62, %v1871_v62  ;;  %v1918_v38 = vrot.slane %v1857_v50, %v4414_v51 }
 0x3bb   : > { %3712 = vpow2.f32 %v1553_v36  ;;  %v1922_v7 = vrot.slane %v1871_v62, %v4414_v51  ;;  %v1316_v49 = vcombine.high %v4690_v48, %v4690_v48  ;;  %v1317_v13 = vcombine.high %v4703_v52, %v4703_v52  ;;  %v3656_v62 = vld [vmem:[%s4324_s30] sm:$0xff]  }
 0x3bc   : > { %3714 = vpow2.f32 %v1555_v8  ;;  %v1926_v12 = vrot.slane %v1879_v4, %v4414_v51  ;;  %v1930_v34 = vrot.slane %v1881_v41, %v4414_v51  ;;  %v1979_v11 = vmul.f32 %v1918_v38, %v4621_v59  ;;  %3523 = vmatpush3.bf16.msra.mxu0 %v3656_v62 }
 0x3bd   : > { %3716 = vpow2.f32 %v1557_v37  ;;  %v1980_v35 = vmul.f32 %v1918_v38, %v4619_v9  ;;  %v1981_v36 = vmul.f32 %v1922_v7, %v4617_v5  ;;  %v1982_v50 = vmul.f32 %v1922_v7, %v4615_v3 }
 0x3be   : > { %3718 = vpow2.f32 %v1559_v18  ;;  %v1983_v45 = vmul.f32 %v1926_v12, %v4629_v54  ;;  %v1984_v46 = vmul.f32 %v1926_v12, %v4627_v23  ;;  %v1985_v47 = vmul.f32 %v1930_v34, %v4625_v16  ;;  %v3657_v12 = vld [vmem:[%s4324_s30 + $0x8] sm:$0xff]  }
 0x3bf   : > { %3720 = vpow2.f32 %v1561_v31  ;;  %v1986_v10 = vmul.f32 %v1930_v34, %v4623_v15  ;;  %v2003_v55 = vpack.c.bf16 %v1980_v35, %v1979_v11  ;;  %v2004_v56 = vpack.c.bf16 %v1982_v50, %v1981_v36 }
 0x3c0   : > { %v3703_v59 = vpop.eup %3702  ;;  %3722 = vpow2.f32 %v1563_v14  ;;  %v2005_v37 = vpack.c.bf16 %v1984_v46, %v1983_v45  ;;  %v1324_v5 = vrot.slane %v4690_v48, %v4669_v44  ;;  %v1331_v18 = vrot.slane %v4703_v52, %v4669_v44 }
 0x3c1   : > { %v3705_v3 = vpop.eup %3704  ;;  %3724 = vpow2.f32 %v1565_v30  ;;  %v2006_v9 = vpack.c.bf16 %v1986_v10, %v1985_v47  ;;  %2019 = vst.msk [vmem:[#allocation3 + $0x40] sm:$0xff] %vm618_vm2, %v2003_v55  ;;  %2020 = vst.msk [vmem:[#allocation3 + $0x48] sm:$0xff] %vm618_vm2, %v2004_v56  ;;  %v1338_v31 = vrot.slane %v1316_v49, %v4669_v44  ;;  %v1345_v15 = vrot.slane %v1317_v13, %v4669_v44 }
 0x3c2   : > { %v3707_v16 = vpop.eup %3706  ;;  %3726 = vpow2.f32 %v1567_v32  ;;  %v1583_v23 = vpack.c.bf16 %v3705_v3, %v3703_v59  ;;  %2021 = vst.msk [vmem:[#allocation3 + $0x50] sm:$0xff] %vm618_vm2, %v2005_v37  ;;  %v1346_v54 = vcombine.high %v1324_v5, %v1324_v5  ;;  %v1347_v30 = vcombine.high %v1331_v18, %v1331_v18 }
 0x3c3   : > { %v3709_v48 = vpop.eup %3708  ;;  %3728 = vpow2.f32 %v1569_v42  ;;  %2022 = vst.msk [vmem:[#allocation3 + $0x58] sm:$0xff] %vm618_vm2, %v2006_v9  ;;  %v1348_v52 = vcombine.high %v1338_v31, %v1338_v31  ;;  %v1402_v58 = vrot.slane %v1324_v5, %v4414_v51  ;;  %v1349_v32 = vcombine.high %v1345_v15, %v1345_v15 }
 0x3c4   : > { %v3711_v61 = vpop.eup %3710  ;;  %3730 = vpow2.f32 %v1571_v0  ;;  %v1584_v22 = vpack.c.bf16 %v3709_v48, %v3707_v16  ;;  %1599 = vst.msk [vmem:[#allocation2 + $0x40] sm:$0xff] %vm618_vm2, %v1583_v23  ;;  %v1406_v1 = vrot.slane %v1338_v31, %v4414_v51  ;;  %v5171_v14 = vsub.f32 0.0, %v4440_v19  ;;  %v3658_v16 = vld [vmem:[%s4324_s30 + $0x10] sm:$0xff]  }
 0x3c5   : > { %v3713_v8 = vpop.eup %3712  ;;  %3732 = vpow2.f32 %v1573_v43  ;;  %v1410_v4 = vrot.slane %v1346_v54, %v4414_v51  ;;  %v1414_v41 = vrot.slane %v1348_v52, %v4414_v51  ;;  %v1834_v7 = vcombine.high %v4675_v6, %v4675_v6 }
 0x3c6   : > { %v4764_v42 = vmul.f32 1.442695, %v5171_v14  ;;  %v3715_v38 = vpop.eup %3714  ;;  %v1585_v0 = vpack.c.bf16 %v3713_v8, %v3711_v61  ;;  %1600 = vst.msk [vmem:[#allocation2 + $0x48] sm:$0xff] %vm618_vm2, %v1584_v22  ;;  %v1418_v49 = vrot.slane %v1331_v18, %v4414_v51  ;;  %v1422_v13 = vrot.slane %v1345_v15, %v4414_v51 }
 0x3c7   : > { %v3717_v34 = vpop.eup %3716  ;;  %v4776_v43 = vmul.f32 %v4679_v53, %v4481_v2  ;;  %v1479_v11 = vmul.f32 %v1402_v58, %v4693_v39  ;;  %v1480_v35 = vmul.f32 %v1402_v58, %v4696_v40  ;;  %v1481_v36 = vmul.f32 %v1406_v1, %v4693_v39 }
 0x3c8   : > { %v5172_v50 = vmov 0.0   ;;  %v3719_v45 = vpop.eup %3718  ;;  %v1586_v46 = vpack.c.bf16 %v3717_v34, %v3715_v38  ;;  %1601 = vst.msk [vmem:[#allocation2 + $0x50] sm:$0xff] %vm618_vm2, %v1585_v0  ;;  %v1426_v47 = vrot.slane %v1347_v30, %v4414_v51  ;;  %v1430_v10 = vrot.slane %v1349_v32, %v4414_v51 }
 0x3c9   : > { %3524 = vmatprep.subr.bf16.mxu0 %v5172_v50  ;;  %v1482_v53 = vmul.f32 %v1406_v1, %v4696_v40  ;;  %v3721_v55 = vpop.eup %3720  ;;  %v1483_v56 = vmul.f32 %v1410_v4, %v4693_v39  ;;  %v1484_v59 = vmul.f32 %v1410_v4, %v4696_v40  ;;  %v1485_v37 = vmul.f32 %v1414_v41, %v4693_v39 }
 0x3ca   : > { %v1486_v5 = vmul.f32 %v1414_v41, %v4696_v40  ;;  %v3723_v18 = vpop.eup %3722  ;;  %v1587_v3 = vpack.c.bf16 %v3721_v55, %v3719_v45  ;;  %1602 = vst.msk [vmem:[#allocation2 + $0x58] sm:$0xff] %vm618_vm2, %v1586_v46  ;;  %v1487_v9 = vmul.f32 %v1418_v49, %v4693_v39  ;;  %v1488_v31 = vmul.f32 %v1418_v49, %v4696_v40  ;;  %v4806_v45 = vpop.permute.xlu0 %1766 }
 0x3cb   : > { %v1489_v15 = vmul.f32 %v1422_v13, %v4693_v39  ;;  %3525 = vmatpush3.bf16.msra.mxu0 %v3657_v12  ;;  %v3725_v23 = vpop.eup %3724  ;;  %v1490_v54 = vmul.f32 %v1422_v13, %v4696_v40  ;;  %v1511_v48 = vmul.f32 1.442695, %v1479_v11  ;;  %v1513_v30 = vmul.f32 1.442695, %v1480_v35  ;;  %v3659_v13 = vld [vmem:[%s4324_s30 + $0x18] sm:$0xff]   ;;  %3530 = vmatprep.mubr.msk.bf16.mxu0 %vm4021_vm11, %v5172_v50 }
 0x3cc   : > { %v1515_v52 = vmul.f32 1.442695, %v1481_v36  ;;  %3526 = vmatprep.subr.bf16.mxu0 %v5172_v50  ;;  %v3727_v58 = vpop.eup %3726  ;;  %v1588_v61 = vpack.c.bf16 %v3725_v23, %v3723_v18  ;;  %1603 = vst.msk [vmem:[#allocation2 + $0x60] sm:$0xff] %vm618_vm2, %v1587_v3  ;;  %v1491_v22 = vmul.f32 %v1426_v47, %v4693_v39  ;;  %v1492_v32 = vmul.f32 %v1426_v47, %v4696_v40  ;;  %v4827_v23 = vpop.permute.xlu1 %1770 }
 0x3cd   : > { %v1517_v1 = vmul.f32 1.442695, %v1482_v53  ;;  %v3729_v62 = vpop.eup %3728  ;;  %v1493_v8 = vmul.f32 %v1430_v10, %v4693_v39  ;;  %v1494_v14 = vmul.f32 %v1430_v10, %v4696_v40  ;;  %3734 = vpow2.f32 %v1511_v48 }
 0x3ce   : > { %v1519_v4 = vmul.f32 1.442695, %v1483_v56  ;;  %v3731_v41 = vpop.eup %3730  ;;  %v1589_v38 = vpack.c.bf16 %v3729_v62, %v3727_v58  ;;  %1604 = vst.msk [vmem:[#allocation2 + $0x68] sm:$0xff] %vm618_vm2, %v1588_v61  ;;  %3736 = vpow2.f32 %v1513_v30  ;;  %v1521_v0 = vmul.f32 1.442695, %v1484_v59 }
 0x3cf   : > { %v1523_v49 = vmul.f32 1.442695, %v1485_v37  ;;  %3527 = vmatpush3.bf16.msra.mxu0 %v3658_v16  ;;  %v3733_v12 = vpop.eup %3732  ;;  %3738 = vpow2.f32 %v1515_v52  ;;  %v1525_v34 = vmul.f32 1.442695, %v1486_v5  ;;  %v1527_v11 = vmul.f32 1.442695, %v1487_v9 }
 0x3d0   : > { %v1529_v35 = vmul.f32 1.442695, %v1488_v31  ;;  %3528 = vmatprep.subr.bf16.mxu0 %v5172_v50  ;;  %v1590_v39 = vpack.c.bf16 %v3733_v12, %v3731_v41  ;;  %1605 = vst.msk [vmem:[#allocation2 + $0x70] sm:$0xff] %vm618_vm2, %v1589_v38  ;;  %3740 = vpow2.f32 %v1517_v1  ;;  %v1531_v40 = vmul.f32 1.442695, %v1489_v15  ;;  %v4822_v6 = vpop.permute.xlu0 %2283 }
 0x3d1   : > { %v1533_v36 = vmul.f32 1.442695, %v1490_v54  ;;  %3742 = vpow2.f32 %v1519_v4  ;;  %v1785_v46 = vcombine.high %v4776_v43, %v4776_v43  ;;  %v1792_v47 = vrot.slane %v4776_v43, %v4669_v44 }
 0x3d2   : > { %v1848_v10 = vrot.slane %v1834_v7, %v4669_v44  ;;  %1606 = vst.msk [vmem:[#allocation2 + $0x78] sm:$0xff] %vm618_vm2, %v1590_v39  ;;  %3744 = vpow2.f32 %v1521_v0  ;;  %v1535_v53 = vmul.f32 1.442695, %v1491_v22  ;;  %v1537_v55 = vmul.f32 1.442695, %v1492_v32 }
 0x3d3   : > { %v1539_v56 = vmul.f32 1.442695, %v1493_v8  ;;  %3529 = vmatpush3.bf16.msra.mxu0 %v3659_v13  ;;  %3746 = vpow2.f32 %v1523_v49  ;;  %v1799_v59 = vrot.slane %v1785_v46, %v4669_v44  ;;  %v1800_v37 = vcombine.high %v1792_v47, %v1792_v47 }
 0x3d4   : > { %v1808_v5 = vrot.slane %v1792_v47, %v4669_v44  ;;  %3748 = vpow2.f32 %v1525_v34  ;;  %v1541_v43 = vmul.f32 1.442695, %v1494_v14  ;;  %v1850_v18 = vcombine.high %v1848_v10, %v1848_v10  ;;  %v4840_v49 = vpop.permute.xlu1 %2288 }
 0x3d5   : > { %v4820_v3 = vrot.slane %v1848_v10, %v4669_v44  ;;  %3750 = vpow2.f32 %v1527_v11  ;;  %v1801_v7 = vcombine.high %v1799_v59, %v1799_v59  ;;  %v1815_v9 = vrot.slane %v1799_v59, %v4669_v44  ;;  %v4842_v13 = vpop.permute.xlu0 %2362 }
 0x3d6   : > { %v1822_v31 = vrot.slane %v1800_v37, %v4669_v44  ;;  %3752 = vpow2.f32 %v1529_v35  ;;  %v1830_v15 = vcombine.high %v1808_v5, %v1808_v5  ;;  %v1886_v16 = vrot.slane %v1808_v5, %v4414_v51 }
 0x3d7   : > { %v4830_v54 = vrot.slane %v1850_v18, %v4669_v44  ;;  %v3735_v48 = vpop.eup %3734  ;;  %3754 = vpow2.f32 %v1531_v40  ;;  %v1829_v30 = vrot.slane %v1801_v7, %v4669_v44  ;;  %v1831_v52 = vcombine.high %v1815_v9, %v1815_v9  ;;  %v5175_v7 = vld [vmem:[#allocation35_spill] sm:$0xff] }
 0x3d8   : > { %v1832_v58 = vcombine.high %v1822_v31, %v1822_v31  ;;  %v3737_v61 = vpop.eup %3736  ;;  %3756 = vpow2.f32 %v1533_v36  ;;  %v1890_v22 = vrot.slane %v1822_v31, %v4414_v51  ;;  %v1894_v32 = vrot.slane %v1830_v15, %v4414_v51  ;;  %v4863_v15 = vpop.permute.xlu1 %2357 }
 0x3d9   : > { %v1902_v1 = vrot.slane %v1815_v9, %v4414_v51  ;;  %v3739_v62 = vpop.eup %3738  ;;  %3758 = vpow2.f32 %v1535_v53  ;;  %v1575_v8 = vpack.c.bf16 %v3737_v61, %v3735_v48  ;;  %v1833_v14 = vcombine.high %v1829_v30, %v1829_v30 }
 0x3da   : > { %v1898_v4 = vrot.slane %v1832_v58, %v4414_v51  ;;  %v3741_v41 = vpop.eup %3740  ;;  %3760 = vpow2.f32 %v1537_v55  ;;  %v1906_v44 = vrot.slane %v1829_v30, %v4414_v51  ;;  %v1910_v38 = vrot.slane %v1831_v52, %v4414_v51  ;;  %v4870_v58 = vld [vmem:[#allocation3 + $0x48] sm:$0xff] }
 0x3db   : > { %v1963_v0 = vmul.f32 %v1886_v16, %v4569_v27  ;;  %v3743_v12 = vpop.eup %3742  ;;  %3762 = vpow2.f32 %v1539_v56  ;;  %v1576_v34 = vpack.c.bf16 %v3741_v41, %v3739_v62  ;;  %1591 = vst.msk [vmem:[#allocation2] sm:$0xff] %vm618_vm2, %v1575_v8  ;;  %v1914_v11 = vrot.slane %v1833_v14, %v4414_v51 }
 0x3dc   : > { %v1964_v35 = vmul.f32 %v1886_v16, %v4567_v26  ;;  %v3745_v39 = vpop.eup %3744  ;;  %3764 = vpow2.f32 %v1541_v43  ;;  %v1965_v40 = vmul.f32 %v1890_v22, %v4563_v24  ;;  %v1966_v36 = vmul.f32 %v1890_v22, %v4561_v63 }
 0x3dd   : > { %v1967_v27 = vmul.f32 %v1894_v32, %v4581_v57  ;;  %v3747_v46 = vpop.eup %3746  ;;  %v1577_v47 = vpack.c.bf16 %v3745_v39, %v3743_v12  ;;  %1592 = vst.msk [vmem:[#allocation2 + $0x8] sm:$0xff] %vm618_vm2, %v1576_v34  ;;  %v1968_v10 = vmul.f32 %v1894_v32, %v4579_v29  ;;  %v1969_v53 = vmul.f32 %v1898_v4, %v4575_v60  ;;  %v5173_v29 = vld [vmem:[#allocation37_spill] sm:$0xff]  ;;  %v5174_v60 = vld [vmem:[#allocation36_spill] sm:$0xff] }
 0x3de   : > { %v1970_v55 = vmul.f32 %v1898_v4, %v4573_v28  ;;  %v3749_v56 = vpop.eup %3748  ;;  %v1971_v26 = vmul.f32 %v1902_v1, %v4589_v25  ;;  %v1972_v59 = vmul.f32 %v1902_v1, %v4587_v21  ;;  %v1973_v24 = vmul.f32 %v1906_v44, %v4585_v17  ;;  %v4865_v17 = vpop.permute.xlu0 %2436 }
 0x3df   : > { %v1974_v63 = vmul.f32 %v1906_v44, %v4583_v20  ;;  %v3751_v57 = vpop.eup %3750  ;;  %v1578_v37 = vpack.c.bf16 %v3749_v56, %v3747_v46  ;;  %1593 = vst.msk [vmem:[#allocation2 + $0x10] sm:$0xff] %vm618_vm2, %v1577_v47  ;;  %v1975_v5 = vmul.f32 %v1910_v38, %v4597_v33  ;;  %v1976_v43 = vmul.f32 %v1910_v38, %v5173_v29  ;;  %v4867_v20 = vld [vmem:[#allocation2 + $0x48] sm:$0xff]  ;;  %v2237_v29 = vld [vmem:[#allocation6 + $0x8] sm:$0xff] }
 0x3e0   : > { %v1977_v18 = vmul.f32 %v1914_v11, %v5174_v60  ;;  %v3753_v28 = vpop.eup %3752  ;;  %v1978_v9 = vmul.f32 %v1914_v11, %v5175_v7  ;;  %v1995_v25 = vpack.c.bf16 %v1964_v35, %v1963_v0  ;;  %v1996_v31 = vpack.c.bf16 %v1966_v36, %v1965_v40  ;;  %v5178_v47 = vld [vmem:[#allocation39_spill] sm:$0xff] }
 0x3e1   : > { %v1997_v21 = vpack.c.bf16 %v1968_v10, %v1967_v27  ;;  %v3755_v16 = vpop.eup %3754  ;;  %v1579_v48 = vpack.c.bf16 %v3753_v28, %v3751_v57  ;;  %1594 = vst.msk [vmem:[#allocation2 + $0x18] sm:$0xff] %vm618_vm2, %v1578_v37  ;;  %v1998_v33 = vpack.c.bf16 %v1970_v55, %v1969_v53  ;;  %v1999_v30 = vpack.c.bf16 %v1972_v59, %v1971_v26  ;;  %v5177_v27 = vld [vmem:[#allocation40_spill] sm:$0xff]  ;;  %v5179_v55 = vld [vmem:[#allocation38_spill] sm:$0xff]  ;;  %v5180_v26 = vld [vmem:[#allocation43_spill] sm:$0xff]  ;;  %v4904_v37 = vpop.permute.xlu1 %2431 }
 0x3e2   : > { %v2000_v52 = vpack.c.bf16 %v1974_v63, %v1973_v24  ;;  %v3757_v61 = vpop.eup %3756  ;;  %v2001_v22 = vpack.c.bf16 %v1976_v43, %v1975_v5  ;;  %v2002_v32 = vpack.c.bf16 %v1978_v9, %v1977_v18  ;;  %2011 = vst.msk [vmem:[#allocation3] sm:$0xff] %vm618_vm2, %v1995_v25  ;;  %2012 = vst.msk [vmem:[#allocation3 + $0x8] sm:$0xff] %vm618_vm2, %v1996_v31  ;;  %v4879_v8 = vld [vmem:[#allocation2] sm:$0xff]  ;;  %v2543_v38 = vunpack.c.l.bf16 %v4867_v20  ;;  %v4906_v5 = vpop.permute.xlu0 %2510  ;;  %v2239_v7 = vld [vmem:[#allocation6 + $0x18] sm:$0xff] }
 0x3e3   : > { %2013 = vst.msk [vmem:[#allocation3 + $0x10] sm:$0xff] %vm618_vm2, %v1997_v21  ;;  %v1880_v1 = vcombine.high %v4820_v3, %v4820_v3  ;;  %v1882_v62 = vcombine.high %v4830_v54, %v4830_v54  ;;  %v3759_v14 = vpop.eup %3758  ;;  %v1580_v4 = vpack.c.bf16 %v3757_v61, %v3755_v16  ;;  %1595 = vst.msk [vmem:[#allocation2 + $0x20] sm:$0xff] %vm618_vm2, %v1579_v48  ;;  %v2246_v35 = vunpack.c.h.bf16 %v4879_v8  ;;  %v5181_v24 = vld [vmem:[#allocation42_spill] sm:$0xff] }
 0x3e4   : > { %2014 = vst.msk [vmem:[#allocation3 + $0x18] sm:$0xff] %vm618_vm2, %v1998_v33  ;;  %2015 = vst.msk [vmem:[#allocation3 + $0x20] sm:$0xff] %vm618_vm2, %v1999_v30  ;;  %v1934_v41 = vrot.slane %v4820_v3, %v4414_v51  ;;  %v1938_v44 = vrot.slane %v4830_v54, %v4414_v51  ;;  %v3761_v0 = vpop.eup %3760  ;;  %v2244_v11 = vld [vmem:[#allocation2 + $0x8] sm:$0xff]  ;;  %v2555_v39 = vunpack.c.l.bf16 %v4870_v58  ;;  %v5176_v54 = vld [vmem:[#allocation41_spill] sm:$0xff]  ;;  %v2544_v21 = vunpack.c.h.bf16 %v4867_v20 }
 0x3e5   : > { %2016 = vst.msk [vmem:[#allocation3 + $0x28] sm:$0xff] %vm618_vm2, %v2000_v52  ;;  %2017 = vst.msk [vmem:[#allocation3 + $0x30] sm:$0xff] %vm618_vm2, %v2001_v22  ;;  %v1942_v12 = vrot.slane %v1880_v1, %v4414_v51  ;;  %v1946_v34 = vrot.slane %v1882_v62, %v4414_v51  ;;  %v3763_v3 = vpop.eup %3762  ;;  %v1581_v40 = vpack.c.bf16 %v3761_v0, %v3759_v14  ;;  %v2238_v57 = vld [vmem:[#allocation6 + $0x10] sm:$0xff]  ;;  %v2247_v28 = vunpack.c.l.bf16 %v2244_v11 }
 0x3e6   : > { %2018 = vst.msk [vmem:[#allocation3 + $0x38] sm:$0xff] %vm618_vm2, %v2002_v32  ;;  %1596 = vst.msk [vmem:[#allocation2 + $0x28] sm:$0xff] %vm618_vm2, %v1580_v4  ;;  %v1987_v36 = vmul.f32 %v1934_v41, %v5176_v54  ;;  %v1988_v46 = vmul.f32 %v1934_v41, %v5177_v27  ;;  %v1989_v10 = vmul.f32 %v1938_v44, %v5178_v47  ;;  %v3765_v53 = vpop.eup %3764  ;;  %v2248_v25 = vunpack.c.h.bf16 %v2244_v11  ;;  %v2279_v54 = vpop.permute.xlu0 %2278 }
 0x3e7   : > { %v1990_v56 = vmul.f32 %v1938_v44, %v5179_v55  ;;  %v1992_v51 = vmul.f32 %v1942_v12, %v4827_v23  ;;  %v1993_v59 = vmul.f32 %v1946_v34, %v5180_v26  ;;  %v1994_v63 = vmul.f32 %v1946_v34, %v5181_v24  ;;  %1597 = vst.msk [vmem:[#allocation2 + $0x30] sm:$0xff] %vm618_vm2, %v1581_v40  ;;  %v2506_v40 = vpop.permute.xlu1 %2505  ;;  %v2317_v26 = vld [vmem:[#allocation2 + $0x10] sm:$0xff] }
 0x3e8   : > { %v1582_v43 = vpack.c.bf16 %v3765_v53, %v3763_v3  ;;  %v2007_v60 = vpack.c.bf16 %v1988_v46, %v1987_v36  ;;  %v1991_v18 = vmul.f32 %v1942_v12, %v4806_v45  ;;  %v2318_v31 = vld [vmem:[#allocation2 + $0x18] sm:$0xff]  ;;  %v2251_v48 = vmul.f32 %v2247_v28, %v2238_v57  ;;  %v2236_v36 = vld [vmem:[#allocation6] sm:$0xff] }
 0x3e9   : > { %v2008_v9 = vpack.c.bf16 %v1990_v56, %v1989_v10  ;;  %v2010_v23 = vpack.c.bf16 %v1994_v63, %v1993_v59  ;;  %v2256_v33 = vld [vmem:[#allocation3 + $0x8] sm:$0xff]  ;;  %v2250_v30 = vmul.f32 %v2246_v35, %v2237_v29  ;;  %v2255_v52 = vld [vmem:[#allocation3] sm:$0xff]  ;;  %v2245_v61 = vunpack.c.l.bf16 %v4879_v8 }
 0x3ea   : > { %1598 = vst.msk [vmem:[#allocation2 + $0x38] sm:$0xff] %vm618_vm2, %v1582_v43  ;;  %2023 = vst.msk [vmem:[#allocation3 + $0x60] sm:$0xff] %vm618_vm2, %v2007_v60  ;;  %v2009_v16 = vpack.c.bf16 %v1992_v51, %v1991_v18  ;;  %v2259_v45 = vunpack.c.l.bf16 %v2256_v33  ;;  %v2252_v22 = vmul.f32 %v2248_v25, %v2239_v7  ;;  %v2260_v32 = vunpack.c.h.bf16 %v2256_v33  ;;  %v4919_v59 = vld [vmem:[#allocation3 + $0x10] sm:$0xff] }
 0x3eb   : > { %2024 = vst.msk [vmem:[#allocation3 + $0x68] sm:$0xff] %vm618_vm2, %v2008_v9  ;;  %2026 = vst.msk [vmem:[#allocation3 + $0x78] sm:$0xff] %vm618_vm2, %v2010_v23  ;;  %v2322_v1 = vunpack.c.h.bf16 %v2318_v31  ;;  %v2330_v62 = vld [vmem:[#allocation3 + $0x18] sm:$0xff]  ;;  %v2321_v41 = vunpack.c.l.bf16 %v2318_v31  ;;  %v2258_v12 = vunpack.c.h.bf16 %v2255_v52  ;;  %v2249_v57 = vmul.f32 %v2245_v61, %v2236_v36  ;;  %v2274_v33 = vpop.permute.xlu1 %2273 }
 0x3ec   : > { %v2404_v14 = vld [vmem:[#allocation3 + $0x28] sm:$0xff]  ;;  %2025 = vst.msk [vmem:[#allocation3 + $0x70] sm:$0xff] %vm618_vm2, %v2009_v16  ;;  %v2334_v4 = vunpack.c.h.bf16 %v2330_v62  ;;  %v2333_v44 = vunpack.c.l.bf16 %v2330_v62  ;;  %v2263_v34 = vadd.f32 %v2259_v45, %v2251_v48  ;;  %v2264_v11 = vadd.f32 %v2260_v32, %v2252_v22 }
 0x3ed   : > { %v2478_v0 = vld [vmem:[#allocation3 + $0x38] sm:$0xff]  ;;  %v2392_v8 = vld [vmem:[#allocation2 + $0x28] sm:$0xff]  ;;  %v2408_v35 = vunpack.c.h.bf16 %v2404_v14  ;;  %v2407_v3 = vunpack.c.l.bf16 %v2404_v14  ;;  %v2262_v10 = vadd.f32 %v2258_v12, %v2250_v30  ;;  %v2257_v29 = vunpack.c.l.bf16 %v2255_v52 }
 0x3ee   : > { %v2396_v27 = vunpack.c.h.bf16 %v2392_v8  ;;  %v2482_v46 = vunpack.c.h.bf16 %v2478_v0  ;;  %v2481_v47 = vunpack.c.l.bf16 %v2478_v0  ;;  %v2293_v53 = vmul.f32 %v4822_v6, %v2263_v34 }
 0x3ef   : > { %v2294_v55 = vmul.f32 %v4840_v49, %v2264_v11  ;;  %v2326_v56 = vmul.f32 %v2322_v1, %v2264_v11  ;;  %v2325_v51 = vmul.f32 %v2321_v41, %v2263_v34  ;;  %v2395_v24 = vunpack.c.l.bf16 %v2392_v8 }
 0x3f0   : > { %v2292_v63 = vmul.f32 %v2279_v54, %v2262_v10  ;;  %v2304_v43 = vsel %vm618_vm2, %v2293_v53, 0.0  ;;  %v2320_v23 = vunpack.c.h.bf16 %v2317_v26  ;;  %v2332_v49 = vunpack.c.h.bf16 %v4919_v59 }
 0x3f1   : > { %v2305_v60 = vsel %vm618_vm2, %v2294_v55, 0.0  ;;  %v2338_v18 = vadd.f32 %v2334_v4, %v2326_v56  ;;  %v2337_v28 = vadd.f32 %v2333_v44, %v2325_v51  ;;  %v2466_v7 = vld [vmem:[#allocation2 + $0x38] sm:$0xff]  ;;  %v2261_v45 = vadd.f32 %v2257_v29, %v2249_v57 }
 0x3f2   : > { %v2306_v9 = vadd.f32 %v2305_v60, %v2304_v43  ;;  %v2470_v6 = vunpack.c.h.bf16 %v2466_v7  ;;  %v2469_v52 = vunpack.c.l.bf16 %v2466_v7  ;;  %v2296_v61 = vsel %vm618_vm2, %v2292_v63, 0.0 }
 0x3f3   : > { %v2368_v25 = vmul.f32 %v4842_v13, %v2338_v18  ;;  %v2367_v31 = vmul.f32 %v4863_v15, %v2337_v28  ;;  %v2400_v16 = vmul.f32 %v2396_v27, %v2338_v18  ;;  %v2399_v48 = vmul.f32 %v2395_v24, %v2337_v28  ;;  %v2353_v24 = vpop.permute.xlu0 %2352  ;;  %v2348_v18 = vpop.permute.xlu1 %2347 }
 0x3f4   : > { %v2307_v30 = vrot.slane %v2306_v9, 4  ;;  %v2291_v41 = vmul.f32 %v2274_v33, %v2261_v45  ;;  %v2324_v13 = vmul.f32 %v2320_v23, %v2262_v10  ;;  %v2319_v54 = vunpack.c.l.bf16 %v2317_v26 }
 0x3f5   : > { %v2379_v22 = vsel %vm618_vm2, %v2368_v25, 0.0  ;;  %v2378_v32 = vsel %vm618_vm2, %v2367_v31, 0.0  ;;  %v2412_v1 = vadd.f32 %v2408_v35, %v2400_v16  ;;  %v2411_v62 = vadd.f32 %v2407_v3, %v2399_v48 }
 0x3f6   : > { %v2308_v14 = vadd.f32 %v2307_v30, %v2306_v9  ;;  %v2380_v4 = vadd.f32 %v2379_v22, %v2378_v32  ;;  %v2295_v8 = vsel %vm618_vm2, %v2291_v41, 0.0  ;;  %v2336_v26 = vadd.f32 %v2332_v49, %v2324_v13  ;;  %v2403_v9 = vld [vmem:[#allocation3 + $0x20] sm:$0xff]  ;;  %v2465_v13 = vld [vmem:[#allocation2 + $0x30] sm:$0xff] }
 0x3f7   : > { %v2442_v15 = vmul.f32 %v4865_v17, %v2412_v1  ;;  %v2441_v44 = vmul.f32 %v4904_v37, %v2411_v62  ;;  %v2474_v0 = vmul.f32 %v2470_v6, %v2412_v1  ;;  %v2473_v12 = vmul.f32 %v2469_v52, %v2411_v62  ;;  %v2391_v37 = vld [vmem:[#allocation2 + $0x20] sm:$0xff]  ;;  %v4945_v1 = vld [vmem:[#allocation2 + $0x58] sm:$0xff] }
 0x3f8   : > { %v2309_v34 = vrot.slane %v2308_v14, 2  ;;  %v2381_v11 = vrot.slane %v2380_v4, 4  ;;  %v2297_v55 = vadd.f32 %v2296_v61, %v2295_v8  ;;  %v2323_v63 = vmul.f32 %v2319_v54, %v2261_v45 }
 0x3f9   : > { %v2453_v36 = vsel %vm618_vm2, %v2442_v15, 0.0  ;;  %v2452_v35 = vsel %vm618_vm2, %v2441_v44, 0.0  ;;  %v4934_v3 = vadd.f32 %v2482_v46, %v2474_v0  ;;  %v4936_v27 = vadd.f32 %v2481_v47, %v2473_v12  ;;  %v2422_v0 = vpop.permute.xlu1 %2421 }
 0x3fa   : > { %v2310_v10 = vadd.f32 %v2309_v34, %v2308_v14  ;;  %v2382_v53 = vadd.f32 %v2381_v11, %v2380_v4  ;;  %v2454_v17 = vadd.f32 %v2453_v36, %v2452_v35  ;;  %v2298_v46 = vrot.slane %v2297_v55, 4  ;;  %v2477_v11 = vld [vmem:[#allocation3 + $0x30] sm:$0xff] }
 0x3fb   : > { %v2516_v56 = vmul.f32 %v4906_v5, %v4934_v3  ;;  %v2515_v51 = vmul.f32 %v2506_v40, %v4936_v27  ;;  %v2331_v28 = vunpack.c.l.bf16 %v4919_v59  ;;  %v2394_v7 = vunpack.c.h.bf16 %v2391_v37  ;;  %v2427_v59 = vpop.permute.xlu0 %2426 }
 0x3fc   : > { %v2311_v57 = vrot.slane %v2310_v10, 1  ;;  %v2383_v29 = vrot.slane %v2382_v53, 2  ;;  %v2455_v43 = vrot.slane %v2454_v17, 4  ;;  %v2366_v40 = vmul.f32 %v2353_v24, %v2336_v26 }
 0x3fd   : > { %v2527_v47 = vsel %vm618_vm2, %v2516_v56, 0.0  ;;  %v2526_v60 = vsel %vm618_vm2, %v2515_v51, 0.0  ;;  %v2299_v49 = vadd.f32 %v2298_v46, %v2297_v55  ;;  %v2335_v25 = vadd.f32 %v2331_v28, %v2323_v63 }
 0x3fe   : > { %v2384_v6 = vadd.f32 %v2383_v29, %v2382_v53  ;;  %v2456_v5 = vadd.f32 %v2455_v43, %v2454_v17  ;;  %v2528_v23 = vadd.f32 %v2527_v47, %v2526_v60  ;;  %v2398_v31 = vmul.f32 %v2394_v7, %v2336_v26 }
 0x3ff   : > { %v2556_v16 = vunpack.c.h.bf16 %v4870_v58  ;;  %v2406_v52 = vunpack.c.h.bf16 %v2403_v9  ;;  %v2312_v61 = vadd.f32 %v2311_v57, %v2310_v10  ;;  %v2300_v45 = vrot.slane %v2299_v49, 2  ;;  %v2501_v60 = vpop.permute.xlu0 %2500 }
 0x400   : > { %v2385_v48 = vrot.slane %v2384_v6, 1  ;;  %v2457_v33 = vrot.slane %v2456_v5, 2  ;;  %v2529_v30 = vrot.slane %v2528_v23, 4  ;;  %v2365_v22 = vmul.f32 %v2348_v18, %v2335_v25 }
 0x401   : > { %v2393_v32 = vunpack.c.l.bf16 %v2391_v37  ;;  %v2370_v4 = vsel %vm618_vm2, %v2366_v40, 0.0  ;;  %v2410_v41 = vadd.f32 %v2406_v52, %v2398_v31  ;;  %v2301_v15 = vadd.f32 %v2300_v45, %v2299_v49 }
 0x402   : > { %v2458_v62 = vadd.f32 %v2457_v33, %v2456_v5  ;;  %v2530_v14 = vadd.f32 %v2529_v30, %v2528_v23  ;;  %v2369_v44 = vsel %vm618_vm2, %v2365_v22, 0.0  ;;  %v2405_v34 = vunpack.c.l.bf16 %v2403_v9  ;;  %v2626_v23 = vld [vmem:[#allocation3 + $0x58] sm:$0xff] }
 0x403   : > { %v2397_v12 = vmul.f32 %v2393_v32, %v2335_v25  ;;  %v4949_v8 = vadd.f32 %v2385_v48, %v2384_v6  ;;  %v2371_v54 = vadd.f32 %v2370_v4, %v2369_v44  ;;  %v2440_v36 = vmul.f32 %v2427_v59, %v2410_v41  ;;  %v2496_v6 = vpop.permute.xlu1 %2495 }
 0x404   : > { %v2617_v35 = vunpack.c.l.bf16 %v4945_v1  ;;  %v2847_v10 = vrot.slane %v2312_v61, 7  ;;  %v2302_v53 = vrot.slane %v2301_v15, 1  ;;  %v2468_v55 = vunpack.c.h.bf16 %v2465_v13 }
 0x405   : > { %v2409_v17 = vadd.f32 %v2405_v34, %v2397_v12  ;;  %v2459_v37 = vrot.slane %v2458_v62, 1  ;;  %v2531_v56 = vrot.slane %v2530_v14, 2  ;;  %v2372_v51 = vrot.slane %v2371_v54, 4 }
 0x406   : > { %v2480_v24 = vunpack.c.h.bf16 %v2477_v11  ;;  %v2303_v26 = vadd.f32 %v2302_v53, %v2301_v15  ;;  %v2472_v57 = vmul.f32 %v2468_v55, %v2410_v41  ;;  %v2467_v29 = vunpack.c.l.bf16 %v2465_v13  ;;  %v2688_v13 = vld [vmem:[#allocation2 + $0x68] sm:$0xff] }
 0x407   : > { %v2439_v63 = vmul.f32 %v2422_v0, %v2409_v17  ;;  %v2850_v43 = vrot.slane %v4949_v8, 7  ;;  %v2373_v46 = vadd.f32 %v2372_v51, %v2371_v54  ;;  %v2444_v47 = vsel %vm618_vm2, %v2440_v36, 0.0  ;;  %v2700_v54 = vld [vmem:[#allocation3 + $0x68] sm:$0xff] }
 0x408   : > { %v2479_v18 = vunpack.c.l.bf16 %v2477_v11  ;;  %v2849_v28 = vsel %vm2848_vm10, %v2847_v10, %v2303_v26  ;;  %v4956_v9 = vadd.f32 %v2480_v24, %v2472_v57  ;;  %v2471_v5 = vmul.f32 %v2467_v29, %v2409_v17 }
 0x409   : > { %v2443_v7 = vsel %vm618_vm2, %v2439_v63, 0.0  ;;  %v4958_v40 = vadd.f32 %v2459_v37, %v2458_v62  ;;  %2873 = vst.msk [vmem:[#allocation5] sm:$0x3] %vm623_vm0, %v2849_v28  ;;  %v2374_v49 = vrot.slane %v2373_v46, 2  ;;  %v2547_v31 = vmul.f32 %v2543_v38, %v4936_v27 }
 0x40a   : > { %v2445_v25 = vadd.f32 %v2444_v47, %v2443_v7  ;;  %v4964_v48 = vadd.f32 %v2531_v56, %v2530_v14  ;;  %v2514_v33 = vmul.f32 %v2501_v60, %v4956_v9  ;;  %v4967_v30 = vadd.f32 %v2479_v18, %v2471_v5  ;;  %v2762_v47 = vld [vmem:[#allocation2 + $0x78] sm:$0xff] }
 0x40b   : > { %v2548_v52 = vmul.f32 %v2544_v21, %v4934_v3  ;;  %v2375_v61 = vadd.f32 %v2374_v49, %v2373_v46  ;;  %v2559_v22 = vadd.f32 %v2555_v39, %v2547_v31  ;;  %v2629_v59 = vunpack.c.l.bf16 %v2626_v23 }
 0x40c   : > { %v2446_v45 = vrot.slane %v2445_v25, 4  ;;  %v2518_v32 = vsel %vm618_vm2, %v2514_v33, 0.0  ;;  %v2513_v38 = vmul.f32 %v2496_v6, %v4967_v30  ;;  %v2580_v27 = vpop.permute.xlu1 %2579  ;;  %v2585_v62 = vpop.permute.xlu0 %2584  ;;  %v2618_v4 = vunpack.c.h.bf16 %v4945_v1 }
 0x40d   : > { %v2560_v14 = vadd.f32 %v2556_v16, %v2548_v52  ;;  %v2376_v41 = vrot.slane %v2375_v61, 1  ;;  %v2589_v21 = vmul.f32 %v2580_v27, %v2559_v22  ;;  %v2621_v3 = vmul.f32 %v2617_v35, %v2559_v22 }
 0x40e   : > { %v2447_v20 = vadd.f32 %v2446_v45, %v2445_v25  ;;  %v2517_v15 = vsel %vm618_vm2, %v2513_v38, 0.0  ;;  %v2630_v0 = vunpack.c.h.bf16 %v2626_v23  ;;  %v2691_v53 = vunpack.c.l.bf16 %v2688_v13  ;;  %v2774_v25 = vld [vmem:[#allocation3 + $0x78] sm:$0xff] }
 0x40f   : > { %v2590_v39 = vmul.f32 %v2585_v62, %v2560_v14  ;;  %v2622_v44 = vmul.f32 %v2618_v4, %v2560_v14  ;;  %v2377_v12 = vadd.f32 %v2376_v41, %v2375_v61  ;;  %v2519_v11 = vadd.f32 %v2518_v32, %v2517_v15  ;;  %v2551_v41 = vld [vmem:[#allocation3 + $0x40] sm:$0xff] }
 0x410   : > { %v2448_v34 = vrot.slane %v2447_v20, 2  ;;  %v2600_v8 = vsel %vm618_vm2, %v2589_v21, 0.0  ;;  %v2654_v16 = vpop.permute.xlu1 %2653  ;;  %v2633_v1 = vadd.f32 %v2629_v59, %v2621_v3  ;;  %v2659_v36 = vpop.permute.xlu0 %2658  ;;  %v2703_v26 = vunpack.c.l.bf16 %v2700_v54  ;;  %v2539_v59 = vld [vmem:[#allocation2 + $0x40] sm:$0xff] }
 0x411   : > { %v2601_v58 = vsel %vm618_vm2, %v2590_v39, 0.0  ;;  %v2634_v10 = vadd.f32 %v2630_v0, %v2622_v44  ;;  %v2851_v35 = vsel %vm2848_vm10, %v2850_v43, %v2377_v12  ;;  %v2520_v55 = vrot.slane %v2519_v11, 4 }
 0x412   : > { %v2449_v17 = vadd.f32 %v2448_v34, %v2447_v20  ;;  %v2602_v37 = vadd.f32 %v2601_v58, %v2600_v8  ;;  %2874 = vst.msk [vmem:[#allocation5 + $0x2] sm:$0x3] %vm623_vm0, %v2851_v35  ;;  %v2663_v56 = vmul.f32 %v2654_v16, %v2633_v1  ;;  %v2695_v24 = vmul.f32 %v2691_v53, %v2633_v1 }
 0x413   : > { %v2664_v51 = vmul.f32 %v2659_v36, %v2634_v10  ;;  %v2533_v63 = vrot.slane %v4964_v48, 1  ;;  %v2521_v29 = vadd.f32 %v2520_v55, %v2519_v11  ;;  %3766 = vpow2.f32 %v4764_v42  ;;  %v5182_v36 = vld [vmem:[#allocation44_spill] sm:$0xff] }
 0x414   : > { %v2450_v57 = vrot.slane %v2449_v17, 1  ;;  %v2603_v46 = vrot.slane %v2602_v37, 4  ;;  %v2852_v60 = vrot.slane %v4958_v40, 7  ;;  %v2728_v43 = vpop.permute.xlu1 %2727  ;;  %v2707_v18 = vadd.f32 %v2703_v26, %v2695_v24  ;;  %v2733_v28 = vpop.permute.xlu0 %2732 }
 0x415   : > { %v2692_v7 = vunpack.c.h.bf16 %v2688_v13  ;;  %v2522_v5 = vrot.slane %v2521_v29, 2  ;;  %v2674_v23 = vsel %vm618_vm2, %v2663_v56, 0.0  ;;  %v2675_v49 = vsel %vm618_vm2, %v2664_v51, 0.0 }
 0x416   : > { %v2451_v6 = vadd.f32 %v2450_v57, %v2449_v17  ;;  %v2737_v31 = vmul.f32 %v2728_v43, %v2707_v18  ;;  %v2704_v52 = vunpack.c.h.bf16 %v2700_v54  ;;  %v2765_v61 = vunpack.c.l.bf16 %v2762_v47 }
 0x417   : > { %v2696_v33 = vmul.f32 %v2692_v7, %v2634_v10  ;;  %v2534_v45 = vadd.f32 %v2533_v63, %v4964_v48  ;;  %v2523_v40 = vadd.f32 %v2522_v5, %v2521_v29  ;;  %v2604_v22 = vadd.f32 %v2603_v46, %v2602_v37  ;;  %v2613_v37 = vld [vmem:[#allocation2 + $0x50] sm:$0xff] }
 0x418   : > { %v2853_v42 = vsel %vm2848_vm10, %v2852_v60, %v2451_v6  ;;  %v2802_v38 = vpop.permute.xlu1 %2801  ;;  %v2769_v27 = vmul.f32 %v2765_v61, %v2707_v18  ;;  %v2777_v62 = vunpack.c.l.bf16 %v2774_v25  ;;  %v2807_v14 = vpop.permute.xlu0 %2806  ;;  %v2766_v4 = vunpack.c.h.bf16 %v2762_v47  ;;  %v2625_v29 = vld [vmem:[#allocation3 + $0x50] sm:$0xff]  ;;  %v2687_v6 = vld [vmem:[#allocation2 + $0x60] sm:$0xff] }
 0x419   : > { %2875 = vst.msk [vmem:[#allocation5 + $0x4] sm:$0x3] %vm623_vm0, %v2853_v42  ;;  %v2708_v32 = vadd.f32 %v2704_v52, %v2696_v33  ;;  %v2524_v20 = vrot.slane %v2523_v40, 1  ;;  %v2676_v21 = vadd.f32 %v2675_v49, %v2674_v23  ;;  %v2748_v3 = vsel %vm618_vm2, %v2737_v31, 0.0  ;;  %v2699_v31 = vld [vmem:[#allocation3 + $0x60] sm:$0xff] }
 0x41a   : > { %v2778_v13 = vunpack.c.h.bf16 %v2774_v25  ;;  %v2781_v15 = vadd.f32 %v2777_v62, %v2769_v27  ;;  %v2541_v44 = vunpack.c.l.bf16 %v2539_v59  ;;  %v2854_v0 = vrot.slane %v2534_v45, 7 }
 0x41b   : > { %v2738_v48 = vmul.f32 %v2733_v28, %v2708_v32  ;;  %v2770_v39 = vmul.f32 %v2766_v4, %v2708_v32  ;;  %v2525_v12 = vadd.f32 %v2524_v20, %v2523_v40  ;;  %v2605_v34 = vrot.slane %v2604_v22, 2 }
 0x41c   : > { %v2553_v11 = vunpack.c.l.bf16 %v2551_v41  ;;  %v2811_v54 = vmul.f32 %v2802_v38, %v2781_v15  ;;  %2883 = vst.msk [vmem:[#allocation6 + $0x10] sm:$0xff] %vm618_vm2, %v2781_v15  ;;  %v2570_v16 = vpop.permute.xlu1 %2569  ;;  %v2545_v1 = vmul.f32 %v2541_v44, %v4967_v30  ;;  %v2960_v10 = vadd.f32 1.0, %v5182_v36  ;;  %v2575_v55 = vpop.permute.xlu0 %2574 }
 0x41d   : > { %v2749_v8 = vsel %vm618_vm2, %v2738_v48, 0.0  ;;  %v2782_v58 = vadd.f32 %v2778_v13, %v2770_v39  ;;  %v2855_v53 = vsel %vm2848_vm10, %v2854_v0, %v2525_v12  ;;  %v2677_v35 = vrot.slane %v2676_v21, 4  ;;  %v3767_v56 = vpop.eup %3766  ;;  %v2761_v39 = vld [vmem:[#allocation2 + $0x70] sm:$0xff] }
 0x41e   : > { %v2750_v17 = vadd.f32 %v2749_v8, %v2748_v3  ;;  %2876 = vst.msk [vmem:[#allocation5 + $0x6] sm:$0x3] %vm623_vm0, %v2855_v53  ;;  %v2557_v24 = vadd.f32 %v2553_v11, %v2545_v1  ;;  %v2542_v26 = vunpack.c.h.bf16 %v2539_v59  ;;  %v2606_v63 = vadd.f32 %v2605_v34, %v2604_v22  ;;  %v2773_v11 = vld [vmem:[#allocation3 + $0x70] sm:$0xff] }
 0x41f   : > { %v2812_v51 = vmul.f32 %v2807_v14, %v2782_v58  ;;  %2884 = vst.msk [vmem:[#allocation6 + $0x18] sm:$0xff] %vm618_vm2, %v2782_v58  ;;  %v2822_v57 = vsel %vm618_vm2, %v2811_v54, 0.0  ;;  %v2554_v30 = vunpack.c.h.bf16 %v2551_v41  ;;  %v2615_v43 = vunpack.c.l.bf16 %v2613_v37 }
 0x420   : > { %v2587_v47 = vmul.f32 %v2570_v16, %v2557_v24  ;;  %v2546_v60 = vmul.f32 %v2542_v26, %v4956_v9  ;;  %3768 = vrcp.f32 %v2960_v10  ;;  %v2678_v18 = vadd.f32 %v2677_v35, %v2676_v21  ;;  %v2649_v45 = vpop.permute.xlu0 %2648 }
 0x421   : > { %v2823_v46 = vsel %vm618_vm2, %v2812_v51, 0.0  ;;  %v2751_v28 = vrot.slane %v2750_v17, 4  ;;  %v2644_v7 = vpop.permute.xlu1 %2643  ;;  %v2619_v23 = vmul.f32 %v2615_v43, %v2557_v24  ;;  %v2627_v49 = vunpack.c.l.bf16 %v2625_v29 }
 0x422   : > { %v2558_v5 = vadd.f32 %v2554_v30, %v2546_v60  ;;  %v2616_v25 = vunpack.c.h.bf16 %v2613_v37  ;;  %v2607_v33 = vrot.slane %v2606_v63, 1  ;;  %v2824_v52 = vadd.f32 %v2823_v46, %v2822_v57 }
 0x423   : > { %v2591_v61 = vsel %vm618_vm2, %v2587_v47, 0.0  ;;  %v2628_v42 = vunpack.c.h.bf16 %v2625_v29  ;;  %v2631_v22 = vadd.f32 %v2627_v49, %v2619_v23  ;;  %v2689_v59 = vunpack.c.l.bf16 %v2687_v6 }
 0x424   : > { %v2588_v40 = vmul.f32 %v2575_v55, %v2558_v5  ;;  %v2620_v9 = vmul.f32 %v2616_v25, %v2558_v5  ;;  %v2679_v32 = vrot.slane %v2678_v18, 2  ;;  %v2752_v38 = vadd.f32 %v2751_v28, %v2750_v17  ;;  %v2723_v1 = vpop.permute.xlu0 %2722 }
 0x425   : > { %v2701_v27 = vunpack.c.l.bf16 %v2699_v31  ;;  %v2690_v62 = vunpack.c.h.bf16 %v2687_v6  ;;  %v2661_v4 = vmul.f32 %v2644_v7, %v2631_v22  ;;  %v2693_v20 = vmul.f32 %v2689_v59, %v2631_v22  ;;  %v2718_v48 = vpop.permute.xlu1 %2717  ;;  %v3463_v59 = vld [vmem:[%s5183_s1] ss:$0 sm:$0xff] }
 0x426   : > { %v2592_v14 = vsel %vm618_vm2, %v2588_v40, 0.0  ;;  %v2632_v41 = vadd.f32 %v2628_v42, %v2620_v9  ;;  %v2961_v21 = vadd.f32 1.0, %v3767_v56  ;;  %v2825_v3 = vrot.slane %v2824_v52, 4 }
 0x427   : > { %v2593_v13 = vadd.f32 %v2592_v14, %v2591_v61  ;;  %v2702_v15 = vunpack.c.h.bf16 %v2699_v31  ;;  %v2665_v44 = vsel %vm618_vm2, %v2661_v4, 0.0  ;;  %v2705_v12 = vadd.f32 %v2701_v27, %v2693_v20 }
 0x428   : > { %v2662_v0 = vmul.f32 %v2649_v45, %v2632_v41  ;;  %v2694_v34 = vmul.f32 %v2690_v62, %v2632_v41  ;;  %v2608_v8 = vadd.f32 %v2607_v33, %v2606_v63  ;;  %v2680_v54 = vadd.f32 %v2679_v32, %v2678_v18  ;;  %v2797_v49 = vpop.permute.xlu0 %2796 }
 0x429   : > { %v2753_v58 = vrot.slane %v2752_v38, 2  ;;  %v2594_v16 = vrot.slane %v2593_v13, 4  ;;  %v2735_v10 = vmul.f32 %v2718_v48, %v2705_v12  ;;  %v2763_v35 = vunpack.c.l.bf16 %v2761_v39  ;;  %v2792_v47 = vpop.permute.xlu1 %2791 }
 0x42a   : > { %v2666_v36 = vsel %vm618_vm2, %v2662_v0, 0.0  ;;  %v2706_v53 = vadd.f32 %v2702_v15, %v2694_v34  ;;  %v3769_v17 = vpop.eup %3768  ;;  %v2826_v55 = vadd.f32 %v2825_v3, %v2824_v52  ;;  %v2775_v51 = vunpack.c.l.bf16 %v2773_v11 }
 0x42b   : > { %v2595_v37 = vadd.f32 %v2594_v16, %v2593_v13  ;;  %v2667_v56 = vadd.f32 %v2666_v36, %v2665_v44  ;;  %v2739_v24 = vsel %vm618_vm2, %v2735_v10, 0.0  ;;  %v2767_v57 = vmul.f32 %v2763_v35, %v2705_v12  ;;  %v5185_v10 = vld [vmem:[#allocation34_spill] sm:$0xff] }
 0x42c   : > { %v2736_v26 = vmul.f32 %v2723_v1, %v2706_v53  ;;  %v2764_v30 = vunpack.c.h.bf16 %v2761_v39  ;;  %v2681_v63 = vrot.slane %v2680_v54, 1  ;;  %v2776_v60 = vunpack.c.h.bf16 %v2773_v11 }
 0x42d   : > { %v2596_v29 = vrot.slane %v2595_v37, 2  ;;  %v2668_v46 = vrot.slane %v2667_v56, 4  ;;  %v2779_v18 = vadd.f32 %v2775_v51, %v2767_v57  ;;  %v2754_v7 = vadd.f32 %v2753_v58, %v2752_v38  ;;  %v5186_v51 = vld [vmem:[#allocation32_spill] sm:$0xff] }
 0x42e   : > { %v2740_v43 = vsel %vm618_vm2, %v2736_v26, 0.0  ;;  %v2768_v28 = vmul.f32 %v2764_v30, %v2706_v53  ;;  %v2827_v25 = vrot.slane %v2826_v55, 2  ;;  %3770 = vrcp.f32 %v2961_v21 }
 0x42f   : > { %v2597_v6 = vadd.f32 %v2596_v29, %v2595_v37  ;;  %v2669_v5 = vadd.f32 %v2668_v46, %v2667_v56  ;;  %v2741_v23 = vadd.f32 %v2740_v43, %v2739_v24  ;;  %v2809_v31 = vmul.f32 %v2792_v47, %v2779_v18  ;;  %2881 = vst.msk [vmem:[#allocation6] sm:$0xff] %vm618_vm2, %v2779_v18  ;;  %v2888_v47 = vld [vmem:[#allocation5 + $0x6] sm:$0x3] }
 0x430   : > { %v2780_v33 = vadd.f32 %v2776_v60, %v2768_v28  ;;  %v2856_v42 = vrot.slane %v2608_v8, 7  ;;  %v2682_v40 = vadd.f32 %v2681_v63, %v2680_v54  ;;  %v2755_v32 = vrot.slane %v2754_v7, 1  ;;  %v5184_v8 = vld [vmem:[#allocation33_spill] sm:$0xff] }
 0x431   : > { %v2598_v52 = vrot.slane %v2597_v6, 1  ;;  %v2670_v61 = vrot.slane %v2669_v5, 2  ;;  %v2742_v45 = vrot.slane %v2741_v23, 4  ;;  %v2813_v22 = vsel %vm618_vm2, %v2809_v31, 0.0 }
 0x432   : > { %v2810_v9 = vmul.f32 %v2797_v49, %v2780_v33  ;;  %2882 = vst.msk [vmem:[#allocation6 + $0x8] sm:$0xff] %vm618_vm2, %v2780_v33  ;;  %v2828_v62 = vadd.f32 %v2827_v25, %v2826_v55  ;;  %v2900_v3 = vmul.f32 %v3463_v59, %v4481_v2  ;;  %v2858_v13 = vrot.slane %v2682_v40, 7 }
 0x433   : > { %v2599_v50 = vadd.f32 %v2598_v52, %v2597_v6  ;;  %v2671_v38 = vadd.f32 %v2670_v61, %v2669_v5  ;;  %v2743_v27 = vadd.f32 %v2742_v45, %v2741_v23  ;;  %v2756_v48 = vadd.f32 %v2755_v32, %v2754_v7  ;;  %v2886_v6 = vld [vmem:[#allocation5 + $0x2] sm:$0x3]  ;;  %v2887_v5 = vld [vmem:[#allocation5 + $0x4] sm:$0x3]  ;;  %v2885_v52 = vld [vmem:[#allocation5] sm:$0x3] }
 0x434   : > { %v2814_v14 = vsel %vm618_vm2, %v2810_v9, 0.0  ;;  %v2829_v0 = vrot.slane %v2828_v62, 1  ;;  %v2966_v54 = vmul.f32 %v3769_v17, %v5184_v8  ;;  %v2904_v58 = vcombine.high %v2900_v3, %v2900_v3 }
 0x435   : > { %v2857_v4 = vsel %vm2848_vm10, %v2856_v42, %v2599_v50  ;;  %v2672_v41 = vrot.slane %v2671_v38, 1  ;;  %v2744_v20 = vrot.slane %v2743_v27, 2  ;;  %v2815_v21 = vadd.f32 %v2814_v14, %v2813_v22 }
 0x436   : > { %2877 = vst.msk [vmem:[#allocation5 + $0x8] sm:$0x3] %vm623_vm0, %v2857_v4  ;;  %v2860_v1 = vrot.slane %v2756_v48, 7  ;;  %v2901_v53 = vmul.f32 %v3463_v59, %v5185_v10  ;;  %v2830_v35 = vadd.f32 %v2829_v0, %v2828_v62  ;;  %v2970_v56 = vcombine.high %v2966_v54, %v2966_v54 }
 0x437   : > { %v2673_v15 = vadd.f32 %v2672_v41, %v2671_v38  ;;  %v2745_v39 = vadd.f32 %v2744_v20, %v2743_v27  ;;  %v2816_v44 = vrot.slane %v2815_v21, 4  ;;  %v2918_v24 = vrot.slane %v2904_v58, %v5186_v51 }
 0x438   : > { %v3771_v16 = vpop.eup %3770  ;;  %v2911_v57 = vrot.slane %v2900_v3, %v5186_v51  ;;  %v2928_v30 = vrot.slane %v2901_v53, %v5186_v51  ;;  %v2921_v63 = vcombine.high %v2901_v53, %v2901_v53  ;;  %v2862_v29 = vrot.slane %v2830_v35, 7 }
 0x439   : > { %v2859_v12 = vsel %vm2848_vm10, %v2858_v13, %v2673_v15  ;;  %v2746_v34 = vrot.slane %v2745_v39, 1  ;;  %v2817_v11 = vadd.f32 %v2816_v44, %v2815_v21  ;;  %v2967_v17 = vmul.f32 %v3771_v16, %v4440_v19 }
 0x43a   : > { %2878 = vst.msk [vmem:[#allocation5 + $0xa] sm:$0x3] %vm623_vm0, %v2859_v12  ;;  %v2984_v60 = vrot.slane %v2970_v56, %v5186_v51  ;;  %v2920_v43 = vcombine.high %v2918_v24, %v2918_v24  ;;  %v2977_v18 = vrot.slane %v2966_v54, %v5186_v51  ;;  %v2919_v49 = vcombine.high %v2911_v57, %v2911_v57 }
 0x43b   : > { %v2747_v2 = vadd.f32 %v2746_v34, %v2745_v39  ;;  %v2818_v36 = vrot.slane %v2817_v11, 2  ;;  %v2987_v28 = vcombine.high %v2967_v17, %v2967_v17  ;;  %v2994_v23 = vrot.slane %v2967_v17, %v5186_v51 }
 0x43c   : > { %v2936_v25 = vcombine.high %v2928_v30, %v2928_v30  ;;  %v2949_v31 = vadd.f32 %v2920_v43, %v2888_v47  ;;  %v2935_v33 = vrot.slane %v2921_v63, %v5186_v51  ;;  %v2986_v45 = vcombine.high %v2984_v60, %v2984_v60 }
 0x43d   : > { %v2861_v55 = vsel %vm2848_vm10, %v2860_v1, %v2747_v2  ;;  %v2819_v37 = vadd.f32 %v2818_v36, %v2817_v11  ;;  %v2889_v61 = vld [vmem:[#allocation5 + $0x8] sm:$0x3]  ;;  %v2947_v42 = vadd.f32 %v2919_v49, %v2886_v6  ;;  %v2948_v40 = vadd.f32 %v2918_v24, %v2887_v5 }
 0x43e   : > { %2879 = vst.msk [vmem:[#allocation5 + $0xc] sm:$0x3] %vm623_vm0, %v2861_v55  ;;  %v2985_v9 = vcombine.high %v2977_v18, %v2977_v18  ;;  %v3001_v59 = vrot.slane %v2987_v28, %v5186_v51  ;;  %v3002_v50 = vcombine.high %v2994_v23, %v2994_v23  ;;  %v2946_v38 = vadd.f32 %v2911_v57, %v2885_v52 }
 0x43f   : > { %v2820_v26 = vrot.slane %v2819_v37, 1  ;;  %v2950_v27 = vadd.f32 %v2928_v30, %v2889_v61  ;;  %v3015_v62 = vmul.f32 %v2986_v45, %v2949_v31  ;;  %v2937_v14 = vcombine.high %v2935_v33, %v2935_v33 }
 0x440   : > { %v3013_v41 = vmul.f32 %v2985_v9, %v2947_v42  ;;  %v3014_v20 = vmul.f32 %v2984_v60, %v2948_v40  ;;  %v3003_v3 = vcombine.high %v3001_v59, %v3001_v59  ;;  %v3012_v15 = vmul.f32 %v2977_v18, %v2946_v38 }
 0x441   : > { %v2821_v46 = vadd.f32 %v2820_v26, %v2819_v37  ;;  %v2890_v19 = vld [vmem:[#allocation5 + $0xa] sm:$0x3]  ;;  %v3016_v39 = vmul.f32 %v2994_v23, %v2950_v27 }
 0x442   : > { %v2951_v22 = vadd.f32 %v2936_v25, %v2890_v19  ;;  %v3029_v44 = vcombine.low %v3014_v20, %v3015_v62  ;;  %v3028_v34 = vcombine.low %v3012_v15, %v3013_v41 }
 0x443   : > { %v2863_v7 = vsel %vm2848_vm10, %v2862_v29, %v2821_v46 }
 0x444   : > { %2880 = vst.msk [vmem:[#allocation5 + $0xe] sm:$0x3] %vm623_vm0, %v2863_v7  ;;  %v3017_v21 = vmul.f32 %v3002_v50, %v2951_v22  ;;  %v3043_v8 = vrot.slane %v3029_v44, %v5186_v51  ;;  %v3036_v58 = vrot.slane %v3028_v34, %v5186_v51 }
 0x445   : > { %v2891_v32 = vld [vmem:[#allocation5 + $0xc] sm:$0x3] }
 0x446   : > { %v2952_v4 = vadd.f32 %v2935_v33, %v2891_v32  ;;  %v3045_v11 = vcombine.low %v3016_v39, %v3017_v21  ;;  %v3044_v2 = vcombine.low %v3036_v58, %v3043_v8 }
 0x448   : > { %v3018_v0 = vmul.f32 %v3001_v59, %v2952_v4  ;;  %v3053_v16 = vrot.slane %v3045_v11, %v5186_v51 }
 0x44b   : > { %v2892_v13 = vld [vmem:[#allocation5 + $0xe] sm:$0x3] }
 0x44c   : > { %v2953_v48 = vadd.f32 %v2937_v14, %v2892_v13 }
 0x44e   : > { %v3019_v12 = vmul.f32 %v3003_v3, %v2953_v48 }
 0x450   : > { %v3046_v54 = vcombine.low %v3018_v0, %v3019_v12 }
 0x452   : > { %v3060_v1 = vrot.slane %v3046_v54, %v5186_v51 }
 0x454   : > { %v3061_v36 = vcombine.low %v3053_v16, %v3060_v1 }
 0x456   : > { %v3064_v10 = vpack.c.bf16 %v3061_v36, %v3044_v2 }
 0x458   : > { %3531 = vmatmul.mubr.msk.bf16.vlgmr.msra.gmra.mrb[4].mxu0 %vm618_vm2, %v3064_v10 }
 0x52b   : > { %v3134_v53 = vpop.f32.mrb[4].mxu0 }
 0x52c   : > { %v3143_v35 = vcombine.high %v3134_v53, %v3134_v53  ;;  %v3150_v55 = vrot.slane %v3134_v53, %v5186_v51  ;;  %v3532_v37 = vpop.f32.mrb[5].mxu0 }
 0x52d   : > { %v3137_v56 = vpop.f32.mrb[6].mxu0 }
 0x52e   : > { %v3157_v24 = vrot.slane %v3143_v35, %v5186_v51  ;;  %v3158_v17 = vcombine.high %v3150_v55, %v3150_v55  ;;  %3186 = vst.msk [vmem:[#allocation17] sm:$0x3] %vm3185_vm12, %v3150_v55  ;;  %v3160_v26 = vcombine.high %v3137_v56, %v3137_v56  ;;  %v3167_v57 = vrot.slane %v3137_v56, %v5186_v51  ;;  %v3533_v30 = vpop.f32.mrb[7].mxu0 }
 0x530   : > { %v3159_v63 = vcombine.high %v3157_v24, %v3157_v24  ;;  %3187 = vst.msk [vmem:[#allocation17 + $0x2] sm:$0x3] %vm3185_vm12, %v3158_v17  ;;  %3188 = vst.msk [vmem:[#allocation17 + $0x4] sm:$0x3] %vm3185_vm12, %v3157_v24  ;;  %v3174_v29 = vrot.slane %v3160_v26, %v5186_v51  ;;  %v3175_v46 = vcombine.high %v3167_v57, %v3167_v57 }
 0x531   : > { %3190 = vst.msk [vmem:[#allocation17 + $0x8] sm:$0x3] %vm3185_vm12, %v3167_v57 }
 0x532   : > { %3189 = vst.msk [vmem:[#allocation17 + $0x6] sm:$0x3] %vm3185_vm12, %v3159_v63  ;;  %v3176_v47 = vcombine.high %v3174_v29, %v3174_v29  ;;  %3191 = vst.msk [vmem:[#allocation17 + $0xa] sm:$0x3] %vm3185_vm12, %v3175_v46 }
 0x533   : > { %3192 = vst.msk [vmem:[#allocation17 + $0xc] sm:$0x3] %vm3185_vm12, %v3174_v29 }
 0x534   : > { %3193 = vst.msk [vmem:[#allocation17 + $0xe] sm:$0x3] %vm3185_vm12, %v3176_v47 }
 0x535   : > { %3931 = shalt.err (!%p3928_p10)
}
 0x536   : > { %s5187_s17 = sld [smem:[#allocation51_spill]] }
 0x53c   : > { %s5188_s25 = smov %s5187_s17  ;;  %s3932_s27 = scalar_lea.hbm %s5187_s17, 256 }
 0x53d   : > { %p3933_p6 = scmp.ne.s32.totalorder %s5188_s25, %s3932_s27  ;;  %p3938_p11 = scmp.lt.u32.totalorder %s3932_s27, %s5188_s25 }
 0x53f   : > { %p3934_p9 = pnand %p3933_p6, %p3578_p13 }
 0x541   : > { %p3935_p4 = pneg %p3934_p9 }
 0x543   : > { %p3940_p8 = pnand %p3938_p11, %p3935_p4 }
 0x545   : > { %3943 = shalt.err (!%p3940_p8)
}
 0x546   : > { %s4022_s30 = smov 32   ;;  %s4023_s11 = smov 2  }
 0x547   : > { %3561 = dma.vmem_to_hbm [thread:$0]  (%p3578_p13), %s4326_s26, 256, %s5188_s25, [#allocation11], %s4022_s30, %s4022_s30, %s4023_s11  }
 0x548   : > { %3985 = dma.done.wait (%p3578_p13), [#allocation11], 256  }
 0x549   : > { %3987 = vsyncadd (%p3578_p13), [#allocation11], 4294967040 }
 0x54a PF: > { %s5189_s15 = sld [smem:[#allocation29_spill]]  ;;  %s5190_s28 = sld [smem:[#allocation27_spill]] }
 0x54b   : > { %s5191_s19 = sld [smem:[#allocation31_spill]]  ;;  %s5192_s20 = sld [smem:[#allocation28_spill]] }
 0x54c   : > { %s5193_s21 = sld [smem:[#allocation30_spill]]  ;;  %s5194_s17 = smov %s3994_s18 }
 0x550   : > { %s31_s22 = sadd.s32 1, %s5189_s15   ;;  %s5195_s18 = smov %s5190_s28 }
 0x551   : > { %p28_p5 = scmp.ge.s32.totalorder %s31_s22, 4  }
 0x553   :  { %30 = sbr.rel (!%p28_p5) target bundleno = 17 (0x11), region = 190 }
 0x55a   :  { %3216 = vsyncpa [#allocation10], 1 }
 0x55b   :  { %3218 = vsyncpa [#allocation10 + $0x1], 1 }
 0x55c   :  { %3219 = vsyncpa [#allocation13], 1 }
 0x55d   :  { %3221 = vsyncpa [#allocation13 + $0x1], 1 }
 0x55e   :  { %3222 = vsyncpa [#allocation16], 1 }
 0x55f   :  { %3224 = vsyncpa [#allocation16 + $0x1], 1 }
 0x560   :  { %3225 = vsyncpa [#allocation11], 1 }
 0x561   :  { %3227 = vsyncpa [#allocation11 + $0x1], 1 }
 0x562   :  { %3228 = vsyncmov [#allocation8] }
 0x565   :  { %s3229_s23 = vpop.sfrf %3228 }
 0x566   :  { %p3473_p0 = scmp.ne.s32.totalorder %s3229_s23, 0 }
 0x568   :  { %3233 = shalt.err (%p3473_p0)  }

</bundles_post_ra>
